<compile_context>
chip_gen: v5e
topology: v5e:2x2
jax: 0.10.0
libtpu: 0.0.40
codegen_flags: <defaults>
</compile_context>

<pallas_src>
import functools

import jax
import jax.numpy as jnp
from jax.experimental import pallas as pl
from jax.experimental.pallas import tpu as pltpu

NF = 64            # nf default in HKNet.__init__
UPSCALE = 1        # upscale default in HKNet.__init__
N_ROT = 4          # rotations per kernel-type
MAX_TILE_P = 1024  # pixel tile on the lane axis (multiple of 128)

# ---------------------------------------------------------------------------
# Unit configuration (HDBUnit for the MSB branch, HDUnit for the LSB branch).
# TODO(synk): rot_dict / pad_dict / pixel-offsets / avg_factor reconstructed
# from the HKLUT paper; the original hklut units.py was not provided.
# pad tuples follow F.pad order: (left, right, top, bottom).
HDB_CFG = dict(
    rot={'h': [0, 1, 2, 3], 'd': [0, 1, 2, 3], 'b': [0, 1, 2, 3]},
    pad={'h': (0, 1, 0, 0), 'd': (0, 1, 0, 1), 'b': (0, 2, 0, 2)},
    offset={'h': (0, 1), 'd': (1, 1), 'b': (2, 2)},   # (dy, dx) of 2nd sampled pixel
    avg=12.0,
)
HD_CFG = dict(
    rot={'h': [0, 1, 2, 3], 'd': [0, 1, 2, 3]},
    pad={'h': (0, 1, 0, 0), 'd': (0, 1, 0, 1)},
    offset={'h': (0, 1), 'd': (1, 1)},
    avg=8.0,
)
CFG = {'hd': HD_CFG, 'hdb': HDB_CFG}


# ---------------------------------------------------------------------------
# Fused Pallas kernel: per-pixel MLP (2 -> nf -> nf -> nf -> 1), ReLU acts,
# tanh output, *127 + floor, 4 rotations per grid step via block-diagonal
# weights, accumulated per branch (msb / lsb).
# Layout: channels on sublanes, pixels on lanes.
def _fused_unit_kernel(x_ref, w1_ref, b1_ref, w2_ref, b2_ref, w3_ref, b3_ref,
                       w4_ref, b4_ref, msb_ref, lsb_ref, *,
                       n_msb_units, n_rot, nf):
    u = pl.program_id(1)

    @pl.when(u == 0)
    def _init():
        msb_ref[...] = jnp.zeros_like(msb_ref)
        lsb_ref[...] = jnp.zeros_like(lsb_ref)

    x = x_ref[0]                                   # (n_rot, 2, TILE_P)  f32
    w1 = w1_ref[0]                                 # (nf, 2)             f32
    b1 = b1_ref[0]                                 # (nf, 1)             f32
    w1a = w1[:, 0:1]
    w1b = w1[:, 1:2]

    # layer 1 (K=2): VPU broadcast-FMA per rotation; stack rotations on the
    # channel axis so layers 2/3 run as one full-width 256-deep MXU matmul.
    hs = []
    for s in range(n_rot):
        h_s = w1a * x[s, 0:1, :] + w1b * x[s, 1:2, :] + b1   # (nf, TILE_P)
        hs.append(jnp.maximum(h_s, 0.0))
    h = jnp.concatenate(hs, axis=0)                # (n_rot*nf, TILE_P)  f32

    # layers 2 / 3: block-diagonal (n_rot*nf x n_rot*nf) MXU matmuls,
    # bf16 inputs, f32 accumulation.
    h = jnp.dot(w2_ref[0], h.astype(jnp.bfloat16),
                preferred_element_type=jnp.float32) + b2_ref[0]
    h = jnp.maximum(h, 0.0)
    h = jnp.dot(w3_ref[0], h.astype(jnp.bfloat16),
                preferred_element_type=jnp.float32) + b3_ref[0]
    h = jnp.maximum(h, 0.0)

    # layer 4 (nf -> 1): VPU multiply + per-rotation cross-sublane reduce.
    t = h * w4_ref[0]                              # (n_rot*nf, TILE_P)
    b4 = b4_ref[0]                                 # (1, 1)

    # Unit output activation, *127 bias and floor_func folded in (applied per
    # rotation BEFORE summing, matching the reference loop).
    # TODO(synk): tanh here assumes the SR-LUT style unit head; the network
    # applies a second tanh on the summed branch outputs (matches reference).
    total = None
    for s in range(n_rot):
        o = jnp.sum(t[s * nf:(s + 1) * nf, :], axis=0, keepdims=True) + b4
        c = jnp.floor(127.0 * jnp.tanh(o))         # (1, TILE_P)
        total = c if total is None else total + c

    @pl.when(u < n_msb_units)
    def _acc_msb():
        msb_ref[...] += total

    @pl.when(u >= n_msb_units)
    def _acc_lsb():
        lsb_ref[...] += total


def fused_lut_mlp(x_feat, stacked, *, n_msb_units, tile_p, nf=NF):
    """x_feat: (U, n_rot, 2, P_pad) f32 features (rotations grouped by unit).
    Returns (msb_sum, lsb_sum), each (1, P_pad) f32."""
    n_units, n_rot, two, p_pad = x_feat.shape
    assert two == 2 and p_pad % tile_p == 0
    n_tiles = p_pad // tile_p
    w1s, b1s, w2s, b2s, w3s, b3s, w4s, b4s = stacked

    def x_map(i, u):
        return (u, 0, 0, i)

    def w_map(i, u):
        return (u, 0, 0)

    def o_map(i, u):
        return (0, i)

    def wspec(arr):
        return pl.BlockSpec((1,) + tuple(arr.shape[1:]), w_map)

    kernel = functools.partial(_fused_unit_kernel,
                               n_msb_units=n_msb_units, n_rot=n_rot, nf=nf)
    grid_spec = pltpu.PrefetchScalarGridSpec(
        num_scalar_prefetch=0,
        grid=(n_tiles, n_units),
        in_specs=[pl.BlockSpec((1, n_rot, 2, tile_p), x_map),
                  wspec(w1s), wspec(b1s), wspec(w2s), wspec(b2s),
                  wspec(w3s), wspec(b3s), wspec(w4s), wspec(b4s)],
        out_specs=(pl.BlockSpec((1, tile_p), o_map),
                   pl.BlockSpec((1, tile_p), o_map)),
    )
    return pl.pallas_call(
        kernel,
        out_shape=(jax.ShapeDtypeStruct((1, p_pad), jnp.float32),
                   jax.ShapeDtypeStruct((1, p_pad), jnp.float32)),
        grid_spec=grid_spec,
        compiler_params=pltpu.CompilerParams(
            dimension_semantics=("parallel", "arbitrary")),
    )(x_feat, w1s, b1s, w2s, b2s, w3s, b3s, w4s, b4s)


# ---------------------------------------------------------------------------
# JAX glue: bit-plane slicing, rotation/reflect-pad feature gathering.
def bit_plane_slicing(l255, bit_mask='11110000'):
    # TODO(synk): reconstructed; LSB is shifted up to occupy the full 8-bit range.
    n_msb = bit_mask.count('1')
    n_lsb = 8 - n_msb
    li = jnp.floor(l255)
    msb = jnp.floor(li / (2.0 ** n_lsb)) * (2.0 ** n_lsb)   # bits 7..4
    lsb = (li - msb) * (2.0 ** n_msb)                       # bits 3..0 << 4
    return msb, lsb


def _unit_rot_features(img, ktype, cfg):
    """img: (N,1,H,W).  Returns, per rotation, (x0, x1) each (N,H,W) already
    rotated BACK to the un-rotated pixel order, so the per-pixel MLP outputs
    of all rotations/units can be accumulated directly in the kernel."""
    pad_l, pad_r, pad_t, pad_b = cfg['pad'][ktype]
    dy, dx = cfg['offset'][ktype]
    out = []
    for r in cfg['rot'][ktype]:
        rot = jnp.rot90(img, k=r, axes=(2, 3))
        padded = jnp.pad(rot, ((0, 0), (0, 0), (pad_t, pad_b), (pad_l, pad_r)),
                         mode='reflect')
        hp, wp = padded.shape[2], padded.shape[3]
        h, w = hp - dy, wp - dx
        x0 = padded[:, 0, 0:h, 0:w]
        x1 = padded[:, 0, dy:dy + h, dx:dx + w]
        kb = (4 - r) % 4
        out.append((jnp.rot90(x0, k=kb, axes=(1, 2)),
                    jnp.rot90(x1, k=kb, axes=(1, 2))))
    return out


def stack_unit_params(unit_params, n_rot=N_ROT):
    """unit_params: list (per unit, in eval order) of (w1,b1,...,w4,b4) in
    conventional (in, out) orientation.  Returns out-major stacked tensors;
    the nf x nf weights are expanded to block-diagonal (n_rot*nf)^2 and cast
    to bf16 for a full-width MXU contraction."""
    eye = jnp.eye(n_rot, dtype=jnp.float32)
    cols = {k: [] for k in ('w1', 'b1', 'w2', 'b2', 'w3', 'b3', 'w4', 'b4')}
    for (w1, b1, w2, b2, w3, b3, w4, b4) in unit_params:
        cols['w1'].append(w1.T)                                          # (nf, 2)
        cols['b1'].append(b1.reshape(-1, 1))                             # (nf, 1)
        cols['w2'].append(jnp.kron(eye, w2.T).astype(jnp.bfloat16))      # (R*nf, R*nf)
        cols['b2'].append(jnp.tile(b2.reshape(-1, 1), (n_rot, 1)))       # (R*nf, 1)
        cols['w3'].append(jnp.kron(eye, w3.T).astype(jnp.bfloat16))
        cols['b3'].append(jnp.tile(b3.reshape(-1, 1), (n_rot, 1)))
        cols['w4'].append(jnp.tile(w4, (n_rot, 1)))                      # (R*nf, 1)
        cols['b4'].append(b4.reshape(1, 1))                              # (1, 1)
    order = ('w1', 'b1', 'w2', 'b2', 'w3', 'b3', 'w4', 'b4')
    return tuple(jnp.stack(cols[k], axis=0) for k in order)


def _round_up(x, m):
    return ((x + m - 1) // m) * m


def _choose_tile_p(p):
    t = MAX_TILE_P
    while t > 128 and (t // 2) >= p:
        t //= 2
    return t


def hknet_forward(x, params, msb='hdb', lsb='hd', upscale=UPSCALE):
    # upscale == 1: bilinear F.interpolate(scale_factor=1) is the identity.
    # TODO(synk): bilinear upsampling path for upscale > 1 not implemented.
    assert upscale == 1
    y = x[:, 0:1]
    cb = x[:, 1:2]
    cr = x[:, 2:3]
    n, _, h, w = y.shape

    batch_l255 = jnp.floor(y * 255.0)
    msb_img, lsb_img = bit_plane_slicing(batch_l255, '11110000')
    msb_img = msb_img / 255.0
    lsb_img = lsb_img / 255.0

    # ---- build the fused eval stack: (U, n_rot, 2, P) features, unit order =
    #      msb kernel-types then lsb kernel-types ----
    feats, per_unit_params = [], []
    n_msb_units = len(msb)
    for branch, img, types in (('msb', msb_img, msb), ('lsb', lsb_img, lsb)):
        cfg = CFG[types]
        for ktype in types:
            per_unit_params.append(params[branch][ktype])
            rot_feats = []
            for (x0, x1) in _unit_rot_features(img, ktype, cfg):
                rot_feats.append(
                    jnp.stack([x0.reshape(-1), x1.reshape(-1)], axis=0))  # (2, P)
            feats.append(jnp.stack(rot_feats, axis=0))                    # (R, 2, P)
    x_feat = jnp.stack(feats, axis=0)                  # (U, R, 2, P) f32

    p_rows = n * h * w
    tile_p = _choose_tile_p(p_rows)
    p_pad = _round_up(p_rows, tile_p)
    if p_pad != p_rows:
        x_feat = jnp.pad(x_feat, ((0, 0), (0, 0), (0, 0), (0, p_pad - p_rows)))

    stacked = stack_unit_params(per_unit_params, n_rot=N_ROT)
    msb_sum, lsb_sum = fused_lut_mlp(x_feat, stacked,
                                     n_msb_units=n_msb_units, tile_p=tile_p)

    msb_sum = msb_sum[0, :p_rows].reshape(n, h, w)[:, None]
    lsb_sum = lsb_sum[0, :p_rows].reshape(n, h, w)[:, None]
    msb_out = msb_sum / CFG[msb]['avg'] / 255.0
    lsb_out = lsb_sum / CFG[lsb]['avg'] / 255.0
    sb = jnp.tanh(msb_out + lsb_out)
    return jnp.concatenate([y + sb, cb, cr], axis=1)


# ---------------------------------------------------------------------------
# Deterministic parameter init (conventional (in, out) orientation).
def init_unit_params(key, nf=NF, upscale=UPSCALE):
    dims = [(2, nf), (nf, nf), (nf, nf), (nf, upscale * upscale)]
    params = []
    for d in dims:
        key, kw, kb = jax.random.split(key, 3)
        wgt = jax.random.normal(kw, d, jnp.float32) / jnp.sqrt(jnp.float32(d[0]))
        b = jax.random.normal(kb, (1, d[1]), jnp.float32) * 0.01
        params += [wgt, b]
    return key, tuple(params)


def init_hknet_params(seed=0, msb='hdb', lsb='hd', nf=NF, upscale=UPSCALE):
    key = jax.random.PRNGKey(seed)
    params = {'msb': {}, 'lsb': {}}
    for ktype in msb:
        key, p = init_unit_params(key, nf, upscale)
        params['msb'][ktype] = p
    for ktype in lsb:
        key, p = init_unit_params(key, nf, upscale)
        params['lsb'][ktype] = p
    return params


# ---------------------------------------------------------------------------
if __name__ == "__main__":
    params = init_hknet_params(seed=0)

    # Input: NCHW, 3 channels = (Y, Cb, Cr), values in [0, 1).
    key = jax.random.PRNGKey(0)
    x = jax.random.uniform(key, (2, 3, 16, 16), dtype=jnp.float32)

    fwd = jax.jit(functools.partial(hknet_forward, msb='hdb', lsb='hd', upscale=1))
    out = fwd(x, params)
    out = jax.block_until_ready(out)

    assert out.shape == (2, 3, 16, 16), out.shape
    assert bool(jnp.all(jnp.isfinite(out)))
    print("KERNEL_OK")
</pallas_src>

<mosaic_0001>
module attributes {stable_mosaic.version = 11 : i64} {
  func.func @_fused_unit_kernel(%arg0: i32, %arg1: i32, %arg2: memref<1x4x2x512xf32, #tpu.memory_space<vmem>>, %arg3: memref<1x64x2xf32, #tpu.memory_space<vmem>>, %arg4: memref<1x64x1xf32, #tpu.memory_space<vmem>>, %arg5: memref<1x256x256xbf16, #tpu.memory_space<vmem>>, %arg6: memref<1x256x1xf32, #tpu.memory_space<vmem>>, %arg7: memref<1x256x256xbf16, #tpu.memory_space<vmem>>, %arg8: memref<1x256x1xf32, #tpu.memory_space<vmem>>, %arg9: memref<1x256x1xf32, #tpu.memory_space<vmem>>, %arg10: memref<1x1x1xf32, #tpu.memory_space<vmem>>, %arg11: memref<1x512xf32, #tpu.memory_space<vmem>>, %arg12: memref<1x512xf32, #tpu.memory_space<vmem>>) attributes {dimension_semantics = [#tpu.dimension_semantics<parallel>, #tpu.dimension_semantics<arbitrary>], iteration_bounds = array<i64: 1, 5>, scalar_prefetch = 0 : i64, scratch_operands = 0 : i64, tpu.core_type = #tpu.core_type<tc>, window_params = [{transform_indices = @transform_0, window_bounds = array<i64: 1, 4, 2, 512>}, {transform_indices = @transform_1, window_bounds = array<i64: 1, 64, 2>}, {transform_indices = @transform_2, window_bounds = array<i64: 1, 64, 1>}, {transform_indices = @transform_3, window_bounds = array<i64: 1, 256, 256>}, {transform_indices = @transform_4, window_bounds = array<i64: 1, 256, 1>}, {transform_indices = @transform_5, window_bounds = array<i64: 1, 256, 256>}, {transform_indices = @transform_6, window_bounds = array<i64: 1, 256, 1>}, {transform_indices = @transform_7, window_bounds = array<i64: 1, 256, 1>}, {transform_indices = @transform_8, window_bounds = array<i64: 1, 1, 1>}, {transform_indices = @transform_9, window_bounds = array<i64: 1, 512>}, {transform_indices = @transform_10, window_bounds = array<i64: 1, 512>}]} {
    %c0_i32 = arith.constant 0 : i32
    %0 = arith.cmpi eq, %arg1, %c0_i32 : i32
    %1 = arith.extui %0 : i1 to i32
    %c0_i32_0 = arith.constant 0 : i32
    %2 = arith.cmpi ne, %1, %c0_i32_0 : i32
    scf.if %2 {
      %cst_46 = arith.constant 0.000000e+00 : f32
      %143 = vector.broadcast %cst_46 : f32 to vector<1x512xf32>
      %c0_47 = arith.constant 0 : index
      %c0_48 = arith.constant 0 : index
      %144 = vector.load %arg11[%c0_47, %c0_48] : memref<1x512xf32, #tpu.memory_space<vmem>>, vector<1x512xf32>
      tpu.vector_store %arg11[%c0_47, %c0_48], %143 {strides = array<i32>} : memref<1x512xf32, #tpu.memory_space<vmem>>, vector<1x512xf32>,
      %cst_49 = arith.constant 0.000000e+00 : f32
      %145 = vector.broadcast %cst_49 : f32 to vector<1x512xf32>
      %c0_50 = arith.constant 0 : index
      %c0_51 = arith.constant 0 : index
      %146 = vector.load %arg12[%c0_50, %c0_51] : memref<1x512xf32, #tpu.memory_space<vmem>>, vector<1x512xf32>
      tpu.vector_store %arg12[%c0_50, %c0_51], %145 {strides = array<i32>} : memref<1x512xf32, #tpu.memory_space<vmem>>, vector<1x512xf32>,
    } else {
    }
    %c0 = arith.constant 0 : index
    %c0_1 = arith.constant 0 : index
    %c0_2 = arith.constant 0 : index
    %c0_3 = arith.constant 0 : index
    %3 = vector.load %arg2[%c0, %c0_1, %c0_2, %c0_3] : memref<1x4x2x512xf32, #tpu.memory_space<vmem>>, vector<1x4x2x512xf32>
    %4 = vector.shape_cast %3 : vector<1x4x2x512xf32> to vector<4x2x512xf32>
    %c0_4 = arith.constant 0 : index
    %c0_5 = arith.constant 0 : index
    %c0_6 = arith.constant 0 : index
    %5 = vector.load %arg3[%c0_4, %c0_5, %c0_6] : memref<1x64x2xf32, #tpu.memory_space<vmem>>, vector<1x64x2xf32>
    %6 = vector.shape_cast %5 : vector<1x64x2xf32> to vector<64x2xf32>
    %c0_7 = arith.constant 0 : index
    %c0_8 = arith.constant 0 : index
    %c0_9 = arith.constant 0 : index
    %7 = vector.load %arg4[%c0_7, %c0_8, %c0_9] : memref<1x64x1xf32, #tpu.memory_space<vmem>>, vector<1x64x1xf32>
    %8 = vector.shape_cast %7 : vector<1x64x1xf32> to vector<64x1xf32>
    %9 = vector.extract_strided_slice %6 {offsets = [0, 0], sizes = [64, 1], strides = [1, 1]} : vector<64x2xf32> to vector<64x1xf32>
    %10 = vector.extract_strided_slice %6 {offsets = [0, 1], sizes = [64, 1], strides = [1, 1]} : vector<64x2xf32> to vector<64x1xf32>
    %11 = vector.extract_strided_slice %4 {offsets = [0, 0, 0], sizes = [1, 1, 512], strides = [1, 1, 1]} : vector<4x2x512xf32> to vector<1x1x512xf32>
    %12 = vector.shape_cast %11 : vector<1x1x512xf32> to vector<1x512xf32>
    %13 = vector.broadcast %9 : vector<64x1xf32> to vector<64x512xf32>
    %14 = vector.broadcast %12 : vector<1x512xf32> to vector<64x512xf32>
    %15 = arith.mulf %13, %14 : vector<64x512xf32>
    %16 = vector.extract_strided_slice %4 {offsets = [0, 1, 0], sizes = [1, 1, 512], strides = [1, 1, 1]} : vector<4x2x512xf32> to vector<1x1x512xf32>
    %17 = vector.shape_cast %16 : vector<1x1x512xf32> to vector<1x512xf32>
    %18 = vector.broadcast %10 : vector<64x1xf32> to vector<64x512xf32>
    %19 = vector.broadcast %17 : vector<1x512xf32> to vector<64x512xf32>
    %20 = arith.mulf %18, %19 : vector<64x512xf32>
    %21 = arith.addf %15, %20 : vector<64x512xf32>
    %22 = vector.broadcast %8 : vector<64x1xf32> to vector<64x512xf32>
    %23 = arith.addf %21, %22 : vector<64x512xf32>
    %cst = arith.constant 0.000000e+00 : f32
    %24 = vector.broadcast %cst : f32 to vector<64x512xf32>
    %25 = arith.maximumf %23, %24 : vector<64x512xf32>
    %26 = vector.extract_strided_slice %4 {offsets = [1, 0, 0], sizes = [1, 1, 512], strides = [1, 1, 1]} : vector<4x2x512xf32> to vector<1x1x512xf32>
    %27 = vector.shape_cast %26 : vector<1x1x512xf32> to vector<1x512xf32>
    %28 = vector.broadcast %9 : vector<64x1xf32> to vector<64x512xf32>
    %29 = vector.broadcast %27 : vector<1x512xf32> to vector<64x512xf32>
    %30 = arith.mulf %28, %29 : vector<64x512xf32>
    %31 = vector.extract_strided_slice %4 {offsets = [1, 1, 0], sizes = [1, 1, 512], strides = [1, 1, 1]} : vector<4x2x512xf32> to vector<1x1x512xf32>
    %32 = vector.shape_cast %31 : vector<1x1x512xf32> to vector<1x512xf32>
    %33 = vector.broadcast %10 : vector<64x1xf32> to vector<64x512xf32>
    %34 = vector.broadcast %32 : vector<1x512xf32> to vector<64x512xf32>
    %35 = arith.mulf %33, %34 : vector<64x512xf32>
    %36 = arith.addf %30, %35 : vector<64x512xf32>
    %37 = vector.broadcast %8 : vector<64x1xf32> to vector<64x512xf32>
    %38 = arith.addf %36, %37 : vector<64x512xf32>
    %cst_10 = arith.constant 0.000000e+00 : f32
    %39 = vector.broadcast %cst_10 : f32 to vector<64x512xf32>
    %40 = arith.maximumf %38, %39 : vector<64x512xf32>
    %41 = vector.extract_strided_slice %4 {offsets = [2, 0, 0], sizes = [1, 1, 512], strides = [1, 1, 1]} : vector<4x2x512xf32> to vector<1x1x512xf32>
    %42 = vector.shape_cast %41 : vector<1x1x512xf32> to vector<1x512xf32>
    %43 = vector.broadcast %9 : vector<64x1xf32> to vector<64x512xf32>
    %44 = vector.broadcast %42 : vector<1x512xf32> to vector<64x512xf32>
    %45 = arith.mulf %43, %44 : vector<64x512xf32>
    %46 = vector.extract_strided_slice %4 {offsets = [2, 1, 0], sizes = [1, 1, 512], strides = [1, 1, 1]} : vector<4x2x512xf32> to vector<1x1x512xf32>
    %47 = vector.shape_cast %46 : vector<1x1x512xf32> to vector<1x512xf32>
    %48 = vector.broadcast %10 : vector<64x1xf32> to vector<64x512xf32>
    %49 = vector.broadcast %47 : vector<1x512xf32> to vector<64x512xf32>
    %50 = arith.mulf %48, %49 : vector<64x512xf32>
    %51 = arith.addf %45, %50 : vector<64x512xf32>
    %52 = vector.broadcast %8 : vector<64x1xf32> to vector<64x512xf32>
    %53 = arith.addf %51, %52 : vector<64x512xf32>
    %cst_11 = arith.constant 0.000000e+00 : f32
    %54 = vector.broadcast %cst_11 : f32 to vector<64x512xf32>
    %55 = arith.maximumf %53, %54 : vector<64x512xf32>
    %56 = vector.extract_strided_slice %4 {offsets = [3, 0, 0], sizes = [1, 1, 512], strides = [1, 1, 1]} : vector<4x2x512xf32> to vector<1x1x512xf32>
    %57 = vector.shape_cast %56 : vector<1x1x512xf32> to vector<1x512xf32>
    %58 = vector.broadcast %9 : vector<64x1xf32> to vector<64x512xf32>
    %59 = vector.broadcast %57 : vector<1x512xf32> to vector<64x512xf32>
    %60 = arith.mulf %58, %59 : vector<64x512xf32>
    %61 = vector.extract_strided_slice %4 {offsets = [3, 1, 0], sizes = [1, 1, 512], strides = [1, 1, 1]} : vector<4x2x512xf32> to vector<1x1x512xf32>
    %62 = vector.shape_cast %61 : vector<1x1x512xf32> to vector<1x512xf32>
    %63 = vector.broadcast %10 : vector<64x1xf32> to vector<64x512xf32>
    %64 = vector.broadcast %62 : vector<1x512xf32> to vector<64x512xf32>
    %65 = arith.mulf %63, %64 : vector<64x512xf32>
    %66 = arith.addf %60, %65 : vector<64x512xf32>
    %67 = vector.broadcast %8 : vector<64x1xf32> to vector<64x512xf32>
    %68 = arith.addf %66, %67 : vector<64x512xf32>
    %cst_12 = arith.constant 0.000000e+00 : f32
    %69 = vector.broadcast %cst_12 : f32 to vector<64x512xf32>
    %70 = arith.maximumf %68, %69 : vector<64x512xf32>
    %71 = tpu.concatenate %25, %40, %55, %70 in 0 : vector<64x512xf32>, vector<64x512xf32>, vector<64x512xf32>, vector<64x512xf32> -> vector<256x512xf32>
    %c0_13 = arith.constant 0 : index
    %c0_14 = arith.constant 0 : index
    %c0_15 = arith.constant 0 : index
    %72 = vector.load %arg5[%c0_13, %c0_14, %c0_15] : memref<1x256x256xbf16, #tpu.memory_space<vmem>>, vector<1x256x256xbf16>
    %73 = vector.shape_cast %72 : vector<1x256x256xbf16> to vector<256x256xbf16>
    %74 = arith.truncf %71 : vector<256x512xf32> to vector<256x512xbf16>
    %cst_16 = arith.constant dense<0.000000e+00> : vector<256x512xf32>
    %75 = tpu.matmul %73, %74, %cst_16 {dimension_numbers = #tpu.dot_dimension_numbers<[1], [0], [0], [1], [0, 0, 1, 1], [], []>} : vector<256x256xbf16>, vector<256x512xbf16>, vector<256x512xf32> -> vector<256x512xf32>
    %c0_17 = arith.constant 0 : index
    %c0_18 = arith.constant 0 : index
    %c0_19 = arith.constant 0 : index
    %76 = vector.load %arg6[%c0_17, %c0_18, %c0_19] : memref<1x256x1xf32, #tpu.memory_space<vmem>>, vector<1x256x1xf32>
    %77 = vector.shape_cast %76 : vector<1x256x1xf32> to vector<256x1xf32>
    %78 = vector.broadcast %77 : vector<256x1xf32> to vector<256x512xf32>
    %79 = arith.addf %75, %78 : vector<256x512xf32>
    %cst_20 = arith.constant 0.000000e+00 : f32
    %80 = vector.broadcast %cst_20 : f32 to vector<256x512xf32>
    %81 = arith.maximumf %79, %80 : vector<256x512xf32>
    %c0_21 = arith.constant 0 : index
    %c0_22 = arith.constant 0 : index
    %c0_23 = arith.constant 0 : index
    %82 = vector.load %arg7[%c0_21, %c0_22, %c0_23] : memref<1x256x256xbf16, #tpu.memory_space<vmem>>, vector<1x256x256xbf16>
    %83 = vector.shape_cast %82 : vector<1x256x256xbf16> to vector<256x256xbf16>
    %84 = arith.truncf %81 : vector<256x512xf32> to vector<256x512xbf16>
    %cst_24 = arith.constant dense<0.000000e+00> : vector<256x512xf32>
    %85 = tpu.matmul %83, %84, %cst_24 {dimension_numbers = #tpu.dot_dimension_numbers<[1], [0], [0], [1], [0, 0, 1, 1], [], []>} : vector<256x256xbf16>, vector<256x512xbf16>, vector<256x512xf32> -> vector<256x512xf32>
    %c0_25 = arith.constant 0 : index
    %c0_26 = arith.constant 0 : index
    %c0_27 = arith.constant 0 : index
    %86 = vector.load %arg8[%c0_25, %c0_26, %c0_27] : memref<1x256x1xf32, #tpu.memory_space<vmem>>, vector<1x256x1xf32>
    %87 = vector.shape_cast %86 : vector<1x256x1xf32> to vector<256x1xf32>
    %88 = vector.broadcast %87 : vector<256x1xf32> to vector<256x512xf32>
    %89 = arith.addf %85, %88 : vector<256x512xf32>
    %cst_28 = arith.constant 0.000000e+00 : f32
    %90 = vector.broadcast %cst_28 : f32 to vector<256x512xf32>
    %91 = arith.maximumf %89, %90 : vector<256x512xf32>
    %c0_29 = arith.constant 0 : index
    %c0_30 = arith.constant 0 : index
    %c0_31 = arith.constant 0 : index
    %92 = vector.load %arg9[%c0_29, %c0_30, %c0_31] : memref<1x256x1xf32, #tpu.memory_space<vmem>>, vector<1x256x1xf32>
    %93 = vector.shape_cast %92 : vector<1x256x1xf32> to vector<256x1xf32>
    %94 = vector.broadcast %93 : vector<256x1xf32> to vector<256x512xf32>
    %95 = arith.mulf %91, %94 : vector<256x512xf32>
    %c0_32 = arith.constant 0 : index
    %c0_33 = arith.constant 0 : index
    %c0_34 = arith.constant 0 : index
    %96 = vector.load %arg10[%c0_32, %c0_33, %c0_34] : memref<1x1x1xf32, #tpu.memory_space<vmem>>, vector<1x1x1xf32>
    %97 = vector.shape_cast %96 : vector<1x1x1xf32> to vector<1x1xf32>
    %98 = vector.extract_strided_slice %95 {offsets = [0, 0], sizes = [64, 512], strides = [1, 1]} : vector<256x512xf32> to vector<64x512xf32>
    %cst_35 = arith.constant dense<0.000000e+00> : vector<512xf32>
    %99 = vector.multi_reduction <add>, %98, %cst_35 [0] : vector<64x512xf32> to vector<512xf32>
    %100 = vector.shape_cast %99 : vector<512xf32> to vector<1x512xf32>
    %101 = vector.broadcast %97 : vector<1x1xf32> to vector<1x512xf32>
    %102 = arith.addf %100, %101 : vector<1x512xf32>
    %103 = math.tanh %102 : vector<1x512xf32>
    %cst_36 = arith.constant 1.270000e+02 : f32
    %104 = vector.broadcast %cst_36 : f32 to vector<1x512xf32>
    %105 = arith.mulf %104, %103 : vector<1x512xf32>
    %106 = math.floor %105 : vector<1x512xf32>
    %107 = vector.extract_strided_slice %95 {offsets = [64, 0], sizes = [64, 512], strides = [1, 1]} : vector<256x512xf32> to vector<64x512xf32>
    %cst_37 = arith.constant dense<0.000000e+00> : vector<512xf32>
    %108 = vector.multi_reduction <add>, %107, %cst_37 [0] : vector<64x512xf32> to vector<512xf32>
    %109 = vector.shape_cast %108 : vector<512xf32> to vector<1x512xf32>
    %110 = vector.broadcast %97 : vector<1x1xf32> to vector<1x512xf32>
    %111 = arith.addf %109, %110 : vector<1x512xf32>
    %112 = math.tanh %111 : vector<1x512xf32>
    %cst_38 = arith.constant 1.270000e+02 : f32
    %113 = vector.broadcast %cst_38 : f32 to vector<1x512xf32>
    %114 = arith.mulf %113, %112 : vector<1x512xf32>
    %115 = math.floor %114 : vector<1x512xf32>
    %116 = arith.addf %106, %115 : vector<1x512xf32>
    %117 = vector.extract_strided_slice %95 {offsets = [128, 0], sizes = [64, 512], strides = [1, 1]} : vector<256x512xf32> to vector<64x512xf32>
    %cst_39 = arith.constant dense<0.000000e+00> : vector<512xf32>
    %118 = vector.multi_reduction <add>, %117, %cst_39 [0] : vector<64x512xf32> to vector<512xf32>
    %119 = vector.shape_cast %118 : vector<512xf32> to vector<1x512xf32>
    %120 = vector.broadcast %97 : vector<1x1xf32> to vector<1x512xf32>
    %121 = arith.addf %119, %120 : vector<1x512xf32>
    %122 = math.tanh %121 : vector<1x512xf32>
    %cst_40 = arith.constant 1.270000e+02 : f32
    %123 = vector.broadcast %cst_40 : f32 to vector<1x512xf32>
    %124 = arith.mulf %123, %122 : vector<1x512xf32>
    %125 = math.floor %124 : vector<1x512xf32>
    %126 = arith.addf %116, %125 : vector<1x512xf32>
    %127 = vector.extract_strided_slice %95 {offsets = [192, 0], sizes = [64, 512], strides = [1, 1]} : vector<256x512xf32> to vector<64x512xf32>
    %cst_41 = arith.constant dense<0.000000e+00> : vector<512xf32>
    %128 = vector.multi_reduction <add>, %127, %cst_41 [0] : vector<64x512xf32> to vector<512xf32>
    %129 = vector.shape_cast %128 : vector<512xf32> to vector<1x512xf32>
    %130 = vector.broadcast %97 : vector<1x1xf32> to vector<1x512xf32>
    %131 = arith.addf %129, %130 : vector<1x512xf32>
    %132 = math.tanh %131 : vector<1x512xf32>
    %cst_42 = arith.constant 1.270000e+02 : f32
    %133 = vector.broadcast %cst_42 : f32 to vector<1x512xf32>
    %134 = arith.mulf %133, %132 : vector<1x512xf32>
    %135 = math.floor %134 : vector<1x512xf32>
    %136 = arith.addf %126, %135 : vector<1x512xf32>
    %c3_i32 = arith.constant 3 : i32
    %137 = arith.cmpi slt, %arg1, %c3_i32 : i32
    %138 = arith.extui %137 : i1 to i32
    %c0_i32_43 = arith.constant 0 : i32
    %139 = arith.cmpi ne, %138, %c0_i32_43 : i32
    scf.if %139 {
      %c0_46 = arith.constant 0 : index
      %c0_47 = arith.constant 0 : index
      %143 = vector.load %arg11[%c0_46, %c0_47] : memref<1x512xf32, #tpu.memory_space<vmem>>, vector<1x512xf32>
      %144 = arith.addf %143, %136 : vector<1x512xf32>
      %c0_48 = arith.constant 0 : index
      %c0_49 = arith.constant 0 : index
      %145 = vector.load %arg11[%c0_48, %c0_49] : memref<1x512xf32, #tpu.memory_space<vmem>>, vector<1x512xf32>
      tpu.vector_store %arg11[%c0_48, %c0_49], %144 {strides = array<i32>} : memref<1x512xf32, #tpu.memory_space<vmem>>, vector<1x512xf32>,
    } else {
    }
    %c3_i32_44 = arith.constant 3 : i32
    %140 = arith.cmpi sge, %arg1, %c3_i32_44 : i32
    %141 = arith.extui %140 : i1 to i32
    %c0_i32_45 = arith.constant 0 : i32
    %142 = arith.cmpi ne, %141, %c0_i32_45 : i32
    scf.if %142 {
      %c0_46 = arith.constant 0 : index
      %c0_47 = arith.constant 0 : index
      %143 = vector.load %arg12[%c0_46, %c0_47] : memref<1x512xf32, #tpu.memory_space<vmem>>, vector<1x512xf32>
      %144 = arith.addf %143, %136 : vector<1x512xf32>
      %c0_48 = arith.constant 0 : index
      %c0_49 = arith.constant 0 : index
      %145 = vector.load %arg12[%c0_48, %c0_49] : memref<1x512xf32, #tpu.memory_space<vmem>>, vector<1x512xf32>
      tpu.vector_store %arg12[%c0_48, %c0_49], %144 {strides = array<i32>} : memref<1x512xf32, #tpu.memory_space<vmem>>, vector<1x512xf32>,
    } else {
    }
    return
  }
  func.func @transform_0(%arg0: i32, %arg1: i32) -> (i32, i32, i32, i32) {
    %c0_i32 = arith.constant 0 : i32
    %c0_i32_0 = arith.constant 0 : i32
    %c0_i32_1 = arith.constant 0 : i32
    return %arg1, %c0_i32, %c0_i32_0, %arg0 : i32, i32, i32, i32
  }
  func.func @transform_1(%arg0: i32, %arg1: i32) -> (i32, i32, i32) {
    %c0_i32 = arith.constant 0 : i32
    %c0_i32_0 = arith.constant 0 : i32
    %c0_i32_1 = arith.constant 0 : i32
    return %arg1, %c0_i32, %c0_i32_0 : i32, i32, i32
  }
  func.func @transform_2(%arg0: i32, %arg1: i32) -> (i32, i32, i32) {
    %c0_i32 = arith.constant 0 : i32
    %c0_i32_0 = arith.constant 0 : i32
    %c0_i32_1 = arith.constant 0 : i32
    return %arg1, %c0_i32, %c0_i32_0 : i32, i32, i32
  }
  func.func @transform_3(%arg0: i32, %arg1: i32) -> (i32, i32, i32) {
    %c0_i32 = arith.constant 0 : i32
    %c0_i32_0 = arith.constant 0 : i32
    %c0_i32_1 = arith.constant 0 : i32
    return %arg1, %c0_i32, %c0_i32_0 : i32, i32, i32
  }
  func.func @transform_4(%arg0: i32, %arg1: i32) -> (i32, i32, i32) {
    %c0_i32 = arith.constant 0 : i32
    %c0_i32_0 = arith.constant 0 : i32
    %c0_i32_1 = arith.constant 0 : i32
    return %arg1, %c0_i32, %c0_i32_0 : i32, i32, i32
  }
  func.func @transform_5(%arg0: i32, %arg1: i32) -> (i32, i32, i32) {
    %c0_i32 = arith.constant 0 : i32
    %c0_i32_0 = arith.constant 0 : i32
    %c0_i32_1 = arith.constant 0 : i32
    return %arg1, %c0_i32, %c0_i32_0 : i32, i32, i32
  }
  func.func @transform_6(%arg0: i32, %arg1: i32) -> (i32, i32, i32) {
    %c0_i32 = arith.constant 0 : i32
    %c0_i32_0 = arith.constant 0 : i32
    %c0_i32_1 = arith.constant 0 : i32
    return %arg1, %c0_i32, %c0_i32_0 : i32, i32, i32
  }
  func.func @transform_7(%arg0: i32, %arg1: i32) -> (i32, i32, i32) {
    %c0_i32 = arith.constant 0 : i32
    %c0_i32_0 = arith.constant 0 : i32
    %c0_i32_1 = arith.constant 0 : i32
    return %arg1, %c0_i32, %c0_i32_0 : i32, i32, i32
  }
  func.func @transform_8(%arg0: i32, %arg1: i32) -> (i32, i32, i32) {
    %c0_i32 = arith.constant 0 : i32
    %c0_i32_0 = arith.constant 0 : i32
    %c0_i32_1 = arith.constant 0 : i32
    return %arg1, %c0_i32, %c0_i32_0 : i32, i32, i32
  }
  func.func @transform_9(%arg0: i32, %arg1: i32) -> (i32, i32) {
    %c0_i32 = arith.constant 0 : i32
    %c0_i32_0 = arith.constant 0 : i32
    return %c0_i32, %arg0 : i32, i32
  }
  func.func @transform_10(%arg0: i32, %arg1: i32) -> (i32, i32) {
    %c0_i32 = arith.constant 0 : i32
    %c0_i32_0 = arith.constant 0 : i32
    return %c0_i32, %arg0 : i32, i32
  }
}

</mosaic_0001>

<bundles_post_ra>
// kernel: reverse
= control target key start
LH: loop header
LB: loop body
LE: loop exit
PB: predicated region body
PF: predicated region fallthrough
CT: control target
= control target key end

     0   :  { %v2_v0 = vlaneseq  ;;  %s162_s0 = inlined_call_operand.vmem [shape: f32[2,1,16,16], index: 0, kind: input, shape index: {}]   ;;  %s163_s1 = inlined_call_operand.vmem [shape: f32[2,1,16,16], index: 1, kind: output, shape index: {}]  }
   0x1   :  { %v43_v2 = vld [vmem:[%s162_s0 + $0x10] sm:$0xff]  ;;  %v39_v3 = vld [vmem:[%s162_s0] sm:$0xff]  ;;  %v45_v4 = vld [vmem:[%s162_s0 + $0x18] sm:$0xff] }
   0x2   :  { %v3_v1 = vsub.s32 15, %v2_v0  ;;  %v41_v5 = vld [vmem:[%s162_s0 + $0x8] sm:$0xff] }
   0x4   :  { %4 = vset.pattern.permute.xlu0 %v3_v1  ;;  %127 = vset.pattern.permute.xlu1 %v3_v1 }
   0x5   :  { %63 = vperm.xlu1 %127, %v43_v2   ;;  %51 = vperm.xlu0 %4, %v39_v3  }
   0xd   :  { %69 = vperm.xlu1 %127, %v45_v4   ;;  %57 = vperm.xlu0 %4, %v41_v5  }
  0x77   :  { %v64_v6 = vpop.permute.xlu1 %63  ;;  %v52_v7 = vpop.permute.xlu0 %51 }
  0x78   :  { %111 = vst [vmem:[%s163_s1 + $0x10] sm:$0xff] %v64_v6 }
  0x79   :  { %107 = vst [vmem:[%s163_s1] sm:$0xff] %v52_v7 }
  0x7f   :  { %v70_v8 = vpop.permute.xlu1 %69  ;;  %v58_v9 = vpop.permute.xlu0 %57 }
  0x80   :  { %113 = vst [vmem:[%s163_s1 + $0x18] sm:$0xff] %v70_v8 }
  0x81   :  { %109 = vst [vmem:[%s163_s1 + $0x8] sm:$0xff] %v58_v9 }

// kernel: reverse.2
= control target key start
LH: loop header
LB: loop body
LE: loop exit
PB: predicated region body
PF: predicated region fallthrough
CT: control target
= control target key end

     0   :  { %v2_v0 = vlaneseq  ;;  %s169_s0 = inlined_call_operand.vmem [shape: f32[2,1,16,16], index: 0, kind: input, shape index: {}]   ;;  %s170_s1 = inlined_call_operand.vmem [shape: f32[2,1,16,16], index: 1, kind: output, shape index: {}]  }
   0x2   :  { %v3_v1 = vsub.s32 15, %v2_v0 }
   0x4   :  { %4 = vset.pattern.permute.xlu0 %v3_v1 }
   0x5   :  { %134 = vset.pattern.permute.xlu1 %v3_v1  ;;  %v45_v2 = vld [vmem:[%s169_s0 + $0x18] sm:$0xff]  ;;  %v41_v3 = vld [vmem:[%s169_s0 + $0x8] sm:$0xff]  ;;  %v43_v4 = vld [vmem:[%s169_s0 + $0x10] sm:$0xff] }
   0x6   :  { %46 = vst [vmem:[#allocation0 + $0x18] sm:$0xff] %v45_v2  ;;  %v39_v5 = vld [vmem:[%s169_s0] sm:$0xff] }
   0x7   :  { %42 = vst [vmem:[#allocation0 + $0x8] sm:$0xff] %v41_v3 }
   0x8   :  { %44 = vst [vmem:[#allocation0 + $0x10] sm:$0xff] %v43_v4 }
   0x9   :  { %40 = vst [vmem:[#allocation0] sm:$0xff] %v39_v5 }
   0xd   :  { %v66_v6 = vld [vmem:[#allocation0 + $0x1f] ss:$-1 sm:$0xff] }
   0xe   :  { %67 = vperm.xlu1 %134, %v66_v6   ;;  %v52_v7 = vld [vmem:[#allocation0 + $0xf] ss:$-1 sm:$0xff] }
   0xf   :  { %53 = vperm.xlu0 %4, %v52_v7   ;;  %v72_v8 = vld [vmem:[#allocation0 + $0x17] ss:$-1 sm:$0xff] }
  0x10   :  { %v58_v9 = vld [vmem:[#allocation0 + $0x7] ss:$-1 sm:$0xff] }
  0x16   :  { %73 = vperm.xlu1 %134, %v72_v8  }
  0x17   :  { %59 = vperm.xlu0 %4, %v58_v9  }
  0x80   :  { %v68_v10 = vpop.permute.xlu1 %67 }
  0x81   :  { %115 = vst [vmem:[%s170_s1 + $0x10] sm:$0xff] %v68_v10  ;;  %v54_v11 = vpop.permute.xlu0 %53 }
  0x82   :  { %111 = vst [vmem:[%s170_s1] sm:$0xff] %v54_v11 }
  0x88   :  { %v74_v12 = vpop.permute.xlu1 %73 }
  0x89   :  { %117 = vst [vmem:[%s170_s1 + $0x18] sm:$0xff] %v74_v12  ;;  %v60_v13 = vpop.permute.xlu0 %59 }
  0x8a   :  { %113 = vst [vmem:[%s170_s1 + $0x8] sm:$0xff] %v60_v13 }

// kernel: reverse.9
= control target key start
LH: loop header
LB: loop body
LE: loop exit
PB: predicated region body
PF: predicated region fallthrough
CT: control target
= control target key end

     0   :  { %s157_s0 = inlined_call_operand.vmem [shape: f32[2,1,1,16], index: 0, kind: input, shape index: {}]   ;;  %s158_s1 = inlined_call_operand.vmem [shape: f32[2,1,1,16], index: 1, kind: output, shape index: {}]  }
   0x1   :  { %v36_v0 = vld [vmem:[%s157_s0] sm:$0xff]  ;;  %v38_v1 = vld [vmem:[%s157_s0 + $0x8] sm:$0xff]  ;;  %v40_v2 = vld [vmem:[%s157_s0 + $0x10] sm:$0xff] }
   0x2   :  { %37 = vst [vmem:[#allocation0] sm:$0xff] %v36_v0  ;;  %v42_v3 = vld [vmem:[%s157_s0 + $0x18] sm:$0xff] }
   0x3   :  { %39 = vst [vmem:[#allocation0 + $0x8] sm:$0xff] %v38_v1 }
   0x4   :  { %41 = vst [vmem:[#allocation0 + $0x10] sm:$0xff] %v40_v2 }
   0x5   :  { %43 = vst [vmem:[#allocation0 + $0x18] sm:$0xff] %v42_v3 }
   0x9   :  { %v53_v4 = vld [vmem:[#allocation0 + $0x7] ss:$-1 sm:$0xff] }
   0xa   :  { %v49_v5 = vld [vmem:[#allocation0 + $0xf] ss:$-1 sm:$0xff]  ;;  %102 = vst [vmem:[%s158_s1 + $0x8] sm:$0xff] %v53_v4 }
   0xb   :  { %v63_v6 = vld [vmem:[#allocation0 + $0x17] ss:$-1 sm:$0xff]  ;;  %100 = vst [vmem:[%s158_s1] sm:$0xff] %v49_v5 }
   0xc   :  { %v59_v7 = vld [vmem:[#allocation0 + $0x1f] ss:$-1 sm:$0xff]  ;;  %106 = vst [vmem:[%s158_s1 + $0x18] sm:$0xff] %v63_v6 }
   0xd   :  { %104 = vst [vmem:[%s158_s1 + $0x10] sm:$0xff] %v59_v7 }

// kernel: hknet_forward.1
= control target key start
LH: loop header
LB: loop body
LE: loop exit
PB: predicated region body
PF: predicated region fallthrough
CT: control target
= control target key end

     0   :  { %s5366_s13 = smov 0   ;;  %s5368_s14 = smov 0   ;;  %s8245_s0 = inlined_call_operand.vmem [shape: f32[5,4,2,512], index: 0, kind: input, shape index: {}]   ;;  %s8246_s1 = inlined_call_operand.vmem [shape: f32[5,64,2], index: 1, kind: input, shape index: {}]   ;;  %s8247_s2 = inlined_call_operand.vmem [shape: f32[5,64,1], index: 2, kind: input, shape index: {}]   ;;  %s8248_s3 = inlined_call_operand.vmem [shape: bf16[5,256,256], index: 3, kind: input, shape index: {}]   ;;  %s8249_s4 = inlined_call_operand.vmem [shape: f32[5,256,1], index: 4, kind: input, shape index: {}]   ;;  %s8250_s5 = inlined_call_operand.vmem [shape: bf16[5,256,256], index: 5, kind: input, shape index: {}]   ;;  %s8251_s6 = inlined_call_operand.vmem [shape: f32[5,256,1], index: 6, kind: input, shape index: {}]   ;;  %s8252_s7 = inlined_call_operand.vmem [shape: f32[5,256,1], index: 7, kind: input, shape index: {}]   ;;  %s8253_s8 = inlined_call_operand.vmem [shape: f32[5,1,1], index: 8, kind: input, shape index: {}]   ;;  %s8254_s9 = inlined_call_operand.vmem [shape: f32[1,512], index: 9, kind: output, shape index: {0}]   ;;  %s8255_s10 = inlined_call_operand.vmem [shape: f32[1,512], index: 10, kind: output, shape index: {1}]  }
   0x1   :  { %8511 = sst [smem:[#allocation60_spill]] %s8245_s0  ;;  %s5370_s15 = smov 0  }
   0x2   :  { %8512 = sst [smem:[#allocation61_spill]] %s8246_s1 }
   0x3   :  { %8513 = sst [smem:[#allocation62_spill]] %s8247_s2 }
   0x4 LB: > { %s30_s16 = sadd.s32 1, %s5302_s14  ;;  %p4855_p0 = scmp.ge.s32.totalorder %s5306_s15, 1  ;;  %s5306_s15 = sphi %s5370_s15, %s21_s15   ;;  %s5302_s14 = sphi %s5368_s14, %s8873_s14   ;;  %s5298_s13 = sphi %s5366_s13, %s8872_s13  }
   0x5   : > { %p31_p1 = scmp.ge.s32.totalorder %s30_s16, 5  ;;  %p412_p2 = scmp.lt.s32.totalorder %s5306_s15, 6 }
   0x7   : > { %s8875_s16 = smov (%p31_p1, %s30_s16), 0  ;;  %p413_p3 = pnand %p4855_p0, %p412_p2 }
   0x8   : > { %8514 = sst [smem:[#allocation2_spill]] %s8875_s16 }
   0x9   : > { %416 = sbr.rel (%p413_p3) target bundleno = 1508 (0x5e4), region = 56 }
   0xe   : > { %p496_p4 = scmp.lt.s32.totalorder %s5298_s13, 4  ;;  %s8515_s0 = sld [smem:[#allocation60_spill]] }
   0xf   : > { %s8516_s1 = sld [smem:[#allocation61_spill]]  ;;  %p4872_p5 = scmp.ne.s32.totalorder %s5298_s13, 0 }
  0x10   : > { %s5388_s17 = scalar_select %p496_p4, %s5298_s13, 4 }
  0x11   : > { %s8517_s2 = sld [smem:[#allocation62_spill]] }
  0x12   : > { %s5137_s18 = sshll.u32 %s5388_s17, 5  ;;  %s5138_s19 = sshll.u32 %s5388_s17, 6 }
  0x13   : > { %s5140_s29 = sshll.u32 %s5388_s17, 8  ;;  %s542_s16 = scalar_lea.vmem %s8253_s8, %s5388_s17 }
  0x14   : > { %s5395_s22 = scalar_lea.vmem %s8515_s0, %s5137_s18  ;;  %s5411_s12 = scalar_lea.vmem %s8248_s3, %s5140_s29 }
  0x15   : > { %s5400_s25 = scalar_lea.vmem %s8516_s1, %s5138_s19  ;;  %s5416_s18 = scalar_lea.vmem %s8249_s4, %s5140_s29 }
  0x16   : > { %s5421_s24 = scalar_lea.vmem %s8250_s5, %s5140_s29  ;;  %s5431_s30 = scalar_lea.vmem %s8252_s7, %s5140_s29 }
  0x17   : > { %s5405_s28 = scalar_lea.vmem %s8517_s2, %s5138_s19  ;;  %s5426_s19 = scalar_lea.vmem %s8251_s6, %s5140_s29 }
  0x18   : > { %556 = sbr.rel (%p4872_p5) target bundleno = 34 (0x22), region = 60 }
  0x1d   : > { %v557_v0 = vlaneseq  ;;  %v5308_v1 = vmov 0.0  }
  0x1f   : > { %vm559_vm0 = vcmp.lt.s32.totalorder %v557_v0, 512 }
  0x20   : > { %561 = vst.msk [vmem:[%s8254_s9] sm:$0xf] %vm559_vm0, %v5308_v1 }
  0x21   : > { %562 = vst.msk [vmem:[%s8255_s10] sm:$0xf] %vm559_vm0, %v5308_v1 }
  0x22 PF: > { %v573_v2 = vld [vmem:[%s5400_s25 + $0x30] sm:$0xff]  ;;  %v571_v3 = vld [vmem:[%s5400_s25 + $0x20] sm:$0xff]  ;;  %v5309_v4 = vmov 1   ;;  %v5310_v5 = vmov 0   ;;  %v574_v6 = vld [vmem:[%s5400_s25 + $0x38] sm:$0xff]  ;;  %p5129_p6 = scmp.ge.s32.totalorder %s5298_s13, 3 }
  0x23   : > { %5237 = vset.pattern.permute.xlu1 %v5309_v4  ;;  %5238 = vset.pattern.permute.xlu2 %v5310_v5  ;;  %v572_v7 = vld [vmem:[%s5400_s25 + $0x28] sm:$0xff]  ;;  %v581_v8 = vld [vmem:[%s5405_s28 + $0x30] sm:$0xff]  ;;  %v570_v9 = vld [vmem:[%s5400_s25 + $0x18] sm:$0xff] }
  0x24   : > { %5236 = vset.pattern.permute.xlu0 %v5310_v5  ;;  %693 = vperm.xlu1 %5237, %v573_v2   ;;  %v569_v10 = vld [vmem:[%s5400_s25 + $0x10] sm:$0xff]  ;;  %v567_v11 = vld [vmem:[%s5400_s25] sm:$0xff]  ;;  %v582_v12 = vld [vmem:[%s5405_s28 + $0x38] sm:$0xff] }
  0x25   : > { %615 = vperm.xlu0 %5236, %v573_v2   ;;  %605 = vperm.xlu2 %5238, %v571_v3   ;;  %v580_v13 = vld [vmem:[%s5405_s28 + $0x28] sm:$0xff]  ;;  %v579_v14 = vld [vmem:[%s5405_s28 + $0x20] sm:$0xff]  ;;  %v577_v16 = vld [vmem:[%s5405_s28 + $0x10] sm:$0xff] }
  0x26   : > { %v568_v15 = vld [vmem:[%s5400_s25 + $0x8] sm:$0xff]  ;;  %v578_v17 = vld [vmem:[%s5405_s28 + $0x18] sm:$0xff]  ;;  %v575_v18 = vld [vmem:[%s5405_s28] sm:$0xff] }
  0x27   : > { %v576_v19 = vld [vmem:[%s5405_s28 + $0x8] sm:$0xff]  ;;  %v1546_v20 = vld [vmem:[%s5416_s18 + $0x78] sm:$0xff]  ;;  %v1561_v21 = vld [vmem:[%s5416_s18 + $0xf0] sm:$0xff] }
  0x28   : > { %v1562_v22 = vld [vmem:[%s5416_s18 + $0xf8] sm:$0xff]  ;;  %v1543_v23 = vld [vmem:[%s5416_s18 + $0x60] sm:$0xff]  ;;  %v1560_v25 = vld [vmem:[%s5416_s18 + $0xe8] sm:$0xff] }
  0x29   : > { %v1559_v24 = vld [vmem:[%s5416_s18 + $0xe0] sm:$0xff]  ;;  %v1542_v27 = vld [vmem:[%s5416_s18 + $0x58] sm:$0xff]  ;;  %v1557_v28 = vld [vmem:[%s5416_s18 + $0xd0] sm:$0xff] }
  0x2a   : > { %v5473_v30 = vld [vmem:[%s5395_s22 + $0x8] sm:$0xff]  ;;  %v5476_v31 = vld [vmem:[%s5395_s22 + $0x18] sm:$0xff]  ;;  %v563_v33 = vld [vmem:[%s5395_s22] sm:$0xff] }
  0x2b   : > { %8520 = vst [vmem:[#allocation5_spill] sm:$0xff] %v5473_v30  ;;  %v881_v32 = vperm.slane %v5473_v30, 0  ;;  %v565_v34 = vld [vmem:[%s5395_s22 + $0x10] sm:$0xff]  ;;  %v1251_v35 = vperm.slane %v5476_v31, 0  ;;  %v882_v36 = vperm.slane %v5473_v30, 2  ;;  %v1252_v37 = vperm.slane %v5476_v31, 2 }
  0x2c   : > { %697 = vperm.xlu1 %5237, %v574_v6   ;;  %8521 = vst [vmem:[#allocation6_spill] sm:$0xff] %v5476_v31  ;;  %v925_v38 = vperm.slane %v5473_v30, 1  ;;  %v1295_v39 = vperm.slane %v5476_v31, 1  ;;  %v926_v40 = vperm.slane %v5473_v30, 3  ;;  %v1296_v41 = vperm.slane %v5476_v31, 3  ;;  %v1539_v42 = vld [vmem:[%s5416_s18 + $0x40] sm:$0xff] }
  0x2d   : > { %620 = vperm.xlu0 %5236, %v574_v6   ;;  %610 = vperm.xlu2 %5238, %v572_v7   ;;  %v624_v43 = vperm.slane %v563_v33, 0  ;;  %v700_v44 = vperm.slane %v563_v33, 1  ;;  %v1066_v45 = vperm.slane %v565_v34, 0  ;;  %v1110_v46 = vperm.slane %v565_v34, 1  ;;  %v1540_v47 = vld [vmem:[%s5416_s18 + $0x48] sm:$0xff] }
  0x2e   : > { %v5490_v48 = vperm.slane %v881_v32, 0  ;;  %v625_v49 = vperm.slane %v563_v33, 2  ;;  %v701_v50 = vperm.slane %v563_v33, 3  ;;  %v1067_v51 = vperm.slane %v565_v34, 2  ;;  %v1544_v30 = vld [vmem:[%s5416_s18 + $0x68] sm:$0xff] }
  0x2f   : > { %v5494_v53 = vperm.slane %v1251_v35, 0  ;;  %v5496_v54 = vperm.slane %v882_v36, 0  ;;  %v5498_v55 = vperm.slane %v1252_v37, 0  ;;  %v1111_v56 = vperm.slane %v565_v34, 3 }
  0x30   : > { %8522 = vst [vmem:[#allocation7_spill] sm:$0xff] %v5490_v48  ;;  %v5500_v57 = vperm.slane %v925_v38, 1  ;;  %v5502_v58 = vperm.slane %v1295_v39, 1  ;;  %v5504_v59 = vperm.slane %v926_v40, 1  ;;  %v5506_v60 = vperm.slane %v1296_v41, 1 }
  0x31   : > { %8524 = vst [vmem:[#allocation9_spill] sm:$0xff] %v5494_v53  ;;  %v5508_v61 = vperm.slane %v624_v43, 0  ;;  %v5510_v62 = vperm.slane %v700_v44, 1  ;;  %v5512_v63 = vperm.slane %v1066_v45, 0  ;;  %v5514_v0 = vperm.slane %v1110_v46, 1  ;;  %v1545_v46 = vld [vmem:[%s5416_s18 + $0x70] sm:$0xff] }
  0x32   : > { %8525 = vst [vmem:[#allocation10_spill] sm:$0xff] %v5496_v54  ;;  %v5520_v2 = vperm.slane %v625_v49, 0 }
  0x33   : > { %8526 = vst [vmem:[#allocation11_spill] sm:$0xff] %v5498_v55 }
  0x34   : > { %689 = vperm.xlu1 %5237, %v572_v7   ;;  %8527 = vst [vmem:[#allocation12_spill] sm:$0xff] %v5512_v63 }
  0x35   : > { %808 = vperm.xlu2 %5238, %v581_v8   ;;  %600 = vperm.xlu0 %5236, %v570_v9   ;;  %8529 = vst [vmem:[#allocation14_spill] sm:$0xff] %v5520_v2  ;;  %v5538_v8 = vperm.slane %v1111_v56, 1 }
  0x3c   : > { %5239 = vset.pattern.permute.xlu1 %v5310_v5 }
  0x3d   : > { %595 = vperm.xlu2 %5238, %v569_v10   ;;  %585 = vperm.xlu0 %5236, %v567_v11  }
  0x3e   : > { %813 = vperm.xlu1 %5239, %v582_v12  }
  0x45   : > { %5241 = vset.pattern.permute.xlu2 %v5309_v4  ;;  %5244 = vset.pattern.permute.xlu0 %v5309_v4 }
  0x46   : > { %5240 = vset.pattern.permute.xlu1 %v5309_v4  ;;  %681 = vperm.xlu2 %5241, %v570_v9  }
  0x47   : > { %685 = vperm.xlu0 %5244, %v571_v3   ;;  %677 = vperm.xlu1 %5240, %v569_v10   ;;  %v5522_v3 = vperm.slane %v701_v50, 1 }
  0x4e   : > { %5243 = vset.pattern.permute.xlu2 %v5310_v5 }
  0x4f   : > { %5242 = vset.pattern.permute.xlu1 %v5310_v5  ;;  %803 = vperm.xlu2 %5243, %v580_v13   ;;  %v1556_v13 = vld [vmem:[%s5416_s18 + $0xc8] sm:$0xff] }
  0x50   : > { %798 = vperm.xlu1 %5242, %v579_v14   ;;  %673 = vperm.xlu0 %5244, %v568_v15  }
  0x57   : > { %5245 = vset.pattern.permute.xlu2 %v5309_v4  ;;  %v5524_v4 = vperm.slane %v1067_v51, 0 }
  0x58   : > { %590 = vperm.xlu1 %5242, %v568_v15   ;;  %669 = vperm.xlu2 %5245, %v567_v11  }
  0x59   : > { %5247 = vset.pattern.permute.xlu0 %v5310_v5  ;;  %8530 = vst [vmem:[#allocation15_spill] sm:$0xff] %v5524_v4 }
  0x5a   : > { %1635 = vperm.xlu0 %5247, %v1545_v46  }
  0x60   : > { %788 = vperm.xlu1 %5242, %v577_v16   ;;  %5246 = vset.pattern.permute.xlu2 %v5310_v5 }
  0x61   : > { %793 = vperm.xlu2 %5246, %v578_v17  }
  0x62   : > { %1630 = vperm.xlu0 %5247, %v1544_v30  }
  0x68   : > { %778 = vperm.xlu1 %5242, %v575_v18  }
  0x69   : > { %783 = vperm.xlu2 %5246, %v576_v19   ;;  %v1537_v19 = vld [vmem:[%s5416_s18 + $0x30] sm:$0xff] }
  0x70   : > { %1640 = vperm.xlu1 %5242, %v1546_v20  }
  0x71   : > { %1715 = vperm.xlu2 %5246, %v1561_v21  }
  0x78   : > { %1720 = vperm.xlu1 %5242, %v1562_v22  }
  0x79   : > { %1625 = vperm.xlu2 %5246, %v1543_v23  }
  0x7f   : > { %v5466_v26 = vpop.permute.xlu2 %605 }
  0x80   : > { %8518 = vst [vmem:[#allocation3_spill] sm:$0xff] %v5466_v26  ;;  %1705 = vperm.xlu1 %5242, %v1559_v24   ;;  %v5518_v1 = vmul.f32 %v5490_v48, %v5466_v26  ;;  %v5528_v5 = vmul.f32 %v5494_v53, %v5466_v26  ;;  %v5532_v6 = vmul.f32 %v5496_v54, %v5466_v26 }
  0x81   : > { %1710 = vperm.xlu2 %5246, %v1560_v25   ;;  %v5536_v7 = vmul.f32 %v5498_v55, %v5466_v26  ;;  %v5559_v14 = vmul.f32 %v5508_v61, %v5466_v26  ;;  %v5567_v16 = vmul.f32 %v5512_v63, %v5466_v26  ;;  %v5578_v20 = vmul.f32 %v5520_v2, %v5466_v26 }
  0x82   : > { %8528 = vst [vmem:[#allocation13_spill] sm:$0xff] %v5518_v1  ;;  %v5586_v22 = vmul.f32 %v5524_v4, %v5466_v26 }
  0x83   : > { %8531 = vst [vmem:[#allocation16_spill] sm:$0xff] %v5528_v5 }
  0x84   : > { %8532 = vst [vmem:[#allocation17_spill] sm:$0xff] %v5532_v6 }
  0x85   : > { %8533 = vst [vmem:[#allocation18_spill] sm:$0xff] %v5536_v7 }
  0x86   : > { %8534 = vst [vmem:[#allocation19_spill] sm:$0xff] %v5559_v14 }
  0x87   : > { %v5470_v29 = vpop.permute.xlu2 %610  ;;  %8535 = vst [vmem:[#allocation20_spill] sm:$0xff] %v5567_v16 }
  0x88   : > { %8519 = vst [vmem:[#allocation4_spill] sm:$0xff] %v5470_v29  ;;  %1620 = vperm.xlu1 %5242, %v1542_v27   ;;  %v5542_v9 = vmul.f32 %v5490_v48, %v5470_v29  ;;  %v5546_v10 = vmul.f32 %v5494_v53, %v5470_v29  ;;  %v5550_v11 = vmul.f32 %v5496_v54, %v5470_v29 }
  0x89   : > { %1695 = vperm.xlu2 %5246, %v1557_v28   ;;  %v5554_v12 = vmul.f32 %v5498_v55, %v5470_v29  ;;  %v5563_v15 = vmul.f32 %v5508_v61, %v5470_v29  ;;  %v5571_v17 = vmul.f32 %v5512_v63, %v5470_v29  ;;  %8537 = vst [vmem:[#allocation22_spill] sm:$0xff] %v5578_v20 }
  0x8a   : > { %v5582_v21 = vmul.f32 %v5520_v2, %v5470_v29  ;;  %8538 = vst [vmem:[#allocation23_spill] sm:$0xff] %v5586_v22  ;;  %v5590_v23 = vmul.f32 %v5524_v4, %v5470_v29 }
  0x8c   : > { %8539 = vst [vmem:[#allocation24_spill] sm:$0xff] %v5590_v23 }
  0x8f   : > { %v5492_v52 = vpop.permute.xlu2 %808 }
  0x90   : > { %8523 = vst [vmem:[#allocation8_spill] sm:$0xff] %v5492_v52  ;;  %1605 = vperm.xlu1 %5242, %v1539_v42  }
  0x91   : > { %1610 = vperm.xlu2 %5246, %v1540_v47  }
  0x96   : > { %v5573_v18 = vpop.permute.xlu1 %693 }
  0x97   : > { %8536 = vst [vmem:[#allocation21_spill] sm:$0xff] %v5573_v18  ;;  %v5592_v24 = vpop.permute.xlu0 %615  ;;  %v5594_v25 = vpop.permute.xlu2 %595  ;;  %v961_v27 = vmul.f32 %v5500_v57, %v5573_v18  ;;  %v1331_v28 = vmul.f32 %v5502_v58, %v5573_v18  ;;  %v962_v32 = vmul.f32 %v5504_v59, %v5573_v18  ;;  %v1332_v33 = vmul.f32 %v5506_v60, %v5573_v18 }
  0x98   : > { %8540 = vst [vmem:[#allocation25_spill] sm:$0xff] %v5592_v24  ;;  %1690 = vperm.xlu1 %5242, %v1556_v13   ;;  %v917_v34 = vmul.f32 %v5490_v48, %v5592_v24  ;;  %v1287_v35 = vmul.f32 %v5494_v53, %v5592_v24  ;;  %v918_v36 = vmul.f32 %v5496_v54, %v5592_v24 }
  0x99   : > { %8541 = vst [vmem:[#allocation26_spill] sm:$0xff] %v5594_v25  ;;  %v1288_v37 = vmul.f32 %v5498_v55, %v5592_v24  ;;  %1595 = vperm.xlu2 %5246, %v1537_v19   ;;  %v5614_v38 = vmul.f32 %v5490_v48, %v5594_v25  ;;  %v5618_v39 = vmul.f32 %v5494_v53, %v5594_v25 }
  0x9a   : > { %v5622_v40 = vmul.f32 %v5496_v54, %v5594_v25  ;;  %v5626_v41 = vmul.f32 %v5498_v55, %v5594_v25  ;;  %v993_v42 = vadd.f32 %v961_v27, %v917_v34  ;;  %v1363_v43 = vadd.f32 %v1331_v28, %v1287_v35  ;;  %v1553_v28 = vld [vmem:[%s5416_s18 + $0xb0] sm:$0xff] }
  0x9b   : > { %8542 = vst [vmem:[#allocation27_spill] sm:$0xff] %v5614_v38  ;;  %v994_v44 = vadd.f32 %v962_v32, %v918_v36  ;;  %v1364_v45 = vadd.f32 %v1332_v33, %v1288_v37  ;;  %v660_v47 = vmul.f32 %v5508_v61, %v5592_v24  ;;  %v736_v49 = vmul.f32 %v5510_v62, %v5573_v18  ;;  %v1554_v37 = vld [vmem:[%s5416_s18 + $0xb8] sm:$0xff] }
  0x9c   : > { %8543 = vst [vmem:[#allocation28_spill] sm:$0xff] %v5618_v39  ;;  %v1102_v50 = vmul.f32 %v5512_v63, %v5592_v24  ;;  %v1146_v51 = vmul.f32 %v5514_v0, %v5573_v18  ;;  %v5638_v56 = vadd.f32 %v993_v42, %v5492_v52  ;;  %v5641_v13 = vadd.f32 %v1363_v43, %v5492_v52 }
  0x9d   : > { %8544 = vst [vmem:[#allocation29_spill] sm:$0xff] %v5622_v40  ;;  %v5644_v19 = vadd.f32 %v994_v44, %v5492_v52  ;;  %v5647_v27 = vadd.f32 %v1364_v45, %v5492_v52  ;;  %v768_v32 = vadd.f32 %v736_v49, %v660_v47  ;;  %v661_v34 = vmul.f32 %v5520_v2, %v5592_v24 }
  0x9e   : > { %8545 = vst [vmem:[#allocation30_spill] sm:$0xff] %v5626_v41  ;;  %v1178_v33 = vadd.f32 %v1146_v51, %v1102_v50  ;;  %v737_v35 = vmul.f32 %v5522_v3, %v5573_v18  ;;  %v5654_v36 = vpop.permute.xlu1 %697  ;;  %v1103_v30 = vmul.f32 %v5524_v4, %v5592_v24 }
  0x9f   : > { %8546 = vst [vmem:[#allocation31_spill] sm:$0xff] %v5654_v36  ;;  %v5661_v46 = vpop.permute.xlu0 %620  ;;  %v965_v47 = vmul.f32 %v5500_v57, %v5654_v36  ;;  %v1335_v49 = vmul.f32 %v5502_v58, %v5654_v36  ;;  %v966_v50 = vmul.f32 %v5504_v59, %v5654_v36  ;;  %v1336_v51 = vmul.f32 %v5506_v60, %v5654_v36 }
  0xa0   : > { %8547 = vst [vmem:[#allocation32_spill] sm:$0xff] %v5661_v46  ;;  %1675 = vperm.xlu1 %5242, %v1553_v28   ;;  %v5671_v43 = vpop.permute.xlu2 %681  ;;  %v921_v45 = vmul.f32 %v5490_v48, %v5661_v46  ;;  %v1291_v44 = vmul.f32 %v5494_v53, %v5661_v46  ;;  %v922_v42 = vmul.f32 %v5496_v54, %v5661_v46 }
  0xa1   : > { %8548 = vst [vmem:[#allocation33_spill] sm:$0xff] %v5671_v43  ;;  %v1292_v29 = vmul.f32 %v5498_v55, %v5661_v46  ;;  %1680 = vperm.xlu2 %5246, %v1554_v37   ;;  %v949_v26 = vmul.f32 %v5500_v57, %v5671_v43  ;;  %v1319_v28 = vmul.f32 %v5502_v58, %v5671_v43 }
  0xa2   : > { %v950_v31 = vmul.f32 %v5504_v59, %v5671_v43  ;;  %v1320_v22 = vmul.f32 %v5506_v60, %v5671_v43  ;;  %v5689_v20 = vadd.f32 %v965_v47, %v921_v45  ;;  %v5691_v23 = vadd.f32 %v1335_v49, %v1291_v44  ;;  %v1536_v49 = vld [vmem:[%s5416_s18 + $0x28] sm:$0xff]  ;;  %v1551_v43 = vld [vmem:[%s5416_s18 + $0xa0] sm:$0xff] }
  0xa3   : > { %v5693_v16 = vadd.f32 %v966_v50, %v922_v42  ;;  %v5695_v37 = vadd.f32 %v1336_v51, %v1292_v29  ;;  %v664_v14 = vmul.f32 %v5508_v61, %v5661_v46  ;;  %v740_v41 = vmul.f32 %v5510_v62, %v5654_v36 }
  0xa4   : > { %v5703_v40 = vadd.f32 %v5492_v52, %v768_v32  ;;  %v1106_v45 = vmul.f32 %v5512_v63, %v5661_v46  ;;  %v1150_v42 = vmul.f32 %v5514_v0, %v5654_v36  ;;  %v5710_v29 = vadd.f32 %v1178_v33, %v5492_v52 }
  0xa5   : > { %v665_v44 = vmul.f32 %v5520_v2, %v5661_v46  ;;  %v741_v47 = vmul.f32 %v5522_v3, %v5654_v36  ;;  %v5717_v50 = vadd.f32 %v740_v41, %v664_v14  ;;  %v769_v51 = vadd.f32 %v737_v35, %v661_v34 }
  0xa6   : > { %v5722_v63 = vpop.permute.xlu1 %689  ;;  %v1182_v33 = vadd.f32 %v1150_v42, %v1106_v45  ;;  %v1107_v2 = vmul.f32 %v5524_v4, %v5661_v46 }
  0xa7   : > { %8549 = vst [vmem:[#allocation34_spill] sm:$0xff] %v5722_v63  ;;  %v773_v38 = vadd.f32 %v741_v47, %v665_v44  ;;  %v5728_v7 = vpop.permute.xlu0 %600  ;;  %v957_v14 = vmul.f32 %v5500_v57, %v5722_v63  ;;  %v1327_v41 = vmul.f32 %v5502_v58, %v5722_v63  ;;  %v958_v34 = vmul.f32 %v5504_v59, %v5722_v63 }
  0xa8   : > { %v1328_v35 = vmul.f32 %v5506_v60, %v5722_v63  ;;  %1590 = vperm.xlu1 %5242, %v1536_v49   ;;  %v905_v45 = vmul.f32 %v5490_v48, %v5728_v7  ;;  %v1275_v42 = vmul.f32 %v5494_v53, %v5728_v7  ;;  %v906_v44 = vmul.f32 %v5496_v54, %v5728_v7 }
  0xa9   : > { %v1276_v47 = vmul.f32 %v5498_v55, %v5728_v7  ;;  %1665 = vperm.xlu2 %5246, %v1551_v43   ;;  %v5746_v39 = vpop.permute.xlu2 %803  ;;  %v989_v32 = vadd.f32 %v957_v14, %v5542_v9  ;;  %v1359_v49 = vadd.f32 %v1327_v41, %v5546_v10  ;;  %v990_v46 = vadd.f32 %v958_v34, %v5550_v11 }
  0xaa   : > { %v1360_v24 = vadd.f32 %v1328_v35, %v5554_v12  ;;  %v5752_v4 = vadd.f32 %v949_v26, %v905_v45  ;;  %v5754_v6 = vadd.f32 %v1319_v28, %v1275_v42  ;;  %v5756_v5 = vadd.f32 %v950_v31, %v906_v44  ;;  %v1541_v26 = vld [vmem:[%s5416_s18 + $0x50] sm:$0xff] }
  0xab   : > { %v5758_v1 = vadd.f32 %v1320_v22, %v1276_v47  ;;  %v5761_v43 = vadd.f32 %v989_v32, %v5746_v39  ;;  %v5764_v9 = vadd.f32 %v1359_v49, %v5746_v39  ;;  %v5767_v10 = vadd.f32 %v990_v46, %v5746_v39  ;;  %1615 = vperm.xlu0 %5247, %v1541_v26   ;;  %v1533_v32 = vld [vmem:[%s5416_s18 + $0x10] sm:$0xff] }
  0xac   : > { %v5770_v11 = vadd.f32 %v1360_v24, %v5746_v39  ;;  %v5774_v31 = vadd.f32 %v5492_v52, %v769_v51  ;;  %v1147_v12 = vmul.f32 %v5538_v8, %v5573_v18  ;;  %v1151_v22 = vmul.f32 %v5538_v8, %v5654_v36  ;;  %v1534_v51 = vld [vmem:[%s5416_s18 + $0x18] sm:$0xff] }
  0xad   : > { %v732_v28 = vmul.f32 %v5510_v62, %v5722_v63  ;;  %v1142_v47 = vmul.f32 %v5514_v0, %v5722_v63  ;;  %v733_v49 = vmul.f32 %v5522_v3, %v5722_v63  ;;  %v5798_v26 = vmul.f32 %v5538_v8, %v5722_v63 }
  0xae   : > { %v1179_v35 = vadd.f32 %v1147_v12, %v1103_v30  ;;  %v1183_v45 = vadd.f32 %v1151_v22, %v1107_v2  ;;  %v5802_v41 = vmul.f32 %v5508_v61, %v5594_v25 }
  0xaf   : > { %v764_v42 = vadd.f32 %v732_v28, %v5563_v15  ;;  %v5790_v44 = vpop.permute.xlu0 %585 }
  0xb0   : > { %8550 = vst [vmem:[#allocation35_spill] sm:$0xff] %v5790_v44  ;;  %v5804_v30 = vpop.permute.xlu1 %813  ;;  %1575 = vperm.xlu1 %5242, %v1533_v32   ;;  %v893_v2 = vmul.f32 %v5490_v48, %v5790_v44  ;;  %v1263_v15 = vmul.f32 %v5494_v53, %v5790_v44  ;;  %v894_v12 = vmul.f32 %v5496_v54, %v5790_v44 }
  0xb1   : > { %8551 = vst [vmem:[#allocation36_spill] sm:$0xff] %v5802_v41  ;;  %v1264_v22 = vmul.f32 %v5498_v55, %v5790_v44  ;;  %1580 = vperm.xlu2 %5246, %v1534_v51   ;;  %v1029_v28 = vadd.f32 %v5689_v20, %v5804_v30  ;;  %v1399_v32 = vadd.f32 %v5691_v23, %v5804_v30  ;;  %v1558_v44 = vld [vmem:[%s5416_s18 + $0xd8] sm:$0xff]  ;;  %v1531_v55 = vld [vmem:[%s5416_s18] sm:$0xff] }
  0xb2   : > { %8552 = vst [vmem:[#allocation37_spill] sm:$0xff] %v5804_v30  ;;  %v1030_v14 = vadd.f32 %v5693_v16, %v5804_v30  ;;  %v1400_v24 = vadd.f32 %v5695_v37, %v5804_v30  ;;  %v5822_v46 = vpop.permute.xlu2 %669  ;;  %v844_v34 = vadd.f32 %v5804_v30, %v5717_v50  ;;  %v1214_v63 = vadd.f32 %v1182_v33, %v5804_v30  ;;  %v1550_v41 = vld [vmem:[%s5416_s18 + $0x98] sm:$0xff] }
  0xb3   : > { %8553 = vst [vmem:[#allocation38_spill] sm:$0xff] %v5822_v46  ;;  %v845_v51 = vadd.f32 %v5804_v30, %v773_v38  ;;  %v5829_v20 = vadd.f32 %v1179_v35, %v5492_v52  ;;  %v1061_v23 = vmax.f32 %v1029_v28, 0.0  ;;  %v1431_v36 = vmax.f32 %v1399_v32, 0.0  ;;  %1700 = vperm.xlu0 %5247, %v1558_v44  }
  0xb4   : > { %v1062_v16 = vmax.f32 %v1030_v14, 0.0  ;;  %v1432_v18 = vmax.f32 %v1400_v24, 0.0  ;;  %v937_v37 = vmul.f32 %v5500_v57, %v5822_v46  ;;  %v1307_v50 = vmul.f32 %v5502_v58, %v5822_v46 }
  0xb5   : > { %v938_v38 = vmul.f32 %v5504_v59, %v5822_v46  ;;  %v1308_v33 = vmul.f32 %v5506_v60, %v5822_v46  ;;  %v8554_v35 = vmax.f32 %v5638_v56, 0.0  ;;  %v8555_v14 = vmax.f32 %v5641_v13, 0.0 }
  0xb6   : > { %v8556_v44 = vmax.f32 %v5644_v19, 0.0  ;;  %v8557_v52 = vmax.f32 %v5647_v27, 0.0  ;;  %v5850_v54 = vadd.f32 %v937_v37, %v893_v2  ;;  %v5852_v53 = vadd.f32 %v1307_v50, %v1263_v15  ;;  %v8564_v37 = vld [vmem:[#allocation16_spill] sm:$0xff] }
  0xb7   : > { %v1495_v28 = vpack.c.bf16 %v1061_v23, %v8554_v35  ;;  %v1527_v24 = vpack.c.bf16 %v1431_v36, %v8555_v14  ;;  %v5854_v48 = vadd.f32 %v938_v38, %v894_v12  ;;  %v5856_v46 = vadd.f32 %v1308_v33, %v1264_v22  ;;  %v8563_v23 = vld [vmem:[#allocation13_spill] sm:$0xff]  ;;  %v8566_v35 = vld [vmem:[#allocation18_spill] sm:$0xff]  ;;  %v8567_v14 = vld [vmem:[#allocation27_spill] sm:$0xff] }
  0xb8   : > { %v1496_v32 = vpack.c.bf16 %v1062_v16, %v8556_v44  ;;  %v1528_v25 = vpack.c.bf16 %v1432_v18, %v8557_v52  ;;  %v876_v56 = vmax.f32 %v844_v34, 0.0  ;;  %v1246_v13 = vmax.f32 %v1214_v63, 0.0  ;;  %1660 = vperm.xlu1 %5242, %v1550_v41   ;;  %v8565_v38 = vld [vmem:[#allocation17_spill] sm:$0xff] }
  0xb9   : > { %1883 = vmatpush.bf16.msra.mxu0 %v1495_v28  ;;  %1972 = vmatpush.bf16.msra.mxu1 %v1527_v24  ;;  %v877_v36 = vmax.f32 %v845_v51, 0.0  ;;  %v1215_v19 = vadd.f32 %v1183_v45, %v5804_v30  ;;  %v1243_v52 = vmax.f32 %v5829_v20, 0.0  ;;  %v5861_v18 = vadd.f32 %v5746_v39, %v764_v42  ;;  %v5865_v15 = vpop.permute.xlu0 %685  ;;  %v5867_v34 = vpop.permute.xlu1 %677  ;;  %v1555_v20 = vld [vmem:[%s5416_s18 + $0xc0] sm:$0xff] }
  0xba   : > { %2061 = vmatpush.bf16.msra.mxu2 %v1496_v32  ;;  %2150 = vmatpush.bf16.msra.mxu3 %v1528_v25  ;;  %v1174_v27 = vadd.f32 %v1142_v47, %v5571_v17  ;;  %v765_v2 = vadd.f32 %v733_v49, %v5582_v21  ;;  %8558 = vst [vmem:[#allocation39_spill] sm:$0xff] %v5865_v15  ;;  %v8559_v63 = vmax.f32 %v5703_v40, 0.0  ;;  %v8560_v25 = vmax.f32 %v5710_v29, 0.0  ;;  %v8568_v32 = vld [vmem:[#allocation28_spill] sm:$0xff] }
  0xbb   : > { %1565 = vperm.xlu2 %5246, %v1531_v55   ;;  %v8561_v42 = vmax.f32 %v5774_v31, 0.0  ;;  %v1247_v21 = vmax.f32 %v1215_v19, 0.0  ;;  %v953_v41 = vmul.f32 %v5500_v57, %v5865_v15  ;;  %v1323_v47 = vmul.f32 %v5502_v58, %v5865_v15  ;;  %v5889_v29 = vpop.permute.xlu2 %793  ;;  %1685 = vperm.xlu0 %5247, %v1555_v20   ;;  %v1548_v19 = vld [vmem:[%s5416_s18 + $0x88] sm:$0xff] }
  0xbc   : > { %v5871_v45 = vpack.c.bf16 %v876_v56, %v8559_v63  ;;  %v5875_v12 = vpack.c.bf16 %v1246_v13, %v8560_v25  ;;  %v954_v55 = vmul.f32 %v5504_v59, %v5865_v15  ;;  %v1324_v40 = vmul.f32 %v5506_v60, %v5865_v15  ;;  %v8569_v63 = vld [vmem:[#allocation29_spill] sm:$0xff] }
  0xbd   : > { %v5879_v17 = vpack.c.bf16 %v877_v36, %v8561_v42  ;;  %v945_v31 = vmul.f32 %v5500_v57, %v5867_v34  ;;  %v1315_v49 = vmul.f32 %v5502_v58, %v5867_v34  ;;  %v946_v22 = vmul.f32 %v5504_v59, %v5867_v34  ;;  %v1547_v36 = vld [vmem:[%s5416_s18 + $0x80] sm:$0xff] }
  0xbe   : > { %v1316_v51 = vmul.f32 %v5506_v60, %v5867_v34  ;;  %v985_v16 = vadd.f32 %v953_v41, %v8563_v23  ;;  %v1355_v50 = vadd.f32 %v1323_v47, %v8564_v37  ;;  %v986_v33 = vadd.f32 %v954_v55, %v8565_v38  ;;  %v8570_v41 = vld [vmem:[#allocation30_spill] sm:$0xff] }
  0xbf   : > { %8562 = vst [vmem:[#allocation40_spill] sm:$0xff] %v5879_v17  ;;  %v1356_v28 = vadd.f32 %v1324_v40, %v8566_v35  ;;  %v5905_v24 = vadd.f32 %v945_v31, %v8567_v14  ;;  %v5909_v44 = vadd.f32 %v5752_v4, %v5889_v29  ;;  %v5912_v56 = vadd.f32 %v1315_v49, %v8568_v32  ;;  %v8574_v14 = vld [vmem:[#allocation20_spill] sm:$0xff]  ;;  %v2821_v49 = vld [vmem:[%s5426_s19 + $0x10] sm:$0xff]  ;;  %v8576_v55 = vld [vmem:[#allocation22_spill] sm:$0xff] }
  0xc0   : > { %v5916_v13 = vadd.f32 %v5754_v6, %v5889_v29  ;;  %v5921_v25 = vadd.f32 %v946_v22, %v8569_v63  ;;  %v5925_v42 = vadd.f32 %v5756_v5, %v5889_v29  ;;  %v5928_v47 = vadd.f32 %v1316_v51, %v8570_v41  ;;  %1645 = vperm.xlu1 %5242, %v1547_v36  }
  0xc1   : > { %v5932_v4 = vadd.f32 %v5758_v1, %v5889_v29  ;;  %v5936_v40 = vpack.c.bf16 %v1247_v21, %v1243_v52  ;;  %v728_v31 = vmul.f32 %v5510_v62, %v5865_v15  ;;  %v868_v22 = vmax.f32 %v5861_v18, 0.0  ;;  %v8572_v1 = vld [vmem:[#allocation19_spill] sm:$0xff]  ;;  %v8573_v21 = vld [vmem:[#allocation5_spill] sm:$0xff] }
  0xc2   : > { %v1138_v51 = vmul.f32 %v5514_v0, %v5865_v15  ;;  %v1206_v23 = vadd.f32 %v1174_v27, %v5746_v39  ;;  %v729_v52 = vmul.f32 %v5522_v3, %v5865_v15  ;;  %v883_v37 = vperm.slane %v8573_v21, 4  ;;  %v5950_v38 = vpop.permute.xlu1 %798  ;;  %v5952_v35 = vpop.permute.xlu0 %673 }
  0xc3   : > { %8571 = vst [vmem:[#allocation13_spill] sm:$0xff] %v5936_v40  ;;  %1650 = vperm.xlu2 %5246, %v1548_v19   ;;  %v760_v20 = vadd.f32 %v728_v31, %v8572_v1  ;;  %v837_v32 = vadd.f32 %v5746_v39, %v765_v2  ;;  %v1139_v36 = vmul.f32 %v5538_v8, %v5865_v15  ;;  %v8575_v19 = vld [vmem:[#allocation24_spill] sm:$0xff]  ;;  %v8577_v15 = vmax.f32 %v5761_v43, 0.0  ;;  %v8581_v43 = vld [vmem:[#allocation23_spill] sm:$0xff] }
  0xc4   : > { %v1170_v18 = vadd.f32 %v1138_v51, %v8574_v14  ;;  %v1175_v27 = vadd.f32 %v5798_v26, %v8575_v19  ;;  %v1017_v63 = vadd.f32 %v985_v16, %v5950_v38  ;;  %v1387_v41 = vadd.f32 %v1355_v50, %v5950_v38 }
  0xc5   : > { %v1018_v31 = vadd.f32 %v986_v33, %v5950_v38  ;;  %v1388_v1 = vadd.f32 %v1356_v28, %v5950_v38  ;;  %v941_v51 = vmul.f32 %v5500_v57, %v5952_v35  ;;  %v1311_v2 = vmul.f32 %v5502_v58, %v5952_v35  ;;  %v2820_v33 = vld [vmem:[%s5426_s19 + $0x8] sm:$0xff] }
  0xc6   : > { %v942_v14 = vmul.f32 %v5504_v59, %v5952_v35  ;;  %v1312_v26 = vmul.f32 %v5506_v60, %v5952_v35  ;;  %v1049_v16 = vmax.f32 %v1017_v63, 0.0  ;;  %v1419_v19 = vmax.f32 %v1387_v41, 0.0 }
  0xc7   : > { %v1050_v50 = vmax.f32 %v1018_v31, 0.0  ;;  %v1420_v5 = vmax.f32 %v1388_v1, 0.0  ;;  %v832_v28 = vadd.f32 %v5950_v38, %v760_v20  ;;  %v1202_v57 = vadd.f32 %v1170_v18, %v5950_v38  ;;  %v1538_v1 = vld [vmem:[%s5416_s18 + $0x38] sm:$0xff] }
  0xc8   : > { %v1238_v6 = vmax.f32 %v1206_v23, 0.0  ;;  %v761_v58 = vadd.f32 %v729_v52, %v8576_v55  ;;  %v1491_v59 = vpack.c.bf16 %v8577_v15, %v1049_v16  ;;  %v8578_v30 = vmax.f32 %v5764_v9, 0.0  ;;  %1600 = vperm.xlu0 %5247, %v1538_v1   ;;  %2858 = vperm.xlu1 %5242, %v2820_v33   ;;  %v8586_v33 = vld [vmem:[#allocation33_spill] sm:$0xff]  ;;  %v2824_v1 = vld [vmem:[%s5426_s19 + $0x28] sm:$0xff] }
  0xc9   : > { %v8579_v60 = vmax.f32 %v5767_v10, 0.0  ;;  %v8580_v41 = vmax.f32 %v5770_v11, 0.0  ;;  %v864_v20 = vmax.f32 %v832_v28, 0.0  ;;  %v1234_v17 = vmax.f32 %v1202_v57, 0.0 }
  0xca   : > { %v1523_v40 = vpack.c.bf16 %v8578_v30, %v1419_v19  ;;  %v833_v23 = vadd.f32 %v5950_v38, %v761_v58  ;;  %v869_v18 = vmax.f32 %v837_v32, 0.0  ;;  %v1171_v15 = vadd.f32 %v1139_v36, %v8581_v43  ;;  %1884 = vmatpush.bf16.msra.mxu0 %v1491_v59  ;;  %v5993_v11 = vpop.permute.xlu1 %590  ;;  %v8582_v32 = vld [vmem:[#allocation7_spill] sm:$0xff]  ;;  %v8583_v36 = vld [vmem:[#allocation9_spill] sm:$0xff] }
  0xcb   : > { %v1492_v63 = vpack.c.bf16 %v8579_v60, %v1050_v50  ;;  %v1524_v31 = vpack.c.bf16 %v8580_v41, %v1420_v5  ;;  %2863 = vperm.xlu2 %5246, %v2821_v49   ;;  %v1207_v9 = vadd.f32 %v1175_v27, %v5746_v39  ;;  %v648_v10 = vmul.f32 %v5508_v61, %v5728_v7  ;;  %v8584_v27 = vld [vmem:[#allocation10_spill] sm:$0xff]  ;;  %v8587_v60 = vld [vmem:[#allocation36_spill] sm:$0xff]  ;;  %v6015_v41 = vpop.permute.xlu2 %783 }
  0xcc   : > { %v5991_v30 = vperm.slane %v883_v37, 0  ;;  %1973 = vmatpush.bf16.msra.mxu1 %v1523_v40  ;;  %v5995_v55 = vpack.c.bf16 %v868_v22, %v864_v20  ;;  %v5997_v5 = vpack.c.bf16 %v1238_v6, %v1234_v17  ;;  %v865_v52 = vmax.f32 %v833_v23, 0.0  ;;  %v8585_v17 = vld [vmem:[#allocation11_spill] sm:$0xff] }
  0xcd   : > { %v720_v49 = vmul.f32 %v5510_v62, %v5867_v34  ;;  %2062 = vmatpush.bf16.msra.mxu2 %v1492_v63  ;;  %2151 = vmatpush.bf16.msra.mxu3 %v1524_v31  ;;  %v897_v37 = vmul.f32 %v8582_v32, %v5993_v11  ;;  %v1267_v40 = vmul.f32 %v8583_v36, %v5993_v11  ;;  %v1239_v16 = vmax.f32 %v1207_v9, 0.0  ;;  %v2823_v31 = vld [vmem:[%s5426_s19 + $0x20] sm:$0xff]  ;;  %v8589_v9 = vld [vmem:[#allocation12_spill] sm:$0xff] }
  0xce   : > { %v898_v22 = vmul.f32 %v8584_v27, %v5993_v11  ;;  %v1268_v6 = vmul.f32 %v8585_v17, %v5993_v11  ;;  %v6009_v19 = vpack.c.bf16 %v869_v18, %v865_v52  ;;  %v1203_v50 = vadd.f32 %v1171_v15, %v5950_v38  ;;  %v8588_v18 = vld [vmem:[#allocation26_spill] sm:$0xff] }
  0xcf   : > { %v724_v28 = vmul.f32 %v5510_v62, %v8586_v33  ;;  %v973_v57 = vadd.f32 %v941_v51, %v897_v37  ;;  %v1343_v58 = vadd.f32 %v1311_v2, %v1267_v40  ;;  %v752_v63 = vadd.f32 %v720_v49, %v8587_v60 }
  0xd0   : > { %v974_v59 = vadd.f32 %v942_v14, %v898_v22  ;;  %v1344_v20 = vadd.f32 %v1312_v26, %v1268_v6  ;;  %v1235_v23 = vmax.f32 %v1203_v50, 0.0  ;;  %v1086_v52 = vmul.f32 %v8589_v9, %v8588_v18  ;;  %v1535_v14 = vld [vmem:[%s5416_s18 + $0x20] sm:$0xff]  ;;  %2873 = vperm.xlu1 %5242, %v2823_v31  }
  0xd1   : > { %v756_v43 = vadd.f32 %v724_v28, %v648_v10  ;;  %v6022_v15 = vadd.f32 %v973_v57, %v6015_v41  ;;  %v6025_v32 = vadd.f32 %v1343_v58, %v6015_v41  ;;  %v1090_v2 = vmul.f32 %v8589_v9, %v5728_v7  ;;  %1585 = vperm.xlu0 %5247, %v1535_v14   ;;  %v8590_v28 = vld [vmem:[#allocation14_spill] sm:$0xff] }
  0xd2   : > { %v6028_v51 = vadd.f32 %v974_v59, %v6015_v41  ;;  %v6034_v26 = vadd.f32 %v1344_v20, %v6015_v41  ;;  %v6036_v10 = vpack.c.bf16 %v1239_v16, %v1235_v23  ;;  %v1130_v37 = vmul.f32 %v5514_v0, %v5867_v34  ;;  %v6046_v17 = vpop.permute.xlu1 %788 }
  0xd3   : > { %v828_v49 = vadd.f32 %v5889_v29, %v756_v43  ;;  %2878 = vperm.xlu2 %5246, %v2824_v1   ;;  %v1037_v36 = vmax.f32 %v6022_v15, 0.0  ;;  %v1134_v22 = vmul.f32 %v5514_v0, %v8586_v33  ;;  %v645_v57 = vmul.f32 %v8590_v28, %v8588_v18 }
  0xd4   : > { %v1162_v50 = vadd.f32 %v1130_v37, %v1086_v52  ;;  %v1009_v58 = vadd.f32 %v5905_v24, %v6046_v17  ;;  %v1379_v59 = vadd.f32 %v5912_v56, %v6046_v17  ;;  %v1010_v60 = vadd.f32 %v5921_v25, %v6046_v17  ;;  %v2826_v37 = vld [vmem:[%s5426_s19 + $0x38] sm:$0xff]  ;;  %v2827_v56 = vld [vmem:[%s5426_s19 + $0x40] sm:$0xff] }
  0xd5   : > { %v860_v6 = vmax.f32 %v828_v49, 0.0  ;;  %v1380_v31 = vadd.f32 %v5928_v47, %v6046_v17  ;;  %v824_v1 = vadd.f32 %v6046_v17, %v752_v63  ;;  %v1166_v20 = vadd.f32 %v1134_v22, %v1090_v2 }
  0xd6   : > { %v1194_v23 = vadd.f32 %v1162_v50, %v6046_v17  ;;  %v649_v43 = vmul.f32 %v8590_v28, %v5728_v7  ;;  %v1041_v52 = vmax.f32 %v1009_v58, 0.0  ;;  %v1411_v14 = vmax.f32 %v1379_v59, 0.0 }
  0xd7   : > { %v1042_v24 = vmax.f32 %v1010_v60, 0.0  ;;  %v1412_v49 = vmax.f32 %v1380_v31, 0.0  ;;  %v856_v16 = vmax.f32 %v824_v1, 0.0  ;;  %v1198_v25 = vadd.f32 %v1166_v20, %v5889_v29 }
  0xd8   : > { %v1226_v27 = vmax.f32 %v1194_v23, 0.0  ;;  %v721_v47 = vmul.f32 %v5522_v3, %v5867_v34  ;;  %v8591_v63 = vmax.f32 %v5909_v44, 0.0  ;;  %v8592_v22 = vmax.f32 %v5916_v13, 0.0  ;;  %2888 = vperm.xlu1 %5242, %v2826_v37   ;;  %v8595_v44 = vld [vmem:[#allocation15_spill] sm:$0xff] }
  0xd9   : > { %v8593_v58 = vmax.f32 %v5925_v42, 0.0  ;;  %v8594_v60 = vmax.f32 %v5932_v4, 0.0  ;;  %v6076_v40 = vpack.c.bf16 %v860_v6, %v856_v16  ;;  %v1230_v1 = vmax.f32 %v1198_v25, 0.0 }
  0xda   : > { %v1487_v2 = vpack.c.bf16 %v8591_v63, %v1041_v52  ;;  %v1519_v50 = vpack.c.bf16 %v8592_v22, %v1411_v14  ;;  %v725_v20 = vmul.f32 %v5522_v3, %v8586_v33  ;;  %v753_v23 = vadd.f32 %v721_v47, %v645_v57  ;;  %v6087_v16 = vpop.permute.xlu1 %778 }
  0xdb   : > { %v1488_v59 = vpack.c.bf16 %v8593_v58, %v1042_v24  ;;  %v1520_v31 = vpack.c.bf16 %v8594_v60, %v1412_v49  ;;  %2893 = vperm.xlu2 %5246, %v2827_v56   ;;  %v1087_v52 = vmul.f32 %v8595_v44, %v8588_v18  ;;  %v1091_v13 = vmul.f32 %v8595_v44, %v5728_v7  ;;  %v8596_v24 = vld [vmem:[#allocation6_spill] sm:$0xff] }
  0xdc   : > { %v1131_v42 = vmul.f32 %v5538_v8, %v5867_v34  ;;  %v927_v4 = vperm.slane %v8573_v21, 5  ;;  %1885 = vmatpush.bf16.msra.mxu0 %v1487_v2  ;;  %1974 = vmatpush.bf16.msra.mxu1 %v1519_v50  ;;  %v6089_v6 = vpack.c.bf16 %v1230_v1, %v1226_v27  ;;  %v757_v57 = vadd.f32 %v725_v20, %v649_v43  ;;  %v8597_v1 = vld [vmem:[#allocation35_spill] sm:$0xff] }
  0xdd   : > { %v825_v14 = vadd.f32 %v6046_v17, %v753_v23  ;;  %v1253_v49 = vperm.slane %v8596_v24, 4  ;;  %2063 = vmatpush.bf16.msra.mxu2 %v1488_v59  ;;  %2152 = vmatpush.bf16.msra.mxu3 %v1520_v31  ;;  %v1001_v37 = vadd.f32 %v5850_v54, %v6087_v16  ;;  %v1371_v56 = vadd.f32 %v5852_v53, %v6087_v16  ;;  %v2829_v59 = vld [vmem:[%s5426_s19 + $0x50] sm:$0xff]  ;;  %v2830_v53 = vld [vmem:[%s5426_s19 + $0x58] sm:$0xff] }
  0xde   : > { %v1002_v25 = vadd.f32 %v5854_v48, %v6087_v16  ;;  %v6099_v27 = vperm.slane %v927_v4, 1  ;;  %v1372_v43 = vadd.f32 %v5856_v46, %v6087_v16  ;;  %v829_v47 = vadd.f32 %v5889_v29, %v757_v57 }
  0xdf   : > { %v857_v63 = vmax.f32 %v825_v14, 0.0  ;;  %v1135_v2 = vmul.f32 %v5538_v8, %v8586_v33  ;;  %v1033_v22 = vmax.f32 %v1001_v37, 0.0  ;;  %v1403_v50 = vmax.f32 %v1371_v56, 0.0 }
  0xe0   : > { %v1034_v54 = vmax.f32 %v1002_v25, 0.0  ;;  %v1163_v58 = vadd.f32 %v1131_v42, %v1087_v52  ;;  %v1404_v60 = vmax.f32 %v1372_v43, 0.0  ;;  %v861_v31 = vmax.f32 %v829_v47, 0.0  ;;  %2903 = vperm.xlu1 %5242, %v2829_v59  }
  0xe1   : > { %v1167_v48 = vadd.f32 %v1135_v2, %v1091_v13  ;;  %v636_v20 = vmul.f32 %v5508_v61, %v8597_v1  ;;  %v1483_v46 = vpack.c.bf16 %v1037_v36, %v1033_v22  ;;  %v8598_v23 = vmax.f32 %v6025_v32, 0.0  ;;  %v8601_v32 = vld [vmem:[#allocation38_spill] sm:$0xff] }
  0xe2   : > { %v8599_v57 = vmax.f32 %v6028_v51, 0.0  ;;  %v1195_v37 = vadd.f32 %v1163_v58, %v6046_v17  ;;  %v8600_v52 = vmax.f32 %v6034_v26, 0.0  ;;  %v6119_v56 = vpack.c.bf16 %v861_v31, %v857_v63 }
  0xe3   : > { %v1515_v4 = vpack.c.bf16 %v8598_v23, %v1403_v50  ;;  %v1199_v13 = vadd.f32 %v1167_v48, %v5889_v29  ;;  %v640_v25 = vmul.f32 %v5508_v61, %v5993_v11  ;;  %2908 = vperm.xlu2 %5246, %v2830_v53   ;;  %v712_v36 = vmul.f32 %v5510_v62, %v8601_v32  ;;  %v2833_v48 = vld [vmem:[%s5426_s19 + $0x70] sm:$0xff] }
  0xe4   : > { %v1484_v14 = vpack.c.bf16 %v8599_v57, %v1034_v54  ;;  %v1516_v42 = vpack.c.bf16 %v8600_v52, %v1404_v60  ;;  %v1227_v15 = vmax.f32 %v1195_v37, 0.0  ;;  %v716_v51 = vmul.f32 %v5510_v62, %v5952_v35  ;;  %1886 = vmatpush.bf16.msra.mxu0 %v1483_v46  ;;  %v8603_v57 = vld [vmem:[#allocation13_spill] sm:$0xff] }
  0xe5   : > { %v1078_v26 = vmul.f32 %v8589_v9, %v8597_v1  ;;  %1975 = vmatpush.bf16.msra.mxu1 %v1515_v4  ;;  %v1231_v43 = vmax.f32 %v1199_v13, 0.0  ;;  %v1082_v47 = vmul.f32 %v8589_v9, %v5993_v11  ;;  %v1122_v61 = vmul.f32 %v5514_v0, %v8601_v32  ;;  %v8602_v4 = vld [vmem:[#allocation40_spill] sm:$0xff] }
  0xe6   : > { %v1126_v63 = vmul.f32 %v5514_v0, %v5952_v35  ;;  %2064 = vmatpush.bf16.msra.mxu2 %v1484_v14  ;;  %2153 = vmatpush.bf16.msra.mxu3 %v1516_v42  ;;  %v744_v62 = vadd.f32 %v712_v36, %v636_v20  ;;  %v748_v2 = vadd.f32 %v716_v51, %v640_v25  ;;  %v6138_v50 = vperm.slane %v1253_v49, 0  ;;  %v2832_v49 = vld [vmem:[%s5426_s19 + $0x68] sm:$0xff] }
  0xe7   : > { %v637_v22 = vmul.f32 %v8590_v28, %v8597_v1  ;;  %v1504_v54 = vpack.c.bf16 %v1231_v43, %v1227_v15  ;;  %v1154_v58 = vadd.f32 %v1122_v61, %v1078_v26  ;;  %v641_v59 = vmul.f32 %v8590_v28, %v5993_v11 }
  0xe8   : > { %v1158_v9 = vadd.f32 %v1126_v63, %v1082_v47  ;;  %v816_v53 = vadd.f32 %v6087_v16, %v744_v62  ;;  %v820_v0 = vadd.f32 %v6015_v41, %v748_v2  ;;  %v713_v60 = vmul.f32 %v5522_v3, %v8601_v32  ;;  %1887 = vmatpush.bf16.msra.mxu0 %v5871_v45  ;;  %v8604_v63 = vld [vmem:[#allocation25_spill] sm:$0xff]  ;;  %v8605_v62 = vld [vmem:[#allocation32_spill] sm:$0xff] }
  0xe9   : > { %v717_v31 = vmul.f32 %v5522_v3, %v5952_v35  ;;  %1976 = vmatpush.bf16.msra.mxu1 %v5875_v12  ;;  %v1186_v20 = vadd.f32 %v1154_v58, %v6087_v16  ;;  %v1079_v46 = vmul.f32 %v8595_v44, %v8597_v1  ;;  %v1297_v23 = vperm.slane %v8596_v24, 5  ;;  %2918 = vperm.xlu1 %5242, %v2832_v49   ;;  %v8607_v58 = vld [vmem:[#allocation31_spill] sm:$0xff] }
  0xea   : > { %v1190_v28 = vadd.f32 %v1158_v9, %v6015_v41  ;;  %2065 = vmatpush.bf16.msra.mxu2 %v8602_v4  ;;  %2154 = vmatpush.bf16.msra.mxu3 %v8603_v57  ;;  %v848_v3 = vmax.f32 %v816_v53, 0.0  ;;  %v852_v14 = vmax.f32 %v820_v0, 0.0  ;;  %v745_v45 = vadd.f32 %v713_v60, %v637_v22  ;;  %v8606_v22 = vld [vmem:[#allocation21_spill] sm:$0xff]  ;;  %v2835_v60 = vld [vmem:[%s5426_s19 + $0x80] sm:$0xff] }
  0xeb   : > { %v749_v37 = vadd.f32 %v717_v31, %v641_v59  ;;  %v1218_v12 = vmax.f32 %v1186_v20, 0.0  ;;  %v1083_v42 = vmul.f32 %v8595_v44, %v5993_v11  ;;  %v1123_v13 = vmul.f32 %v5538_v8, %v8601_v32  ;;  %2923 = vperm.xlu2 %5246, %v2833_v48   ;;  %v2836_v31 = vld [vmem:[%s5426_s19 + $0x88] sm:$0xff] }
  0xec   : > { %v1222_v52 = vmax.f32 %v1190_v28, 0.0  ;;  %v1467_v25 = vpack.c.bf16 %v852_v14, %v848_v3  ;;  %v817_v24 = vadd.f32 %v6087_v16, %v745_v45  ;;  %v6165_v36 = vperm.slane %v1297_v23, 1  ;;  %1888 = vmatpush.bf16.msra.mxu0 %v5995_v55  ;;  %v8608_v3 = vld [vmem:[#allocation8_spill] sm:$0xff]  ;;  %v8609_v45 = vld [vmem:[#allocation37_spill] sm:$0xff] }
  0xed   : > { %v821_v15 = vadd.f32 %v6015_v41, %v749_v37  ;;  %1977 = vmatpush.bf16.msra.mxu1 %v5997_v5  ;;  %v1127_v44 = vmul.f32 %v5538_v8, %v5952_v35  ;;  %v1155_v26 = vadd.f32 %v1123_v13, %v1079_v46  ;;  %v884_v43 = vperm.slane %v8573_v21, 6 }
  0xee   : > { %v1499_v51 = vpack.c.bf16 %v1222_v52, %v1218_v12  ;;  %2066 = vmatpush.bf16.msra.mxu2 %v6009_v19  ;;  %2155 = vmatpush.bf16.msra.mxu3 %v6036_v10  ;;  %v849_v47 = vmax.f32 %v817_v24, 0.0  ;;  %v919_v55 = vmul.f32 %v5991_v30, %v8604_v63  ;;  %v923_v5 = vmul.f32 %v5991_v30, %v8605_v62  ;;  %v1552_v10 = vld [vmem:[%s5416_s18 + $0xa8] sm:$0xff]  ;;  %v5281_v12 = vld [vmem:[%s5395_s22 + $0x18] sm:$0xff]  ;;  %v4875_v24 = vld [vmem:[%s5411_s12] sm:$0xf] }
  0xef   : > { %v853_v61 = vmax.f32 %v821_v15, 0.0  ;;  %v1159_v2 = vadd.f32 %v1127_v44, %v1083_v42  ;;  %v1187_v8 = vadd.f32 %v1155_v26, %v6087_v16  ;;  %v963_v21 = vmul.f32 %v6099_v27, %v8606_v22  ;;  %1670 = vperm.xlu0 %5247, %v1552_v10   ;;  %v5146_v15 = vld [vmem:[%s5411_s12 + $0x4] sm:$0xf0] }
  0xf0   : > { %v967_v19 = vmul.f32 %v6099_v27, %v8607_v58  ;;  %v1289_v59 = vmul.f32 %v6138_v50, %v8604_v63  ;;  %v1293_v53 = vmul.f32 %v6138_v50, %v8605_v62  ;;  %v1333_v0 = vmul.f32 %v6165_v36, %v8606_v22  ;;  %1889 = vmatpush.bf16.msra.mxu0 %v6076_v40 }
  0xf1   : > { %v1468_v9 = vpack.c.bf16 %v853_v61, %v849_v47  ;;  %1978 = vmatpush.bf16.msra.mxu1 %v6089_v6  ;;  %v1191_v49 = vadd.f32 %v1159_v2, %v6015_v41  ;;  %v1219_v48 = vmax.f32 %v1187_v8, 0.0  ;;  %v995_v20 = vadd.f32 %v963_v21, %v919_v55  ;;  %v5280_v6 = vld [vmem:[%s5395_s22 + $0x8] sm:$0xff]  ;;  %2933 = vperm.xlu1 %5242, %v2835_v60   ;;  %v5145_v61 = vld [vmem:[%s5411_s12 + $0x4] sm:$0xf] }
  0xf2   : > { %v999_v28 = vadd.f32 %v967_v19, %v923_v5  ;;  %2067 = vmatpush.bf16.msra.mxu2 %v6119_v56  ;;  %2156 = vmatpush.bf16.msra.mxu3 %v1504_v54  ;;  %v1337_v46 = vmul.f32 %v6165_v36, %v8607_v58  ;;  %v1365_v23 = vadd.f32 %v1333_v0, %v1289_v59  ;;  %v6198_v40 = vperm.slane %v884_v43, 0  ;;  %v4877_v55 = vld [vmem:[%s5411_s12 + $0x8] sm:$0xf0] }
  0xf3   : > { %v928_v4 = vperm.slane %v5280_v6, 7  ;;  %v1223_v57 = vmax.f32 %v1191_v49, 0.0  ;;  %v1027_v14 = vadd.f32 %v995_v20, %v8608_v3  ;;  %v1254_v52 = vperm.slane %v5281_v12, 6  ;;  %2938 = vperm.xlu2 %5246, %v2836_v31  }
  0xf4   : > { %v1031_v37 = vadd.f32 %v999_v28, %v8609_v45  ;;  %v1369_v56 = vadd.f32 %v1337_v46, %v1293_v53  ;;  %v1397_v54 = vadd.f32 %v1365_v23, %v8608_v3  ;;  %v920_v42 = vmul.f32 %v6198_v40, %v8604_v63  ;;  %1890 = vmatpush.bf16.msra.mxu0 %v1467_v25  ;;  %v2838_v28 = vld [vmem:[%s5426_s19 + $0x98] sm:$0xff] }
  0xf5   : > { %v6207_v13 = vperm.slane %v928_v4, 1  ;;  %1979 = vmatpush.bf16.msra.mxu1 %v1499_v51  ;;  %v1500_v44 = vpack.c.bf16 %v1223_v57, %v1219_v48  ;;  %v1059_v26 = vmax.f32 %v1027_v14, 0.0  ;;  %v924_v47 = vmul.f32 %v6198_v40, %v8605_v62  ;;  %v8610_v48 = vld [vmem:[#allocation3_spill] sm:$0xff] }
  0xf6   : > { %v1063_v43 = vmax.f32 %v1031_v37, 0.0  ;;  %2068 = vmatpush.bf16.msra.mxu2 %v1468_v9  ;;  %v1401_v5 = vadd.f32 %v1369_v56, %v8609_v45  ;;  %v1429_v2 = vmax.f32 %v1397_v54, 0.0  ;;  %v6220_v51 = vperm.slane %v1254_v52, 0  ;;  %v2839_v4 = vld [vmem:[%s5426_s19 + $0xa0] sm:$0xff]  ;;  %v8611_v52 = vld [vmem:[#allocation4_spill] sm:$0xff] }
  0xf7   : > { %v964_v8 = vmul.f32 %v6207_v13, %v8606_v22  ;;  %v968_v21 = vmul.f32 %v6207_v13, %v8607_v58  ;;  %2157 = vmatpush.bf16.msra.mxu3 %v1500_v44  ;;  %v1298_v19 = vperm.slane %v5281_v12, 7  ;;  %v6222_v10 = vor.u32 %v5146_v15, %v4875_v24  ;;  %v6242_v57 = vld [vmem:[%s5395_s22] sm:$0xff]  ;;  %v8613_v44 = vld [vmem:[#allocation34_spill] sm:$0xff] }
  0xf8   : > { %v1497_v25 = vpack.c.bf16 %v1063_v43, %v1059_v26  ;;  %v1433_v59 = vmax.f32 %v1401_v5, 0.0  ;;  %v6224_v0 = vor.u32 %v5145_v61, %v4877_v55  ;;  %v1290_v60 = vmul.f32 %v6220_v51, %v8604_v63  ;;  %v8612_v54 = vld [vmem:[#allocation39_spill] sm:$0xff] }
  0xf9   : > { %v996_v9 = vadd.f32 %v964_v8, %v920_v42  ;;  %v1000_v53 = vadd.f32 %v968_v21, %v924_v47  ;;  %v1294_v31 = vmul.f32 %v6220_v51, %v8605_v62  ;;  %v6230_v49 = vperm.slane %v1298_v19, 1  ;;  %2069 = vmatmul.bf16.vlgmr.msra.gmra.mxu2 %v6222_v10  ;;  %1891 = vmatmul.bf16.vlgmr.msra.gmra.mxu0 %v6222_v10 }
  0xfa   : > { %2239 = vmatpush.bf16.msrb.mxu0 %v1497_v25  ;;  %v911_v20 = vmul.f32 %v5991_v30, %v8610_v48  ;;  %v1529_v46 = vpack.c.bf16 %v1433_v59, %v1429_v2  ;;  %2158 = vmatmul.bf16.vlgmr.msra.gmra.mxu3 %v6224_v0  ;;  %v626_v14 = vperm.slane %v6242_v57, 4  ;;  %v915_v56 = vmul.f32 %v5991_v30, %v8611_v52 }
  0xfb   : > { %v1028_v23 = vadd.f32 %v996_v9, %v8608_v3  ;;  %v1032_v6 = vadd.f32 %v1000_v53, %v8609_v45  ;;  %v1334_v37 = vmul.f32 %v6230_v49, %v8606_v22  ;;  %v1338_v12 = vmul.f32 %v6230_v49, %v8607_v58  ;;  %1980 = vmatmul.bf16.vlgmr.msra.gmra.mxu1 %v6224_v0 }
  0xfc   : > { %v955_v42 = vmul.f32 %v6099_v27, %v8612_v54  ;;  %2328 = vmatpush.bf16.msrb.mxu1 %v1529_v46  ;;  %v959_v26 = vmul.f32 %v6099_v27, %v8613_v44  ;;  %v1281_v43 = vmul.f32 %v6138_v50, %v8610_v48  ;;  %2948 = vperm.xlu1 %5242, %v2838_v28  }
  0xfd   : > { %v1060_v24 = vmax.f32 %v1028_v23, 0.0  ;;  %v1064_v15 = vmax.f32 %v1032_v6, 0.0  ;;  %v1366_v47 = vadd.f32 %v1334_v37, %v1290_v60  ;;  %v1370_v61 = vadd.f32 %v1338_v12, %v1294_v31  ;;  %2953 = vperm.xlu2 %5246, %v2839_v4  }
  0xfe   : > { %v987_v55 = vadd.f32 %v955_v42, %v911_v20  ;;  %v1285_v5 = vmul.f32 %v6138_v50, %v8611_v52  ;;  %v991_v8 = vadd.f32 %v959_v26, %v915_v56  ;;  %v1325_v21 = vmul.f32 %v6165_v36, %v8612_v54 }
  0xff   : > { %v1498_v2 = vpack.c.bf16 %v1064_v15, %v1060_v24  ;;  %v1329_v25 = vmul.f32 %v6165_v36, %v8613_v44  ;;  %v1398_v19 = vadd.f32 %v1366_v47, %v8608_v3  ;;  %v1402_v59 = vadd.f32 %v1370_v61, %v8609_v45 }
 0x100   : > { %v1019_v9 = vadd.f32 %v987_v55, %v5950_v38  ;;  %v912_v53 = vmul.f32 %v6198_v40, %v8610_v48  ;;  %v1023_v60 = vadd.f32 %v991_v8, %v5746_v39  ;;  %v1357_v31 = vadd.f32 %v1325_v21, %v1281_v43 }
 0x101   : > { %2417 = vmatpush.bf16.msrb.mxu2 %v1498_v2  ;;  %v1361_v20 = vadd.f32 %v1329_v25, %v1285_v5  ;;  %v916_v28 = vmul.f32 %v6198_v40, %v8611_v52  ;;  %v1430_v46 = vmax.f32 %v1398_v19, 0.0  ;;  %v1434_v23 = vmax.f32 %v1402_v59, 0.0  ;;  %v1549_v19 = vld [vmem:[%s5416_s18 + $0x90] sm:$0xff] }
 0x102   : > { %v1051_v6 = vmax.f32 %v1019_v9, 0.0  ;;  %v956_v4 = vmul.f32 %v6207_v13, %v8612_v54  ;;  %v1055_v37 = vmax.f32 %v1023_v60, 0.0  ;;  %v1389_v12 = vadd.f32 %v1357_v31, %v5950_v38  ;;  %v2841_v59 = vld [vmem:[%s5426_s19 + $0xb0] sm:$0xff]  ;;  %v2842_v9 = vld [vmem:[%s5426_s19 + $0xb8] sm:$0xff]  ;;  %1655 = vperm.xlu0 %5247, %v1549_v19  }
 0x103   : > { %v1393_v56 = vadd.f32 %v1361_v20, %v5746_v39  ;;  %v960_v42 = vmul.f32 %v6207_v13, %v8613_v44  ;;  %v1530_v24 = vpack.c.bf16 %v1434_v23, %v1430_v46  ;;  %v1282_v26 = vmul.f32 %v6220_v51, %v8610_v48 }
 0x104   : > { %v988_v15 = vadd.f32 %v956_v4, %v912_v53  ;;  %v1286_v43 = vmul.f32 %v6220_v51, %v8611_v52  ;;  %v1493_v47 = vpack.c.bf16 %v1055_v37, %v1051_v6  ;;  %v1421_v61 = vmax.f32 %v1389_v12, 0.0  ;;  %2963 = vperm.xlu1 %5242, %v2841_v59  }
 0x105   : > { %v1425_v55 = vmax.f32 %v1393_v56, 0.0  ;;  %v992_v5 = vadd.f32 %v960_v42, %v916_v28  ;;  %2506 = vmatpush.bf16.msrb.mxu3 %v1530_v24  ;;  %v1326_v8 = vmul.f32 %v6230_v49, %v8612_v54  ;;  %v1330_v21 = vmul.f32 %v6230_v49, %v8613_v44  ;;  %2968 = vperm.xlu2 %5246, %v2842_v9  }
 0x106   : > { %v1020_v2 = vadd.f32 %v988_v15, %v5950_v38  ;;  %v903_v25 = vmul.f32 %v5991_v30, %v8588_v18  ;;  %2240 = vmatpush.bf16.msrb.mxu0 %v1493_v47  ;;  %v907_v31 = vmul.f32 %v5991_v30, %v5728_v7  ;;  %v947_v20 = vmul.f32 %v6099_v27, %v5867_v34 }
 0x107   : > { %v1525_v53 = vpack.c.bf16 %v1425_v55, %v1421_v61  ;;  %v1024_v60 = vadd.f32 %v992_v5, %v5746_v39  ;;  %v1358_v46 = vadd.f32 %v1326_v8, %v1282_v26  ;;  %v1362_v23 = vadd.f32 %v1330_v21, %v1286_v43 }
 0x108   : > { %v1052_v28 = vmax.f32 %v1020_v2, 0.0  ;;  %v951_v6 = vmul.f32 %v6099_v27, %v8586_v33  ;;  %v979_v37 = vadd.f32 %v947_v20, %v903_v25  ;;  %v1273_v12 = vmul.f32 %v6138_v50, %v8588_v18 }
 0x109   : > { %2329 = vmatpush.bf16.msrb.mxu1 %v1525_v53  ;;  %v1056_v4 = vmax.f32 %v1024_v60, 0.0  ;;  %v1277_v56 = vmul.f32 %v6138_v50, %v5728_v7  ;;  %v1390_v42 = vadd.f32 %v1358_v46, %v5950_v38  ;;  %v1394_v24 = vadd.f32 %v1362_v23, %v5746_v39 }
 0x10a   : > { %v983_v15 = vadd.f32 %v951_v6, %v907_v31  ;;  %v1317_v26 = vmul.f32 %v6165_v36, %v5867_v34  ;;  %v1011_v47 = vadd.f32 %v979_v37, %v6046_v17  ;;  %v1321_v61 = vmul.f32 %v6165_v36, %v8586_v33 }
 0x10b   : > { %v1494_v43 = vpack.c.bf16 %v1056_v4, %v1052_v28  ;;  %v904_v55 = vmul.f32 %v6198_v40, %v8588_v18  ;;  %v1422_v5 = vmax.f32 %v1390_v42, 0.0  ;;  %v1426_v2 = vmax.f32 %v1394_v24, 0.0 }
 0x10c   : > { %v1015_v8 = vadd.f32 %v983_v15, %v5889_v29  ;;  %v1349_v21 = vadd.f32 %v1317_v26, %v1273_v12  ;;  %v1043_v25 = vmax.f32 %v1011_v47, 0.0  ;;  %v1353_v19 = vadd.f32 %v1321_v61, %v1277_v56 }
 0x10d   : > { %2418 = vmatpush.bf16.msrb.mxu2 %v1494_v43  ;;  %v908_v59 = vmul.f32 %v6198_v40, %v5728_v7  ;;  %v948_v9 = vmul.f32 %v6207_v13, %v5867_v34  ;;  %v1526_v53 = vpack.c.bf16 %v1426_v2, %v1422_v5  ;;  %v952_v20 = vmul.f32 %v6207_v13, %v8586_v33 }
 0x10e   : > { %v1047_v60 = vmax.f32 %v1015_v8, 0.0  ;;  %v1381_v31 = vadd.f32 %v1349_v21, %v6046_v17  ;;  %v1385_v28 = vadd.f32 %v1353_v19, %v5889_v29  ;;  %v1274_v23 = vmul.f32 %v6220_v51, %v8588_v18 }
 0x10f   : > { %v980_v46 = vadd.f32 %v948_v9, %v904_v55  ;;  %v1278_v6 = vmul.f32 %v6220_v51, %v5728_v7  ;;  %2507 = vmatpush.bf16.msrb.mxu3 %v1526_v53  ;;  %v984_v12 = vadd.f32 %v952_v20, %v908_v59  ;;  %v1318_v56 = vmul.f32 %v6230_v49, %v5867_v34 }
 0x110   : > { %v1489_v4 = vpack.c.bf16 %v1047_v60, %v1043_v25  ;;  %v1413_v37 = vmax.f32 %v1381_v31, 0.0  ;;  %v1417_v42 = vmax.f32 %v1385_v28, 0.0  ;;  %v1322_v15 = vmul.f32 %v6230_v49, %v8586_v33 }
 0x111   : > { %v1012_v24 = vadd.f32 %v980_v46, %v6046_v17  ;;  %v895_v26 = vmul.f32 %v5991_v30, %v8597_v1  ;;  %v1016_v43 = vadd.f32 %v984_v12, %v5889_v29  ;;  %v1350_v47 = vadd.f32 %v1318_v56, %v1274_v23 }
 0x112   : > { %2241 = vmatpush.bf16.msrb.mxu0 %v1489_v4  ;;  %v899_v61 = vmul.f32 %v5991_v30, %v5993_v11  ;;  %v939_v55 = vmul.f32 %v6099_v27, %v8601_v32  ;;  %v1521_v5 = vpack.c.bf16 %v1417_v42, %v1413_v37  ;;  %v1354_v8 = vadd.f32 %v1322_v15, %v1278_v6 }
 0x113   : > { %v1044_v2 = vmax.f32 %v1012_v24, 0.0  ;;  %v943_v21 = vmul.f32 %v6099_v27, %v5952_v35  ;;  %v1048_v25 = vmax.f32 %v1016_v43, 0.0  ;;  %v1382_v19 = vadd.f32 %v1350_v47, %v6046_v17 }
 0x114   : > { %v971_v59 = vadd.f32 %v939_v55, %v895_v26  ;;  %v1265_v9 = vmul.f32 %v6138_v50, %v8597_v1  ;;  %2330 = vmatpush.bf16.msrb.mxu1 %v1521_v5  ;;  %v1386_v53 = vadd.f32 %v1354_v8, %v5889_v29  ;;  %v1269_v60 = vmul.f32 %v6138_v50, %v5993_v11 }
 0x115   : > { %v975_v30 = vadd.f32 %v943_v21, %v899_v61  ;;  %v1309_v31 = vmul.f32 %v6165_v36, %v8601_v32  ;;  %v1490_v20 = vpack.c.bf16 %v1048_v25, %v1044_v2  ;;  %v1414_v28 = vmax.f32 %v1382_v19, 0.0 }
 0x116   : > { %v1003_v27 = vadd.f32 %v971_v59, %v6087_v16  ;;  %v1313_v46 = vmul.f32 %v6165_v36, %v5952_v35  ;;  %v1418_v23 = vmax.f32 %v1386_v53, 0.0  ;;  %v896_v37 = vmul.f32 %v6198_v40, %v8597_v1  ;;  %v6377_v53 = vld [vmem:[%s5395_s22 + $0x10] sm:$0xff] }
 0x117   : > { %v1007_v6 = vadd.f32 %v975_v30, %v6015_v41  ;;  %v1341_v4 = vadd.f32 %v1309_v31, %v1265_v9  ;;  %2419 = vmatpush.bf16.msrb.mxu2 %v1490_v20  ;;  %v900_v56 = vmul.f32 %v6198_v40, %v5993_v11  ;;  %v940_v42 = vmul.f32 %v6207_v13, %v8601_v32 }
 0x118   : > { %v1035_v12 = vmax.f32 %v1003_v27, 0.0  ;;  %v1345_v50 = vadd.f32 %v1313_v46, %v1269_v60  ;;  %v1522_v24 = vpack.c.bf16 %v1418_v23, %v1414_v28  ;;  %v944_v26 = vmul.f32 %v6207_v13, %v5952_v35 }
 0x119   : > { %v1039_v15 = vmax.f32 %v1007_v6, 0.0  ;;  %v1373_v36 = vadd.f32 %v1341_v4, %v6087_v16  ;;  %v972_v47 = vadd.f32 %v940_v42, %v896_v37  ;;  %v1266_v61 = vmul.f32 %v6220_v51, %v8597_v1 }
 0x11a   : > { %v1377_v43 = vadd.f32 %v1345_v50, %v6015_v41  ;;  %v1270_v40 = vmul.f32 %v6220_v51, %v5993_v11  ;;  %2508 = vmatpush.bf16.msrb.mxu3 %v1522_v24  ;;  %v976_v2 = vadd.f32 %v944_v26, %v900_v56  ;;  %v1310_v8 = vmul.f32 %v6230_v49, %v8601_v32  ;;  %v2844_v50 = vld [vmem:[%s5426_s19 + $0xc8] sm:$0xff]  ;;  %v2845_v56 = vld [vmem:[%s5426_s19 + $0xd0] sm:$0xff] }
 0x11b   : > { %v1485_v55 = vpack.c.bf16 %v1039_v15, %v1035_v12  ;;  %v1405_v5 = vmax.f32 %v1373_v36, 0.0  ;;  %v1004_v13 = vadd.f32 %v972_v47, %v6087_v16  ;;  %v1314_v25 = vmul.f32 %v6230_v49, %v5952_v35  ;;  %v1532_v12 = vld [vmem:[%s5416_s18 + $0x8] sm:$0xff]  ;;  %2978 = vperm.xlu1 %5242, %v2844_v50   ;;  %2983 = vperm.xlu2 %5246, %v2845_v56  }
 0x11c   : > { %v1409_v21 = vmax.f32 %v1377_v43, 0.0  ;;  %v6372_v19 = vperm.slane %v626_v14, 0  ;;  %v1008_v51 = vadd.f32 %v976_v2, %v6015_v41  ;;  %v1342_v59 = vadd.f32 %v1310_v8, %v1266_v61  ;;  %1570 = vperm.xlu0 %5247, %v1532_v12  }
 0x11d   : > { %2242 = vmatpush.bf16.msrb.mxu0 %v1485_v55  ;;  %v702_v9 = vperm.slane %v6242_v57, 5  ;;  %v1068_v30 = vperm.slane %v6377_v53, 4  ;;  %v1036_v31 = vmax.f32 %v1004_v13, 0.0  ;;  %v1346_v49 = vadd.f32 %v1314_v25, %v1270_v40 }
 0x11e   : > { %v1517_v60 = vpack.c.bf16 %v1409_v21, %v1405_v5  ;;  %v662_v14 = vmul.f32 %v6372_v19, %v8604_v63  ;;  %v1040_v20 = vmax.f32 %v1008_v51, 0.0  ;;  %v1374_v28 = vadd.f32 %v1342_v59, %v6087_v16  ;;  %v4883_v51 = vld [vmem:[%s5411_s12 + $0x10] sm:$0xf]  ;;  %v5148_v59 = vld [vmem:[%s5411_s12 + $0x14] sm:$0xf0] }
 0x11f   : > { %v666_v27 = vmul.f32 %v6372_v19, %v8605_v62  ;;  %v6385_v46 = vperm.slane %v702_v9, 1  ;;  %v1378_v23 = vadd.f32 %v1346_v49, %v6015_v41  ;;  %v6388_v6 = vperm.slane %v1068_v30, 0 }
 0x120   : > { %2331 = vmatpush.bf16.msrb.mxu1 %v1517_v60  ;;  %v1112_v4 = vperm.slane %v6377_v53, 5  ;;  %v627_v37 = vperm.slane %v6242_v57, 6  ;;  %v1486_v42 = vpack.c.bf16 %v1040_v20, %v1036_v31  ;;  %v1406_v24 = vmax.f32 %v1374_v28, 0.0  ;;  %v6421_v31 = vpop.permute.xlu2 %1715 }
 0x121   : > { %v738_v15 = vmul.f32 %v6385_v46, %v8606_v22  ;;  %v742_v36 = vmul.f32 %v6385_v46, %v8607_v58  ;;  %v1410_v26 = vmax.f32 %v1378_v23, 0.0  ;;  %v1104_v43 = vmul.f32 %v6388_v6, %v8604_v63  ;;  %8614 = vst [vmem:[#allocation16_spill] sm:$0xff] %v6421_v31 }
 0x122   : > { %v1108_v47 = vmul.f32 %v6388_v6, %v8605_v62  ;;  %v6403_v61 = vperm.slane %v1112_v4, 1  ;;  %2420 = vmatpush.bf16.msrb.mxu2 %v1486_v42  ;;  %v6405_v5 = vperm.slane %v627_v37, 0  ;;  %v703_v2 = vperm.slane %v6242_v57, 7 }
 0x123   : > { %v770_v40 = vadd.f32 %v738_v15, %v662_v14  ;;  %v774_v55 = vadd.f32 %v742_v36, %v666_v27  ;;  %v1518_v8 = vpack.c.bf16 %v1410_v26, %v1406_v24  ;;  %v1069_v25 = vperm.slane %v6377_v53, 6  ;;  %v5147_v24 = vld [vmem:[%s5411_s12 + $0x14] sm:$0xf]  ;;  %v4885_v15 = vld [vmem:[%s5411_s12 + $0x18] sm:$0xf0] }
 0x124   : > { %v1148_v21 = vmul.f32 %v6403_v61, %v8606_v22  ;;  %v1152_v13 = vmul.f32 %v6403_v61, %v8607_v58  ;;  %v663_v60 = vmul.f32 %v6405_v5, %v8604_v63  ;;  %v667_v57 = vmul.f32 %v6405_v5, %v8605_v62 }
 0x125   : > { %v842_v9 = vadd.f32 %v8608_v3, %v770_v40  ;;  %v846_v30 = vadd.f32 %v8609_v45, %v774_v55  ;;  %2509 = vmatpush.bf16.msrb.mxu3 %v1518_v8  ;;  %v6423_v20 = vperm.slane %v703_v2, 1  ;;  %v6425_v28 = vperm.slane %v1069_v25, 0 }
 0x126   : > { %v1180_v49 = vadd.f32 %v1148_v21, %v1104_v43  ;;  %v1184_v14 = vadd.f32 %v1152_v13, %v1108_v47  ;;  %v1113_v4 = vperm.slane %v6377_v53, 7  ;;  %v6428_v37 = vor.u32 %v5148_v59, %v4883_v51 }
 0x127   : > { %v874_v27 = vmax.f32 %v842_v9, 0.0  ;;  %v878_v23 = vmax.f32 %v846_v30, 0.0  ;;  %v739_v56 = vmul.f32 %v6423_v20, %v8606_v22  ;;  %v743_v42 = vmul.f32 %v6423_v20, %v8607_v58 }
 0x128   : > { %v1212_v12 = vadd.f32 %v1180_v49, %v8608_v3  ;;  %v1216_v50 = vadd.f32 %v1184_v14, %v8609_v45  ;;  %v1105_v26 = vmul.f32 %v6425_v28, %v8604_v63  ;;  %v1109_v53 = vmul.f32 %v6425_v28, %v8605_v62  ;;  %1896 = vmatmul.bf16.gmra.mxu0 %v6428_v37 }
 0x129   : > { %v1481_v36 = vpack.c.bf16 %v878_v23, %v874_v27  ;;  %v6442_v43 = vperm.slane %v1113_v4, 1  ;;  %2074 = vmatmul.bf16.gmra.mxu2 %v6428_v37  ;;  %v771_v55 = vadd.f32 %v739_v56, %v663_v60  ;;  %v775_v2 = vadd.f32 %v743_v42, %v667_v57 }
 0x12a   : > { %v1244_v47 = vmax.f32 %v1212_v12, 0.0  ;;  %v1248_v40 = vmax.f32 %v1216_v50, 0.0  ;;  %v6450_v21 = vor.u32 %v5147_v24, %v4885_v15  ;;  %v654_v62 = vmul.f32 %v6372_v19, %v8610_v48  ;;  %v6470_v12 = vpop.permute.xlu2 %1625 }
 0x12b   : > { %2243 = vmatpush.bf16.msrb.mxu0 %v1481_v36  ;;  %v1149_v8 = vmul.f32 %v6442_v43, %v8606_v22  ;;  %v1153_v63 = vmul.f32 %v6442_v43, %v8607_v58  ;;  %v843_v25 = vadd.f32 %v8608_v3, %v771_v55  ;;  %v847_v51 = vadd.f32 %v8609_v45, %v775_v2 }
 0x12c   : > { %v1513_v13 = vpack.c.bf16 %v1248_v40, %v1244_v47  ;;  %v658_v59 = vmul.f32 %v6372_v19, %v8611_v52  ;;  %2163 = vmatmul.bf16.gmra.mxu3 %v6450_v21  ;;  %1985 = vmatmul.bf16.gmra.mxu1 %v6450_v21  ;;  %v730_v22 = vmul.f32 %v6385_v46, %v8612_v54 }
 0x12d   : > { %v1181_v9 = vadd.f32 %v1149_v8, %v1105_v26  ;;  %v1185_v30 = vadd.f32 %v1153_v63, %v1109_v53  ;;  %v875_v58 = vmax.f32 %v843_v25, 0.0  ;;  %v879_v60 = vmax.f32 %v847_v51, 0.0 }
 0x12e   : > { %2332 = vmatpush.bf16.msrb.mxu1 %v1513_v13  ;;  %v734_v57 = vmul.f32 %v6385_v46, %v8613_v44  ;;  %v1096_v49 = vmul.f32 %v6388_v6, %v8610_v48  ;;  %v762_v23 = vadd.f32 %v730_v22, %v654_v62  ;;  %v1100_v4 = vmul.f32 %v6388_v6, %v8611_v52 }
 0x12f   : > { %v1213_v14 = vadd.f32 %v1181_v9, %v8608_v3  ;;  %v1217_v27 = vadd.f32 %v1185_v30, %v8609_v45  ;;  %v1482_v50 = vpack.c.bf16 %v879_v60, %v875_v58  ;;  %v1140_v42 = vmul.f32 %v6403_v61, %v8612_v54 }
 0x130   : > { %v766_v56 = vadd.f32 %v734_v57, %v658_v59  ;;  %v1144_v24 = vmul.f32 %v6403_v61, %v8613_v44  ;;  %v834_v3 = vadd.f32 %v5950_v38, %v762_v23  ;;  %v655_v45 = vmul.f32 %v6405_v5, %v8610_v48 }
 0x131   : > { %v1245_v15 = vmax.f32 %v1213_v14, 0.0  ;;  %v1249_v36 = vmax.f32 %v1217_v27, 0.0  ;;  %2421 = vmatpush.bf16.msrb.mxu2 %v1482_v50  ;;  %v1172_v53 = vadd.f32 %v1140_v42, %v1096_v49  ;;  %v659_v40 = vmul.f32 %v6405_v5, %v8611_v52  ;;  %v2847_v14 = vld [vmem:[%s5426_s19 + $0xe0] sm:$0xff]  ;;  %v2848_v27 = vld [vmem:[%s5426_s19 + $0xe8] sm:$0xff] }
 0x132   : > { %v838_v26 = vadd.f32 %v5746_v39, %v766_v56  ;;  %v1176_v47 = vadd.f32 %v1144_v24, %v1100_v4  ;;  %v866_v2 = vmax.f32 %v834_v3, 0.0  ;;  %v731_v8 = vmul.f32 %v6423_v20, %v8612_v54  ;;  %2993 = vperm.xlu1 %5242, %v2847_v14   ;;  %2998 = vperm.xlu2 %5246, %v2848_v27   ;;  %v6509_v3 = vpop.permute.xlu2 %1710 }
 0x133   : > { %v1514_v55 = vpack.c.bf16 %v1249_v36, %v1245_v15  ;;  %v735_v63 = vmul.f32 %v6423_v20, %v8613_v44  ;;  %v1204_v13 = vadd.f32 %v1172_v53, %v5950_v38  ;;  %v1097_v51 = vmul.f32 %v6425_v28, %v8610_v48  ;;  %8615 = vst [vmem:[#allocation17_spill] sm:$0xff] %v6509_v3  ;;  %v4973_v3 = vld [vmem:[%s5411_s12 + $0xc8] sm:$0xf0] }
 0x134   : > { %v870_v62 = vmax.f32 %v838_v26, 0.0  ;;  %v1208_v25 = vadd.f32 %v1176_v47, %v5746_v39  ;;  %v763_v59 = vadd.f32 %v731_v8, %v655_v45  ;;  %v1101_v30 = vmul.f32 %v6425_v28, %v8611_v52 }
 0x135   : > { %2510 = vmatpush.bf16.msrb.mxu3 %v1514_v55  ;;  %v767_v9 = vadd.f32 %v735_v63, %v659_v40  ;;  %v1141_v22 = vmul.f32 %v6442_v43, %v8612_v54  ;;  %v1236_v60 = vmax.f32 %v1204_v13, 0.0  ;;  %v1145_v49 = vmul.f32 %v6442_v43, %v8613_v44  ;;  %v2850_v13 = vld [vmem:[%s5426_s19 + $0xf8] sm:$0xff] }
 0x136   : > { %v1477_v58 = vpack.c.bf16 %v870_v62, %v866_v2  ;;  %v1240_v57 = vmax.f32 %v1208_v25, 0.0  ;;  %v835_v23 = vadd.f32 %v5950_v38, %v763_v59  ;;  %v646_v50 = vmul.f32 %v6372_v19, %v8588_v18 }
 0x137   : > { %v839_v48 = vadd.f32 %v5746_v39, %v767_v9  ;;  %v1173_v4 = vadd.f32 %v1141_v22, %v1097_v51  ;;  %v1177_v54 = vadd.f32 %v1145_v49, %v1101_v30  ;;  %v650_v56 = vmul.f32 %v6372_v19, %v5728_v7 }
 0x138   : > { %2244 = vmatpush.bf16.msrb.mxu0 %v1477_v58  ;;  %v1509_v52 = vpack.c.bf16 %v1240_v57, %v1236_v60  ;;  %v722_v44 = vmul.f32 %v6385_v46, %v5867_v34  ;;  %v867_v42 = vmax.f32 %v835_v23, 0.0  ;;  %v726_v36 = vmul.f32 %v6385_v46, %v8586_v33  ;;  %v4011_v57 = vld [vmem:[%s5431_s30] sm:$0xff] }
 0x139   : > { %v871_v24 = vmax.f32 %v839_v48, 0.0  ;;  %v1205_v15 = vadd.f32 %v1173_v4, %v5950_v38  ;;  %v1209_v45 = vadd.f32 %v1177_v54, %v5746_v39  ;;  %v1088_v53 = vmul.f32 %v6388_v6, %v8588_v18 }
 0x13a   : > { %2333 = vmatpush.bf16.msrb.mxu1 %v1509_v52  ;;  %v754_v26 = vadd.f32 %v722_v44, %v646_v50  ;;  %v1092_v47 = vmul.f32 %v6388_v6, %v5728_v7  ;;  %v758_v38 = vadd.f32 %v726_v36, %v650_v56  ;;  %v1132_v2 = vmul.f32 %v6403_v61, %v5867_v34 }
 0x13b   : > { %v1478_v40 = vpack.c.bf16 %v871_v24, %v867_v42  ;;  %v1237_v55 = vmax.f32 %v1205_v15, 0.0  ;;  %v1241_v8 = vmax.f32 %v1209_v45, 0.0  ;;  %v1136_v39 = vmul.f32 %v6403_v61, %v8586_v33  ;;  %3008 = vperm.xlu1 %5242, %v2850_v13   ;;  %4045 = vperm.xlu2 %5246, %v4011_v57  }
 0x13c   : > { %v826_v63 = vadd.f32 %v6046_v17, %v754_v26  ;;  %v647_v62 = vmul.f32 %v6405_v5, %v8588_v18  ;;  %v830_v25 = vadd.f32 %v5889_v29, %v758_v38  ;;  %v1164_v51 = vadd.f32 %v1132_v2, %v1088_v53  ;;  %v4013_v38 = vld [vmem:[%s5431_s30 + $0x10] sm:$0xff] }
 0x13d   : > { %2422 = vmatpush.bf16.msrb.mxu2 %v1478_v40  ;;  %v651_v59 = vmul.f32 %v6405_v5, %v5728_v7  ;;  %v723_v9 = vmul.f32 %v6423_v20, %v5867_v34  ;;  %v1510_v30 = vpack.c.bf16 %v1241_v8, %v1237_v55  ;;  %v1168_v58 = vadd.f32 %v1136_v39, %v1092_v47 }
 0x13e   : > { %v858_v22 = vmax.f32 %v826_v63, 0.0  ;;  %v727_v60 = vmul.f32 %v6423_v20, %v8586_v33  ;;  %v862_v49 = vmax.f32 %v830_v25, 0.0  ;;  %v1196_v14 = vadd.f32 %v1164_v51, %v6046_v17  ;;  %v4014_v25 = vld [vmem:[%s5431_s30 + $0x18] sm:$0xff] }
 0x13f   : > { %v755_v27 = vadd.f32 %v723_v9, %v647_v62  ;;  %v1089_v23 = vmul.f32 %v6425_v28, %v8588_v18  ;;  %2511 = vmatpush.bf16.msrb.mxu3 %v1510_v30  ;;  %v1200_v48 = vadd.f32 %v1168_v58, %v5889_v29  ;;  %v1093_v50 = vmul.f32 %v6425_v28, %v5728_v7 }
 0x140   : > { %v759_v4 = vadd.f32 %v727_v60, %v651_v59  ;;  %v1133_v52 = vmul.f32 %v6442_v43, %v5867_v34  ;;  %v1473_v54 = vpack.c.bf16 %v862_v49, %v858_v22  ;;  %v1228_v56 = vmax.f32 %v1196_v14, 0.0 }
 0x141   : > { %v827_v44 = vadd.f32 %v6046_v17, %v755_v27  ;;  %v1137_v42 = vmul.f32 %v6442_v43, %v8586_v33  ;;  %v1232_v18 = vmax.f32 %v1200_v48, 0.0  ;;  %v638_v36 = vmul.f32 %v6372_v19, %v8597_v1  ;;  %v6550_v33 = vpop.permute.xlu2 %1695  ;;  %v5150_v48 = vld [vmem:[%s5411_s12 + $0x24] sm:$0xf0] }
 0x142   : > { %v831_v24 = vadd.f32 %v5889_v29, %v759_v4  ;;  %v1165_v15 = vadd.f32 %v1133_v52, %v1089_v23  ;;  %2245 = vmatpush.bf16.msrb.mxu0 %v1473_v54  ;;  %v642_v34 = vmul.f32 %v6372_v19, %v5993_v11  ;;  %v714_v26 = vmul.f32 %v6385_v46, %v8601_v32  ;;  %v5149_v54 = vld [vmem:[%s5411_s12 + $0x24] sm:$0xf] }
 0x143   : > { %v859_v7 = vmax.f32 %v827_v44, 0.0  ;;  %v1169_v45 = vadd.f32 %v1137_v42, %v1093_v50  ;;  %8616 = vst [vmem:[#allocation18_spill] sm:$0xff] %v6550_v33  ;;  %v1505_v53 = vpack.c.bf16 %v1232_v18, %v1228_v56  ;;  %v718_v55 = vmul.f32 %v6385_v46, %v5952_v35  ;;  %4055 = vperm.xlu1 %5242, %v4013_v38   ;;  %v4893_v56 = vld [vmem:[%s5411_s12 + $0x28] sm:$0xf0]  ;;  %v5168_v33 = vld [vmem:[%s5411_s12 + $0xb4] sm:$0xf0] }
 0x144   : > { %v863_v47 = vmax.f32 %v831_v24, 0.0  ;;  %v1197_v40 = vadd.f32 %v1165_v15, %v6046_v17  ;;  %v746_v8 = vadd.f32 %v714_v26, %v638_v36  ;;  %v1080_v19 = vmul.f32 %v6388_v6, %v8597_v1  ;;  %4060 = vperm.xlu2 %5246, %v4014_v25  }
 0x145   : > { %v1201_v2 = vadd.f32 %v1169_v45, %v5889_v29  ;;  %v1084_v63 = vmul.f32 %v6388_v6, %v5993_v11  ;;  %2334 = vmatpush.bf16.msrb.mxu1 %v1505_v53  ;;  %v750_v13 = vadd.f32 %v718_v55, %v642_v34  ;;  %v1124_v17 = vmul.f32 %v6403_v61, %v8601_v32  ;;  %v4016_v34 = vld [vmem:[%s5431_s30 + $0x28] sm:$0xff] }
 0x146   : > { %v1474_v39 = vpack.c.bf16 %v863_v47, %v859_v7  ;;  %v1229_v62 = vmax.f32 %v1197_v40, 0.0  ;;  %v818_v46 = vadd.f32 %v6087_v16, %v746_v8  ;;  %v1128_v29 = vmul.f32 %v6403_v61, %v5952_v35  ;;  %v4020_v8 = vld [vmem:[%s5431_s30 + $0x48] sm:$0xff] }
 0x147   : > { %v1233_v51 = vmax.f32 %v1201_v2, 0.0  ;;  %v639_v59 = vmul.f32 %v6405_v5, %v8597_v1  ;;  %v822_v6 = vadd.f32 %v6015_v41, %v750_v13  ;;  %v1156_v9 = vadd.f32 %v1124_v17, %v1080_v19  ;;  %v6606_v2 = vpop.permute.xlu1 %1640  ;;  %v4901_v13 = vld [vmem:[%s5411_s12 + $0x38] sm:$0xf0] }
 0x148   : > { %2423 = vmatpush.bf16.msrb.mxu2 %v1474_v39  ;;  %v643_v30 = vmul.f32 %v6405_v5, %v5993_v11  ;;  %v715_v22 = vmul.f32 %v6423_v20, %v8601_v32  ;;  %v850_v60 = vmax.f32 %v818_v46, 0.0  ;;  %v1160_v61 = vadd.f32 %v1128_v29, %v1084_v63  ;;  %v4891_v5 = vld [vmem:[%s5411_s12 + $0x20] sm:$0xf]  ;;  %v4899_v63 = vld [vmem:[%s5411_s12 + $0x30] sm:$0xf] }
 0x149   : > { %v1506_v58 = vpack.c.bf16 %v1233_v51, %v1229_v62  ;;  %v719_v57 = vmul.f32 %v6423_v20, %v5952_v35  ;;  %v854_v49 = vmax.f32 %v822_v6, 0.0  ;;  %v1188_v14 = vadd.f32 %v1156_v9, %v6087_v16  ;;  %v5152_v39 = vld [vmem:[%s5411_s12 + $0x34] sm:$0xf0]  ;;  %v5151_v62 = vld [vmem:[%s5411_s12 + $0x34] sm:$0xf]  ;;  %v4023_v29 = vld [vmem:[%s5431_s30 + $0x60] sm:$0xff] }
 0x14a   : > { %v747_v27 = vadd.f32 %v715_v22, %v639_v59  ;;  %v1081_v23 = vmul.f32 %v6425_v28, %v8597_v1  ;;  %v1192_v4 = vadd.f32 %v1160_v61, %v6015_v41  ;;  %v1085_v52 = vmul.f32 %v6425_v28, %v5993_v11  ;;  %v6594_v11 = vpop.permute.xlu2 %1610  ;;  %v4022_v51 = vld [vmem:[%s5431_s30 + $0x58] sm:$0xff]  ;;  %v2819_v59 = vld [vmem:[%s5426_s19] sm:$0xff]  ;;  %v4025_v9 = vld [vmem:[%s5431_s30 + $0x70] sm:$0xff] }
 0x14b   : > { %2512 = vmatpush.bf16.msrb.mxu3 %v1506_v58  ;;  %v751_v50 = vadd.f32 %v719_v57, %v643_v30  ;;  %v1125_v20 = vmul.f32 %v6442_v43, %v8601_v32  ;;  %v1469_v44 = vpack.c.bf16 %v854_v49, %v850_v60  ;;  %v1220_v42 = vmax.f32 %v1188_v14, 0.0  ;;  %8618 = vst [vmem:[#allocation28_spill] sm:$0xff] %v6594_v11  ;;  %v4026_v30 = vld [vmem:[%s5431_s30 + $0x78] sm:$0xff]  ;;  %v4907_v22 = vld [vmem:[%s5411_s12 + $0x40] sm:$0xf] }
 0x14c   : > { %v819_v18 = vadd.f32 %v6087_v16, %v747_v27  ;;  %v1129_v1 = vmul.f32 %v6442_v43, %v5952_v35  ;;  %v1224_v24 = vmax.f32 %v1192_v4, 0.0  ;;  %v6592_v7 = vor.u32 %v5150_v48, %v4891_v5  ;;  %v4017_v35 = vld [vmem:[%s5431_s30 + $0x30] sm:$0xff]  ;;  %4070 = vperm.xlu1 %5242, %v4016_v34   ;;  %2853 = vperm.xlu0 %5247, %v2819_v59   ;;  %v5154_v58 = vld [vmem:[%s5411_s12 + $0x44] sm:$0xf0]  ;;  %v5153_v61 = vld [vmem:[%s5411_s12 + $0x44] sm:$0xf] }
 0x14d   : > { %v823_v15 = vadd.f32 %v6015_v41, %v751_v50  ;;  %v1157_v36 = vadd.f32 %v1125_v20, %v1081_v23  ;;  %2246 = vmatpush.bf16.msrb.mxu0 %v1469_v44  ;;  %v6596_v45 = vor.u32 %v5149_v54, %v4893_v56  ;;  %4075 = vperm.xlu2 %5246, %v4017_v35   ;;  %v4909_v57 = vld [vmem:[%s5411_s12 + $0x48] sm:$0xf0]  ;;  %v4029_v5 = vld [vmem:[%s5431_s30 + $0x90] sm:$0xff]  ;;  %v2822_v48 = vld [vmem:[%s5426_s19 + $0x18] sm:$0xff] }
 0x14e   : > { %8617 = vst [vmem:[#allocation27_spill] sm:$0xff] %v6592_v7  ;;  %v851_v32 = vmax.f32 %v819_v18, 0.0  ;;  %v1161_v28 = vadd.f32 %v1129_v1, %v1085_v52  ;;  %v1501_v26 = vpack.c.bf16 %v1224_v24, %v1220_v42  ;;  %1901 = vmatmul.bf16.gmra.mxu0 %v6592_v7  ;;  %2079 = vmatmul.bf16.gmra.mxu2 %v6592_v7  ;;  %v4028_v23 = vld [vmem:[%s5431_s30 + $0x88] sm:$0xff]  ;;  %v4035_v52 = vld [vmem:[%s5431_s30 + $0xc0] sm:$0xff]  ;;  %v2825_v20 = vld [vmem:[%s5426_s19 + $0x30] sm:$0xff] }
 0x14f   : > { %8619 = vst [vmem:[#allocation29_spill] sm:$0xff] %v6596_v45  ;;  %v855_v53 = vmax.f32 %v823_v15, 0.0  ;;  %v1189_v47 = vadd.f32 %v1157_v36, %v6087_v16  ;;  %2168 = vmatmul.bf16.gmra.mxu3 %v6596_v45  ;;  %1990 = vmatmul.bf16.gmra.mxu1 %v6596_v45  ;;  %v6616_v17 = vor.u32 %v5152_v39, %v4899_v63  ;;  %v6621_v46 = vpop.permute.xlu1 %1720  ;;  %v4036_v54 = vld [vmem:[%s5431_s30 + $0xc8] sm:$0xff]  ;;  %v4915_v56 = vld [vmem:[%s5411_s12 + $0x50] sm:$0xf]  ;;  %v4031_v36 = vld [vmem:[%s5431_s30 + $0xa0] sm:$0xff] }
 0x150   : > { %v1193_v43 = vadd.f32 %v1161_v28, %v6015_v41  ;;  %2335 = vmatpush.bf16.msrb.mxu1 %v1501_v26  ;;  %v4019_v41 = vld [vmem:[%s5431_s30 + $0x40] sm:$0xff]  ;;  %v6618_v25 = vor.u32 %v5151_v62, %v4901_v13  ;;  %8623 = vst [vmem:[#allocation20_spill] sm:$0xff] %v6621_v46  ;;  %v6639_v49 = vor.u32 %v5154_v58, %v4907_v22  ;;  %v5156_v44 = vld [vmem:[%s5411_s12 + $0x54] sm:$0xf0]  ;;  %v5155_v42 = vld [vmem:[%s5411_s12 + $0x54] sm:$0xf] }
 0x151   : > { %v1470_v40 = vpack.c.bf16 %v855_v53, %v851_v32  ;;  %v1221_v16 = vmax.f32 %v1189_v47, 0.0  ;;  %8621 = vst [vmem:[#allocation19_spill] sm:$0xff] %v6616_v17  ;;  %v6643_v27 = vor.u32 %v5153_v61, %v4909_v57  ;;  %v4917_v18 = vld [vmem:[%s5411_s12 + $0x58] sm:$0xf0]  ;;  %v6663_v1 = vor.u32 %v5156_v44, %v4915_v56  ;;  %v2828_v34 = vld [vmem:[%s5426_s19 + $0x48] sm:$0xff] }
 0x152   : > { %v1225_v55 = vmax.f32 %v1193_v43, 0.0  ;;  %v6610_v19 = vpop.permute.xlu2 %1595  ;;  %8622 = vst [vmem:[#allocation5_spill] sm:$0xff] %v6618_v25  ;;  %v6665_v24 = vor.u32 %v5155_v42, %v4917_v18  ;;  %v4038_v32 = vld [vmem:[%s5431_s30 + $0xd8] sm:$0xff]  ;;  %v4039_v43 = vld [vmem:[%s5431_s30 + $0xe0] sm:$0xff]  ;;  %v4925_v63 = vld [vmem:[%s5411_s12 + $0x68] sm:$0xf0] }
 0x153   : > { %2424 = vmatpush.bf16.msrb.mxu2 %v1470_v40  ;;  %8620 = vst [vmem:[#allocation30_spill] sm:$0xff] %v6610_v19  ;;  %v2831_v40 = vld [vmem:[%s5426_s19 + $0x60] sm:$0xff]  ;;  %v4034_v13 = vld [vmem:[%s5431_s30 + $0xb8] sm:$0xff] }
 0x154   : > { %v1502_v38 = vpack.c.bf16 %v1225_v55, %v1221_v16  ;;  %4085 = vperm.xlu1 %5242, %v4019_v41   ;;  %8626 = vst [vmem:[#allocation23_spill] sm:$0xff] %v6639_v49  ;;  %2868 = vperm.xlu0 %5247, %v2822_v48   ;;  %v4033_v55 = vld [vmem:[%s5431_s30 + $0xb0] sm:$0xff]  ;;  %v5158_v41 = vld [vmem:[%s5411_s12 + $0x64] sm:$0xf0]  ;;  %v4331_v57 = vld [vmem:[%s542_s16] sm:$0x1] }
 0x155   : > { %4090 = vperm.xlu2 %5246, %v4020_v8   ;;  %8628 = vst [vmem:[#allocation9_spill] sm:$0xff] %v6643_v27  ;;  %v5157_v8 = vld [vmem:[%s5411_s12 + $0x64] sm:$0xf]  ;;  %v5160_v48 = vld [vmem:[%s5411_s12 + $0x74] sm:$0xf0] }
 0x156   : > { %2513 = vmatpush.bf16.msrb.mxu3 %v1502_v38  ;;  %8629 = vst [vmem:[#allocation10_spill] sm:$0xff] %v6663_v1  ;;  %v4923_v38 = vld [vmem:[%s5411_s12 + $0x60] sm:$0xf]  ;;  %v6692_v62 = vor.u32 %v5157_v8, %v4925_v63  ;;  %v4941_v8 = vld [vmem:[%s5411_s12 + $0x88] sm:$0xf0] }
 0x157   : > { %v6635_v60 = vpop.permute.xlu1 %1705  ;;  %8630 = vst [vmem:[#allocation11_spill] sm:$0xff] %v6665_v24  ;;  %v6690_v39 = vor.u32 %v5158_v41, %v4923_v38  ;;  %v5162_v38 = vld [vmem:[%s5411_s12 + $0x84] sm:$0xf0]  ;;  %v5161_v41 = vld [vmem:[%s5411_s12 + $0x84] sm:$0xf] }
 0x158   : > { %8625 = vst [vmem:[#allocation22_spill] sm:$0xff] %v6635_v60  ;;  %v4965_v60 = vld [vmem:[%s5411_s12 + $0xb8] sm:$0xf0] }
 0x159   : > { %8635 = vst [vmem:[#allocation14_spill] sm:$0xff] %v6690_v39 }
 0x15a   : > { %v6629_v6 = vpop.permute.xlu2 %1680  ;;  %8636 = vst [vmem:[#allocation15_spill] sm:$0xff] %v6692_v62 }
 0x15b   : > { %8624 = vst [vmem:[#allocation24_spill] sm:$0xff] %v6629_v6  ;;  %v4042_v6 = vld [vmem:[%s5431_s30 + $0xf8] sm:$0xff] }
 0x15c   : > { %4100 = vperm.xlu1 %5242, %v4022_v51   ;;  %2883 = vperm.xlu0 %5247, %v2825_v20   ;;  %v4041_v51 = vld [vmem:[%s5431_s30 + $0xf0] sm:$0xff]  ;;  %v4933_v20 = vld [vmem:[%s5411_s12 + $0x78] sm:$0xf0] }
 0x15d   : > { %4105 = vperm.xlu2 %5246, %v4023_v29   ;;  %v6698_v29 = vpop.permute.xlu0 %1635 }
 0x15e   : > { %1906 = vmatmul.bf16.gmra.mxu0 %v6616_v17  ;;  %2084 = vmatmul.bf16.gmra.mxu2 %v6616_v17  ;;  %v4997_v17 = vld [vmem:[%s5411_s12 + $0xf8] sm:$0xf0] }
 0x15f   : > { %2173 = vmatmul.bf16.gmra.mxu3 %v6618_v25  ;;  %1995 = vmatmul.bf16.gmra.mxu1 %v6618_v25  ;;  %v6652_v4 = vpop.permute.xlu1 %1620  ;;  %v5175_v25 = vld [vmem:[%s5411_s12 + $0xf4] sm:$0xf] }
 0x162   : > { %v6641_v14 = vpop.permute.xlu2 %1665 }
 0x163   : > { %8627 = vst [vmem:[#allocation7_spill] sm:$0xff] %v6641_v14  ;;  %v6924_v14 = vor.u32 %v5175_v25, %v4997_v17 }
 0x164   : > { %4115 = vperm.xlu1 %5242, %v4025_v9   ;;  %2898 = vperm.xlu0 %5247, %v2828_v34   ;;  %v2834_v9 = vld [vmem:[%s5426_s19 + $0x78] sm:$0xff] }
 0x165   : > { %4120 = vperm.xlu2 %5246, %v4026_v30   ;;  %8665 = vst [vmem:[#allocation54_spill] sm:$0xff] %v6924_v14 }
 0x167   : > { %v6667_v15 = vpop.permute.xlu1 %1605 }
 0x168   : > { %8631 = vst [vmem:[#allocation33_spill] sm:$0xff] %v6667_v15 }
 0x16a   : > { %v6654_v50 = vpop.permute.xlu2 %1580 }
 0x16c   : > { %4130 = vperm.xlu1 %5242, %v4028_v23   ;;  %2913 = vperm.xlu0 %5247, %v2831_v40   ;;  %v2837_v23 = vld [vmem:[%s5426_s19 + $0x90] sm:$0xff] }
 0x16d   : > { %4135 = vperm.xlu2 %5246, %v4029_v5   ;;  %v4931_v5 = vld [vmem:[%s5411_s12 + $0x70] sm:$0xf] }
 0x16e   : > { %1911 = vmatmul.bf16.gmra.mxu0 %v6639_v49  ;;  %2089 = vmatmul.bf16.gmra.mxu2 %v6639_v49  ;;  %v6722_v44 = vor.u32 %v5160_v48, %v4931_v5  ;;  %v2846_v48 = vld [vmem:[%s5426_s19 + $0xd8] sm:$0xff] }
 0x16f   : > { %2178 = vmatmul.bf16.gmra.mxu3 %v6643_v27  ;;  %2000 = vmatmul.bf16.gmra.mxu1 %v6643_v27  ;;  %v6683_v16 = vpop.permute.xlu1 %1690 }
 0x170   : > { %8634 = vst [vmem:[#allocation12_spill] sm:$0xff] %v6683_v16  ;;  %v4963_v16 = vld [vmem:[%s5411_s12 + $0xb0] sm:$0xf] }
 0x171   : > { %8640 = vst [vmem:[#allocation40_spill] sm:$0xff] %v6722_v44 }
 0x172   : > { %v6673_v28 = vpop.permute.xlu2 %1565 }
 0x173   : > { %8632 = vst [vmem:[#allocation36_spill] sm:$0xff] %v6673_v28 }
 0x174   : > { %4165 = vperm.xlu1 %5242, %v4035_v52   ;;  %2928 = vperm.xlu0 %5247, %v2834_v9   ;;  %v5159_v52 = vld [vmem:[%s5411_s12 + $0x74] sm:$0xf] }
 0x175   : > { %4170 = vperm.xlu2 %5246, %v4036_v54   ;;  %v6718_v54 = vpop.permute.xlu0 %1630  ;;  %v6724_v42 = vor.u32 %v5159_v52, %v4933_v20  ;;  %v4947_v20 = vld [vmem:[%s5411_s12 + $0x90] sm:$0xf] }
 0x176   : > { %v1892_v26 = vpop.f32.mrf.mxu0 }
 0x177   : > { %v1893_v53 = vadd.f32 %v1892_v26, %v6673_v28  ;;  %v6703_v30 = vpop.permute.xlu1 %1675  ;;  %8641 = vst [vmem:[#allocation13_spill] sm:$0xff] %v6724_v42 }
 0x178   : > { %v1981_v47 = vpop.f32.mrf.mxu1  ;;  %8637 = vst [vmem:[#allocation6_spill] sm:$0xff] %v6703_v30 }
 0x179   : > { %v6679_v35 = vadd.f32 %v1981_v47, %v1893_v53 }
 0x17b   : > { %8633 = vst [vmem:[#allocation26_spill] sm:$0xff] %v6679_v35 }
 0x17c   : > { %4145 = vperm.xlu1 %5242, %v4031_v36   ;;  %v2070_v59 = vpop.f32.mrf.mxu2  ;;  %2943 = vperm.xlu0 %5247, %v2837_v23  }
 0x17d   : > { %4180 = vperm.xlu2 %5246, %v4038_v32   ;;  %v2071_v22 = vadd.f32 %v2070_v59, %v6673_v28  ;;  %v2159_v58 = vpop.f32.mrf.mxu3  ;;  %v2840_v32 = vld [vmem:[%s5426_s19 + $0xa8] sm:$0xff]  ;;  %v6737_v26 = vpop.permute.xlu0 %1615  ;;  %v6752_v59 = vor.u32 %v5161_v41, %v4941_v8  ;;  %v2849_v41 = vld [vmem:[%s5426_s19 + $0xf0] sm:$0xff] }
 0x17e   : > { %1916 = vmatmul.bf16.gmra.mxu0 %v6663_v1  ;;  %2094 = vmatmul.bf16.gmra.mxu2 %v6663_v1  ;;  %v6726_v18 = vpop.f32.mrf.mxu0 }
 0x17f   : > { %2183 = vmatmul.bf16.gmra.mxu3 %v6665_v24  ;;  %2005 = vmatmul.bf16.gmra.mxu1 %v6665_v24  ;;  %v6706_v61 = vadd.f32 %v2159_v58, %v2071_v22  ;;  %v6720_v56 = vpop.permute.xlu1 %1590  ;;  %8645 = vst [vmem:[#allocation31_spill] sm:$0xff] %v6752_v59  ;;  %v2843_v58 = vld [vmem:[%s5426_s19 + $0xc0] sm:$0xff] }
 0x180   : > { %8639 = vst [vmem:[#allocation38_spill] sm:$0xff] %v6720_v56  ;;  %v6732_v36 = vpop.f32.mrf.mxu1 }
 0x181   : > { %8638 = vst [vmem:[#allocation35_spill] sm:$0xff] %v6706_v61 }
 0x184   : > { %4185 = vperm.xlu1 %5242, %v4039_v43   ;;  %2958 = vperm.xlu0 %5247, %v2840_v32   ;;  %v6735_v34 = vpop.f32.mrf.mxu2  ;;  %v5164_v32 = vld [vmem:[%s5411_s12 + $0x94] sm:$0xf0] }
 0x185   : > { %4155 = vperm.xlu2 %5246, %v4033_v55   ;;  %v6741_v47 = vpop.f32.mrf.mxu3  ;;  %v4939_v55 = vld [vmem:[%s5411_s12 + $0x80] sm:$0xf] }
 0x186   : > { %8643 = vst [vmem:[#allocation32_spill] sm:$0xff] %v6741_v47 }
 0x187   : > { %v6739_v53 = vpop.permute.xlu1 %1575 }
 0x188   : > { %8642 = vst [vmem:[#allocation25_spill] sm:$0xff] %v6739_v53 }
 0x18c   : > { %4160 = vperm.xlu1 %5242, %v4034_v13   ;;  %v6748_v13 = vor.u32 %v5162_v38, %v4939_v55  ;;  %2973 = vperm.xlu0 %5247, %v2843_v58   ;;  %v6771_v55 = vor.u32 %v5164_v32, %v4947_v20  ;;  %v5165_v32 = vld [vmem:[%s5411_s12 + $0xa4] sm:$0xf] }
 0x18d   : > { %4195 = vperm.xlu2 %5246, %v4041_v51  }
 0x18e   : > { %1921 = vmatmul.bf16.gmra.mxu0 %v6690_v39  ;;  %2099 = vmatmul.bf16.gmra.mxu2 %v6690_v39  ;;  %8644 = vst [vmem:[#allocation21_spill] sm:$0xff] %v6748_v13  ;;  %v4989_v39 = vld [vmem:[%s5411_s12 + $0xe8] sm:$0xf0] }
 0x18f   : > { %2188 = vmatmul.bf16.gmra.mxu3 %v6692_v62  ;;  %2010 = vmatmul.bf16.gmra.mxu1 %v6692_v62  ;;  %8649 = vst [vmem:[#allocation4_spill] sm:$0xff] %v6771_v55  ;;  %v5173_v62 = vld [vmem:[%s5411_s12 + $0xe4] sm:$0xf] }
 0x190   : > { %v6907_v1 = vor.u32 %v5173_v62, %v4989_v39  ;;  %v4995_v39 = vld [vmem:[%s5411_s12 + $0xf0] sm:$0xf]  ;;  %v5176_v62 = vld [vmem:[%s5411_s12 + $0xf4] sm:$0xf0] }
 0x191   : > { %v6922_v7 = vor.u32 %v5176_v62, %v4995_v39 }
 0x192   : > { %8663 = vst [vmem:[#allocation52_spill] sm:$0xff] %v6907_v1 }
 0x193   : > { %8664 = vst [vmem:[#allocation53_spill] sm:$0xff] %v6922_v7 }
 0x194   : > { %4386 = vperm.xlu1 %5242, %v4331_v57   ;;  %v6756_v57 = vpop.permute.xlu0 %1700  ;;  %2988 = vperm.xlu0 %5247, %v2846_v48   ;;  %v5166_v48 = vld [vmem:[%s5411_s12 + $0xa4] sm:$0xf0] }
 0x195   : > { %8646 = vst [vmem:[#allocation8_spill] sm:$0xff] %v6756_v57  ;;  %v5167_v57 = vld [vmem:[%s5411_s12 + $0xb4] sm:$0xf] }
 0x19c   : > { %v6765_v52 = vpop.permute.xlu0 %1685  ;;  %3003 = vperm.xlu0 %5247, %v2849_v41  }
 0x19d   : > { %8648 = vst [vmem:[#allocation3_spill] sm:$0xff] %v6765_v52 }
 0x19e   : > { %1926 = vmatmul.bf16.gmra.mxu0 %v6722_v44  ;;  %2104 = vmatmul.bf16.gmra.mxu2 %v6722_v44  ;;  %v5174_v44 = vld [vmem:[%s5411_s12 + $0xe4] sm:$0xf0] }
 0x19f   : > { %2193 = vmatmul.bf16.gmra.mxu3 %v6724_v42  ;;  %2015 = vmatmul.bf16.gmra.mxu1 %v6724_v42  ;;  %v4987_v42 = vld [vmem:[%s5411_s12 + $0xe0] sm:$0xf] }
 0x1a4   : > { %v6780_v8 = vpop.permute.xlu0 %1600 }
 0x1a5   : > { %v1897_v43 = vpop.f32.mrf.mxu0  ;;  %8651 = vst [vmem:[#allocation34_spill] sm:$0xff] %v6780_v8 }
 0x1a6   : > { %v1898_v40 = vadd.f32 %v1897_v43, %v6739_v53  ;;  %v5163_v43 = vld [vmem:[%s5411_s12 + $0x94] sm:$0xf] }
 0x1a9   : > { %v1986_v63 = vpop.f32.mrf.mxu1 }
 0x1aa   : > { %v6750_v51 = vadd.f32 %v1986_v63, %v1898_v40  ;;  %v4949_v40 = vld [vmem:[%s5411_s12 + $0x98] sm:$0xf0] }
 0x1ab   : > { %v6773_v38 = vor.u32 %v5163_v43, %v4949_v40  ;;  %v4957_v43 = vld [vmem:[%s5411_s12 + $0xa8] sm:$0xf0] }
 0x1ac   : > { %v2075_v9 = vpop.f32.mrf.mxu2  ;;  %v6797_v41 = vpop.permute.xlu0 %1585 }
 0x1ad   : > { %v2076_v22 = vadd.f32 %v2075_v9, %v6739_v53  ;;  %8650 = vst [vmem:[#allocation39_spill] sm:$0xff] %v6773_v38  ;;  %v6782_v63 = vpop.f32.mrf.mxu0 }
 0x1ae   : > { %1931 = vmatmul.bf16.gmra.mxu0 %v6748_v13  ;;  %2109 = vmatmul.bf16.gmra.mxu2 %v6748_v13  ;;  %8654 = vst [vmem:[#allocation43_spill] sm:$0xff] %v6797_v41 }
 0x1af   : > { %2198 = vmatmul.bf16.gmra.mxu3 %v6752_v59  ;;  %2020 = vmatmul.bf16.gmra.mxu1 %v6752_v59  ;;  %v2164_v23 = vpop.f32.mrf.mxu3 }
 0x1b0   : > { %v6762_v5 = vadd.f32 %v2164_v23, %v2076_v22  ;;  %v4012_v22 = vld [vmem:[%s5431_s30 + $0x8] sm:$0xff]  ;;  %v4955_v23 = vld [vmem:[%s5411_s12 + $0xa0] sm:$0xf] }
 0x1b1   : > { %v6784_v9 = vpop.f32.mrf.mxu1  ;;  %4050 = vperm.xlu0 %5247, %v4012_v22   ;;  %v6795_v40 = vor.u32 %v5166_v48, %v4955_v23  ;;  %v4015_v22 = vld [vmem:[%s5431_s30 + $0x20] sm:$0xff] }
 0x1b2   : > { %8647 = vst [vmem:[#allocation37_spill] sm:$0xff] %v6762_v5 }
 0x1b3   : > { %8653 = vst [vmem:[#allocation42_spill] sm:$0xff] %v6795_v40 }
 0x1b4   : > { %v6787_v58 = vpop.f32.mrf.mxu2  ;;  %v6942_v62 = vpop.permute.xlu0 %1670 }
 0x1b5   : > { %8667 = vst [vmem:[#allocation56_spill] sm:$0xff] %v6942_v62 }
 0x1b7   : > { %v6791_v20 = vpop.f32.mrf.mxu3 }
 0x1b8   : > { %8652 = vst [vmem:[#allocation41_spill] sm:$0xff] %v6791_v20 }
 0x1b9   : > { %4065 = vperm.xlu0 %5247, %v4015_v22  }
 0x1be   : > { %1936 = vmatmul.bf16.gmra.mxu0 %v6771_v55  ;;  %2114 = vmatmul.bf16.gmra.mxu2 %v6771_v55  ;;  %v6799_v55 = vor.u32 %v5165_v32, %v4957_v43 }
 0x1bf   : > { %2203 = vmatmul.bf16.gmra.mxu3 %v6773_v38  ;;  %2025 = vmatmul.bf16.gmra.mxu1 %v6773_v38 }
 0x1c0   : > { %8655 = vst [vmem:[#allocation44_spill] sm:$0xff] %v6799_v55 }
 0x1cb   : > { %v1902_v38 = vpop.f32.mrf.mxu0 }
 0x1cc   : > { %v1903_v53 = vadd.f32 %v1902_v38, %v6797_v41  ;;  %v1991_v59 = vpop.f32.mrf.mxu1 }
 0x1ce   : > { %v6802_v13 = vadd.f32 %v1991_v59, %v1903_v53  ;;  %1941 = vmatmul.bf16.gmra.mxu0 %v6795_v40  ;;  %2119 = vmatmul.bf16.gmra.mxu2 %v6795_v40  ;;  %v4018_v40 = vld [vmem:[%s5431_s30 + $0x38] sm:$0xff] }
 0x1cf   : > { %2208 = vmatmul.bf16.gmra.mxu3 %v6799_v55  ;;  %2030 = vmatmul.bf16.gmra.mxu1 %v6799_v55 }
 0x1d0   : > { %4080 = vperm.xlu0 %5247, %v4018_v40   ;;  %v2611_v47 = vmax.f32 %v6802_v13, 0.0 }
 0x1d1   : > { %v2080_v23 = vpop.f32.mrf.mxu2 }
 0x1d2   : > { %v2081_v38 = vadd.f32 %v2080_v23, %v6797_v41  ;;  %v2169_v48 = vpop.f32.mrf.mxu3  ;;  %v6821_v41 = vor.u32 %v5168_v33, %v4963_v16  ;;  %v4021_v33 = vld [vmem:[%s5431_s30 + $0x50] sm:$0xff] }
 0x1d3   : > { %v1904_v53 = vpop.f32.mrf.mxu0 }
 0x1d4   : > { %v6810_v59 = vadd.f32 %v2169_v48, %v2081_v38  ;;  %v1905_v32 = vadd.f32 %v1904_v53, %v6720_v56  ;;  %v1993_v43 = vpop.f32.mrf.mxu1  ;;  %8656 = vst [vmem:[#allocation45_spill] sm:$0xff] %v6821_v41  ;;  %v6823_v48 = vor.u32 %v5167_v57, %v4965_v60 }
 0x1d6   : > { %v6813_v28 = vadd.f32 %v1993_v43, %v1905_v32  ;;  %8657 = vst [vmem:[#allocation46_spill] sm:$0xff] %v6823_v48 }
 0x1d8   : > { %4095 = vperm.xlu0 %5247, %v4021_v33  }
 0x1d9   : > { %v2082_v22 = vpop.f32.mrf.mxu2 }
 0x1da   : > { %v2083_v55 = vadd.f32 %v2082_v22, %v6720_v56  ;;  %v2171_v23 = vpop.f32.mrf.mxu3  ;;  %v5169_v56 = vld [vmem:[%s5411_s12 + $0xc4] sm:$0xf] }
 0x1db   : > { %v1907_v38 = vpop.f32.mrf.mxu0 }
 0x1dc   : > { %v6825_v53 = vadd.f32 %v2171_v23, %v2083_v55  ;;  %v1908_v32 = vadd.f32 %v1907_v38, %v6610_v19  ;;  %v1996_v43 = vpop.f32.mrf.mxu1 }
 0x1de   : > { %v6828_v46 = vadd.f32 %v1996_v43, %v1908_v32  ;;  %1946 = vmatmul.bf16.gmra.mxu0 %v6821_v41  ;;  %2124 = vmatmul.bf16.gmra.mxu2 %v6821_v41  ;;  %v4024_v32 = vld [vmem:[%s5431_s30 + $0x68] sm:$0xff]  ;;  %v4971_v43 = vld [vmem:[%s5411_s12 + $0xc0] sm:$0xf] }
 0x1df   : > { %2213 = vmatmul.bf16.gmra.mxu3 %v6823_v48  ;;  %2035 = vmatmul.bf16.gmra.mxu1 %v6823_v48  ;;  %v5170_v41 = vld [vmem:[%s5411_s12 + $0xc4] sm:$0xf0] }
 0x1e0   : > { %4110 = vperm.xlu0 %5247, %v4024_v32   ;;  %v2619_v61 = vmax.f32 %v6828_v46, 0.0 }
 0x1e1   : > { %v2085_v60 = vpop.f32.mrf.mxu2 }
 0x1e2   : > { %v2086_v16 = vadd.f32 %v2085_v60, %v6610_v19  ;;  %v2174_v57 = vpop.f32.mrf.mxu3  ;;  %v6847_v19 = vor.u32 %v5170_v41, %v4971_v43  ;;  %v4027_v41 = vld [vmem:[%s5431_s30 + $0x80] sm:$0xff] }
 0x1e3   : > { %v1909_v55 = vpop.f32.mrf.mxu0 }
 0x1e4   : > { %v6836_v40 = vadd.f32 %v2174_v57, %v2086_v16  ;;  %v1910_v22 = vadd.f32 %v1909_v55, %v6780_v8  ;;  %v1998_v23 = vpop.f32.mrf.mxu1  ;;  %8658 = vst [vmem:[#allocation47_spill] sm:$0xff] %v6847_v19  ;;  %v6849_v57 = vor.u32 %v5169_v56, %v4973_v3 }
 0x1e6   : > { %v6839_v38 = vadd.f32 %v1998_v23, %v1910_v22  ;;  %8659 = vst [vmem:[#allocation48_spill] sm:$0xff] %v6849_v57 }
 0x1e8   : > { %4125 = vperm.xlu0 %5247, %v4027_v41  }
 0x1e9   : > { %v2087_v33 = vpop.f32.mrf.mxu2 }
 0x1ea   : > { %v2088_v48 = vadd.f32 %v2087_v33, %v6780_v8  ;;  %v2176_v60 = vpop.f32.mrf.mxu3 }
 0x1eb   : > { %v1912_v16 = vpop.f32.mrf.mxu0 }
 0x1ec   : > { %v6851_v55 = vadd.f32 %v2176_v60, %v2088_v48  ;;  %v1913_v22 = vadd.f32 %v1912_v16, %v6667_v15  ;;  %v2001_v23 = vpop.f32.mrf.mxu1  ;;  %v4030_v60 = vld [vmem:[%s5431_s30 + $0x98] sm:$0xff]  ;;  %v4979_v16 = vld [vmem:[%s5411_s12 + $0xd0] sm:$0xf] }
 0x1ee   : > { %v6854_v31 = vadd.f32 %v2001_v23, %v1913_v22  ;;  %1951 = vmatmul.bf16.gmra.mxu0 %v6847_v19  ;;  %2129 = vmatmul.bf16.gmra.mxu2 %v6847_v19  ;;  %v5172_v22 = vld [vmem:[%s5411_s12 + $0xd4] sm:$0xf0]  ;;  %v5171_v23 = vld [vmem:[%s5411_s12 + $0xd4] sm:$0xf]  ;;  %v4981_v19 = vld [vmem:[%s5411_s12 + $0xd8] sm:$0xf0] }
 0x1ef   : > { %2218 = vmatmul.bf16.gmra.mxu3 %v6849_v57  ;;  %2040 = vmatmul.bf16.gmra.mxu1 %v6849_v57 }
 0x1f0   : > { %4140 = vperm.xlu0 %5247, %v4030_v60   ;;  %v4037_v60 = vld [vmem:[%s5431_s30 + $0xd0] sm:$0xff] }
 0x1f1   : > { %v2090_v3 = vpop.f32.mrf.mxu2 }
 0x1f2   : > { %v2091_v56 = vadd.f32 %v2090_v3, %v6667_v15  ;;  %v2179_v48 = vpop.f32.mrf.mxu3  ;;  %v6877_v3 = vor.u32 %v5172_v22, %v4979_v16 }
 0x1f3   : > { %v6862_v32 = vpop.f32.mrf.mxu0 }
 0x1f4   : > { %v6864_v43 = vadd.f32 %v2179_v48, %v2091_v56  ;;  %v6866_v33 = vpop.f32.mrf.mxu1  ;;  %8660 = vst [vmem:[#allocation49_spill] sm:$0xff] %v6877_v3  ;;  %v6881_v48 = vor.u32 %v5171_v23, %v4981_v19  ;;  %v4032_v23 = vld [vmem:[%s5431_s30 + $0xa8] sm:$0xff] }
 0x1f6   : > { %8661 = vst [vmem:[#allocation50_spill] sm:$0xff] %v6881_v48 }
 0x1f8   : > { %4175 = vperm.xlu0 %5247, %v4037_v60   ;;  %v6905_v60 = vor.u32 %v5174_v44, %v4987_v42 }
 0x1f9   : > { %v6873_v8 = vpop.f32.mrf.mxu2 }
 0x1fa   : > { %v6875_v41 = vpop.f32.mrf.mxu3  ;;  %8662 = vst [vmem:[#allocation51_spill] sm:$0xff] %v6905_v60 }
 0x1fb   : > { %v6879_v56 = vpop.f32.mrf.mxu0 }
 0x1fc   : > { %v6883_v57 = vpop.f32.mrf.mxu1 }
 0x1fe   : > { %1956 = vmatmul.bf16.gmra.mxu0 %v6877_v3  ;;  %2134 = vmatmul.bf16.gmra.mxu2 %v6877_v3 }
 0x1ff   : > { %2223 = vmatmul.bf16.gmra.mxu3 %v6881_v48  ;;  %2045 = vmatmul.bf16.gmra.mxu1 %v6881_v48 }
 0x200   : > { %4150 = vperm.xlu0 %5247, %v4032_v23   ;;  %v4040_v23 = vld [vmem:[%s5431_s30 + $0xe8] sm:$0xff] }
 0x201   : > { %v6890_v16 = vpop.f32.mrf.mxu2 }
 0x202   : > { %v6892_v22 = vpop.f32.mrf.mxu3 }
 0x203   : > { %v1919_v15 = vpop.f32.mrf.mxu0 }
 0x204   : > { %v6894_v19 = vpop.f32.mrf.mxu1 }
 0x208   : > { %4190 = vperm.xlu0 %5247, %v4040_v23   ;;  %v2615_v23 = vmax.f32 %v6813_v28, 0.0  ;;  %v6938_v28 = vpop.permute.xlu1 %1660 }
 0x209   : > { %v6901_v3 = vpop.f32.mrf.mxu2  ;;  %8666 = vst [vmem:[#allocation55_spill] sm:$0xff] %v6938_v28  ;;  %v2612_v28 = vmax.f32 %v6810_v59, 0.0  ;;  %v1915_v59 = vadd.f32 %v6862_v32, %v6594_v11 }
 0x20a   : > { %v6903_v24 = vpop.f32.mrf.mxu3  ;;  %v6936_v25 = vpack.c.bf16 %v2615_v23, %v2611_v47 }
 0x20b   : > { %v1922_v48 = vpop.f32.mrf.mxu0 }
 0x20c   : > { %v2011_v27 = vpop.f32.mrf.mxu1 }
 0x20e   : > { %1961 = vmatmul.bf16.gmra.mxu0 %v6905_v60  ;;  %2139 = vmatmul.bf16.gmra.mxu2 %v6905_v60  ;;  %v2623_v60 = vmax.f32 %v6839_v38, 0.0  ;;  %v2624_v38 = vmax.f32 %v6851_v55, 0.0  ;;  %v1920_v55 = vadd.f32 %v1919_v15, %v6652_v4 }
 0x20f   : > { %2228 = vmatmul.bf16.gmra.mxu3 %v6907_v1  ;;  %2050 = vmatmul.bf16.gmra.mxu1 %v6907_v1 }
 0x210   : > { %4200 = vperm.xlu0 %5247, %v4042_v6   ;;  %v6931_v6 = vpack.c.bf16 %v2623_v60, %v2619_v61  ;;  %v1923_v61 = vadd.f32 %v1922_v48, %v6470_v12  ;;  %v1918_v48 = vadd.f32 %v6879_v56, %v6737_v26  ;;  %v2009_v15 = vadd.f32 %v6894_v19, %v1920_v55 }
 0x211   : > { %v2100_v49 = vpop.f32.mrf.mxu2 }
 0x212   : > { %v6914_v44 = vpop.f32.mrf.mxu3 }
 0x213   : > { %v1924_v42 = vpop.f32.mrf.mxu0 }
 0x214   : > { %v2013_v52 = vpop.f32.mrf.mxu1  ;;  %v1925_v13 = vadd.f32 %v1924_v42, %v6718_v54 }
 0x216   : > { %v2014_v35 = vadd.f32 %v2013_v52, %v1925_v13  ;;  %v2101_v52 = vadd.f32 %v2100_v49, %v6470_v12 }
 0x219   : > { %v2102_v30 = vpop.f32.mrf.mxu2 }
 0x21a   : > { %v2191_v45 = vpop.f32.mrf.mxu3 }
 0x21b   : > { %v1927_v1 = vpop.f32.mrf.mxu0 }
 0x21c   : > { %v2016_v5 = vpop.f32.mrf.mxu1  ;;  %v1928_v17 = vadd.f32 %v1927_v1, %v6698_v29 }
 0x21e   : > { %1966 = vmatmul.bf16.gmra.mxu0 %v6922_v7  ;;  %2144 = vmatmul.bf16.gmra.mxu2 %v6922_v7  ;;  %v2616_v7 = vmax.f32 %v6825_v53, 0.0  ;;  %v2017_v1 = vadd.f32 %v2016_v5, %v1928_v17  ;;  %v2012_v53 = vadd.f32 %v2011_v27, %v1923_v61  ;;  %v6963_v61 = vpop.permute.xlu1 %1645 }
 0x21f   : > { %2233 = vmatmul.bf16.gmra.mxu3 %v6924_v14  ;;  %2055 = vmatmul.bf16.gmra.mxu1 %v6924_v14  ;;  %v2620_v14 = vmax.f32 %v6836_v40, 0.0  ;;  %v2103_v40 = vadd.f32 %v2102_v30, %v6718_v54  ;;  %8668 = vst [vmem:[#allocation57_spill] sm:$0xff] %v6963_v61  ;;  %v2007_v30 = vadd.f32 %v6883_v57, %v1918_v48 }
 0x220   : > { %v2651_v5 = vmax.f32 %v2017_v1, 0.0  ;;  %v2643_v32 = vmax.f32 %v2012_v53, 0.0  ;;  %v2004_v1 = vadd.f32 %v6866_v33, %v1915_v59  ;;  %v2190_v57 = vadd.f32 %v6914_v44, %v2101_v52 }
 0x221   : > { %v2105_v46 = vpop.f32.mrf.mxu2  ;;  %v6951_v62 = vpack.c.bf16 %v2624_v38, %v2620_v14  ;;  %v2647_v14 = vmax.f32 %v2014_v35, 0.0  ;;  %v2635_v33 = vmax.f32 %v2007_v30, 0.0 }
 0x222   : > { %v2194_v39 = vpop.f32.mrf.mxu3  ;;  %v2106_v42 = vadd.f32 %v2105_v46, %v6698_v29  ;;  %v2631_v44 = vmax.f32 %v2004_v1, 0.0  ;;  %v2644_v59 = vmax.f32 %v2190_v57, 0.0 }
 0x223   : > { %v1929_v60 = vpop.f32.mrf.mxu0 }
 0x224   : > { %v1930_v47 = vadd.f32 %v1929_v60, %v6606_v2  ;;  %v2018_v23 = vpop.f32.mrf.mxu1  ;;  %v6956_v60 = vpack.c.bf16 %v2616_v7, %v2612_v28  ;;  %v2195_v38 = vadd.f32 %v2194_v39, %v2106_v42  ;;  %v2098_v7 = vadd.f32 %v6901_v3, %v6652_v4  ;;  %v6969_v39 = vpop.permute.xlu0 %1655 }
 0x225   : > { %v2192_v28 = vadd.f32 %v2191_v45, %v2103_v40  ;;  %8669 = vst [vmem:[#allocation58_spill] sm:$0xff] %v6969_v39  ;;  %v2779_v45 = vpack.c.bf16 %v2647_v14, %v2643_v32  ;;  %v2093_v40 = vadd.f32 %v6873_v8, %v6594_v11 }
 0x226   : > { %v2019_v20 = vadd.f32 %v2018_v23, %v1930_v47  ;;  %v2096_v47 = vadd.f32 %v6890_v16, %v6737_v26  ;;  %v2639_v23 = vmax.f32 %v2009_v15, 0.0  ;;  %v2652_v55 = vmax.f32 %v2195_v38, 0.0 }
 0x227   : > { %v2187_v48 = vadd.f32 %v6903_v24, %v2098_v7  ;;  %v2648_v16 = vmax.f32 %v2192_v28, 0.0  ;;  %v2627_v24 = vmax.f32 %v6854_v31, 0.0 }
 0x228   : > { %v2655_v17 = vmax.f32 %v2019_v20, 0.0  ;;  %v2775_v52 = vpack.c.bf16 %v2639_v23, %v2635_v33 }
 0x229   : > { %v2107_v46 = vpop.f32.mrf.mxu2  ;;  %v2640_v14 = vmax.f32 %v2187_v48, 0.0 }
 0x22a   : > { %v2783_v13 = vpack.c.bf16 %v2655_v17, %v2651_v5  ;;  %v2108_v56 = vadd.f32 %v2107_v46, %v6606_v2  ;;  %v2196_v27 = vpop.f32.mrf.mxu3  ;;  %v2185_v17 = vadd.f32 %v6892_v22, %v2096_v47  ;;  %v2182_v22 = vadd.f32 %v6875_v41, %v2093_v40 }
 0x22b   : > { %v1932_v20 = vpop.f32.mrf.mxu0 }
 0x22c   : > { %v2197_v19 = vadd.f32 %v2196_v27, %v2108_v56  ;;  %v1933_v49 = vadd.f32 %v1932_v20, %v6963_v61  ;;  %3171 = vmatpush.bf16.msra.mxu0 %v2783_v13  ;;  %v2021_v35 = vpop.f32.mrf.mxu1  ;;  %v2780_v56 = vpack.c.bf16 %v2648_v16, %v2644_v59  ;;  %v1900_v27 = vadd.f32 %v6782_v63, %v6654_v50  ;;  %v6997_v31 = vpop.permute.xlu0 %1570 }
 0x22d   : > { %v2636_v30 = vmax.f32 %v2185_v17, 0.0  ;;  %v2771_v20 = vpack.c.bf16 %v2631_v44, %v2627_v24  ;;  %v2632_v28 = vmax.f32 %v2182_v22, 0.0  ;;  %v2628_v63 = vmax.f32 %v6864_v43, 0.0 }
 0x22e   : > { %v2656_v3 = vmax.f32 %v2197_v19, 0.0  ;;  %v6975_v42 = vadd.f32 %v2021_v35, %v1933_v49  ;;  %2247 = vmatmul.bf16.vlgmr.msrb.gmra.mxu0 %v6222_v10  ;;  %2425 = vmatmul.bf16.vlgmr.msrb.gmra.mxu2 %v6222_v10  ;;  %v1895_v49 = vadd.f32 %v6726_v18, %v6997_v31  ;;  %v1989_v35 = vadd.f32 %v6784_v9, %v1900_v27  ;;  %v8676_v27 = vld [vmem:[#allocation35_spill] sm:$0xff] }
 0x22f   : > { %2514 = vmatmul.bf16.vlgmr.msrb.gmra.mxu3 %v6224_v0  ;;  %2336 = vmatmul.bf16.vlgmr.msrb.gmra.mxu1 %v6224_v0  ;;  %v6986_v0 = vpop.permute.xlu2 %1650  ;;  %v2776_v32 = vpack.c.bf16 %v2640_v14, %v2636_v30  ;;  %v2772_v18 = vpack.c.bf16 %v2632_v28, %v2628_v63  ;;  %v2603_v43 = vmax.f32 %v6750_v51, 0.0  ;;  %v2596_v30 = vmax.f32 %v8676_v27, 0.0  ;;  %v8677_v28 = vld [vmem:[#allocation7_spill] sm:$0xff] }
 0x230   : > { %v2784_v53 = vpack.c.bf16 %v2656_v3, %v2652_v55  ;;  %3172 = vmatpush.bf16.msra.mxu0 %v2779_v45  ;;  %8670 = vst [vmem:[#allocation59_spill] sm:$0xff] %v6986_v0  ;;  %v2078_v3 = vadd.f32 %v6787_v58, %v6654_v50  ;;  %v1984_v9 = vadd.f32 %v6732_v36, %v1895_v49  ;;  %v2607_v45 = vmax.f32 %v1989_v35, 0.0  ;;  %v8671_v36 = vld [vmem:[#allocation41_spill] sm:$0xff] }
 0x231   : > { %v2110_v5 = vpop.f32.mrf.mxu2  ;;  %v2073_v58 = vadd.f32 %v6735_v34, %v6997_v31  ;;  %v8674_v34 = vld [vmem:[#allocation32_spill] sm:$0xff] }
 0x232   : > { %v2111_v10 = vadd.f32 %v2110_v5, %v6963_v61  ;;  %v2199_v15 = vpop.f32.mrf.mxu3  ;;  %3349 = vmatpush.bf16.msra.mxu2 %v2784_v53  ;;  %v2599_v16 = vmax.f32 %v1984_v9, 0.0  ;;  %v8672_v5 = vld [vmem:[#allocation26_spill] sm:$0xff] }
 0x233   : > { %v1934_v46 = vpop.f32.mrf.mxu0  ;;  %v2595_v51 = vmax.f32 %v8672_v5, 0.0  ;;  %v8682_v5 = vld [vmem:[#allocation19_spill] sm:$0xff] }
 0x234   : > { %v6989_v38 = vadd.f32 %v2199_v15, %v2111_v10  ;;  %v1935_v13 = vadd.f32 %v1934_v46, %v6986_v0  ;;  %3173 = vmatpush.bf16.msra.mxu0 %v2775_v52  ;;  %v2023_v8 = vpop.f32.mrf.mxu1  ;;  %v2162_v10 = vadd.f32 %v8674_v34, %v2073_v58  ;;  %v8675_v46 = vld [vmem:[#allocation37_spill] sm:$0xff] }
 0x235   : > { %v2755_v24 = vpack.c.bf16 %v2599_v16, %v2595_v51  ;;  %v2604_v14 = vmax.f32 %v8675_v46, 0.0  ;;  %v8683_v51 = vld [vmem:[#allocation5_spill] sm:$0xff] }
 0x236   : > { %v6995_v7 = vadd.f32 %v2023_v8, %v1935_v13  ;;  %3350 = vmatpush.bf16.msra.mxu2 %v2780_v56 }
 0x238   : > { %3174 = vmatpush.bf16.msra.mxu0 %v2771_v20 }
 0x239   : > { %v2112_v19 = vpop.f32.mrf.mxu2 }
 0x23a   : > { %v2113_v41 = vadd.f32 %v2112_v19, %v6986_v0  ;;  %v2201_v1 = vpop.f32.mrf.mxu3  ;;  %3351 = vmatpush.bf16.msra.mxu2 %v2776_v32 }
 0x23b   : > { %v1937_v47 = vpop.f32.mrf.mxu0 }
 0x23c   : > { %v7004_v23 = vadd.f32 %v2201_v1, %v2113_v41  ;;  %v1938_v57 = vadd.f32 %v1937_v47, %v6969_v39  ;;  %3175 = vmatpush.bf16.msra.mxu0 %v6931_v6  ;;  %v2026_v55 = vpop.f32.mrf.mxu1  ;;  %v2167_v6 = vadd.f32 %v8671_v36, %v2078_v3  ;;  %v8679_v1 = vld [vmem:[#allocation29_spill] sm:$0xff] }
 0x23e   : > { %v7011_v33 = vadd.f32 %v2026_v55, %v1938_v57  ;;  %2252 = vmatmul.bf16.gmra.mxu0 %v6428_v37  ;;  %2430 = vmatmul.bf16.gmra.mxu2 %v6428_v37  ;;  %v2759_v37 = vpack.c.bf16 %v2607_v45, %v2603_v43  ;;  %v2608_v15 = vmax.f32 %v2167_v6, 0.0 }
 0x23f   : > { %2519 = vmatmul.bf16.gmra.mxu3 %v6450_v21  ;;  %3352 = vmatpush.bf16.msra.mxu2 %v2772_v18  ;;  %v8680_v18 = vld [vmem:[#allocation56_spill] sm:$0xff] }
 0x240   : > { %2341 = vmatmul.bf16.gmra.mxu1 %v6450_v21  ;;  %3176 = vmatpush.bf16.msra.mxu0 %v6936_v25  ;;  %v8673_v21 = vld [vmem:[#allocation55_spill] sm:$0xff]  ;;  %v2760_v8 = vpack.c.bf16 %v2608_v15, %v2604_v14 }
 0x241   : > { %v2115_v48 = vpop.f32.mrf.mxu2 }
 0x242   : > { %v2116_v53 = vadd.f32 %v2115_v48, %v6969_v39  ;;  %v2204_v44 = vpop.f32.mrf.mxu3  ;;  %v8698_v39 = vld [vmem:[#allocation8_spill] sm:$0xff] }
 0x243   : > { %3353 = vmatpush.bf16.msra.mxu2 %v6951_v62  ;;  %v1939_v40 = vpop.f32.mrf.mxu0  ;;  %v2600_v62 = vmax.f32 %v2162_v10, 0.0 }
 0x244   : > { %v7025_v17 = vadd.f32 %v2204_v44, %v2116_v53  ;;  %v1940_v25 = vadd.f32 %v1939_v40, %v8673_v21  ;;  %3177 = vmatpush.bf16.msra.mxu0 %v2759_v37  ;;  %v2028_v59 = vpop.f32.mrf.mxu1  ;;  %v8681_v53 = vld [vmem:[#allocation6_spill] sm:$0xff] }
 0x245   : > { %v2756_v35 = vpack.c.bf16 %v2600_v62, %v2596_v30  ;;  %v8685_v30 = vld [vmem:[#allocation3_spill] sm:$0xff] }
 0x246   : > { %v7029_v52 = vadd.f32 %v2028_v59, %v1940_v25 }
 0x247   : > { %3354 = vmatpush.bf16.msra.mxu2 %v6956_v60  ;;  %v8678_v60 = vld [vmem:[#allocation27_spill] sm:$0xff] }
 0x248   : > { %3178 = vmatpush.bf16.msra.mxu0 %v2755_v24  ;;  %v8684_v24 = vld [vmem:[#allocation24_spill] sm:$0xff] }
 0x249   : > { %v2117_v13 = vpop.f32.mrf.mxu2 }
 0x24a   : > { %v2118_v56 = vadd.f32 %v2117_v13, %v8673_v21  ;;  %v2206_v22 = vpop.f32.mrf.mxu3 }
 0x24b   : > { %3355 = vmatpush.bf16.msra.mxu2 %v2760_v8  ;;  %v1942_v20 = vpop.f32.mrf.mxu0 }
 0x24c   : > { %v7035_v32 = vadd.f32 %v2206_v22, %v2118_v56  ;;  %v1943_v19 = vadd.f32 %v1942_v20, %v8677_v28  ;;  %v2031_v49 = vpop.f32.mrf.mxu1 }
 0x24e   : > { %v7038_v41 = vadd.f32 %v2031_v49, %v1943_v19  ;;  %2257 = vmatmul.bf16.gmra.mxu0 %v8678_v60  ;;  %2435 = vmatmul.bf16.gmra.mxu2 %v8678_v60  ;;  %v8687_v60 = vld [vmem:[#allocation9_spill] sm:$0xff] }
 0x24f   : > { %2524 = vmatmul.bf16.gmra.mxu3 %v8679_v1  ;;  %3356 = vmatpush.bf16.msra.mxu2 %v2756_v35  ;;  %v8686_v35 = vld [vmem:[#allocation23_spill] sm:$0xff] }
 0x250   : > { %2346 = vmatmul.bf16.gmra.mxu1 %v8679_v1 }
 0x251   : > { %v2120_v63 = vpop.f32.mrf.mxu2 }
 0x252   : > { %v2121_v47 = vadd.f32 %v2120_v63, %v8677_v28  ;;  %v2209_v57 = vpop.f32.mrf.mxu3 }
 0x253   : > { %v1944_v55 = vpop.f32.mrf.mxu0 }
 0x254   : > { %v7045_v3 = vadd.f32 %v2209_v57, %v2121_v47  ;;  %v1945_v9 = vadd.f32 %v1944_v55, %v8680_v18  ;;  %v2033_v45 = vpop.f32.mrf.mxu1 }
 0x256   : > { %v7048_v43 = vadd.f32 %v2033_v45, %v1945_v9 }
 0x259   : > { %v2122_v58 = vpop.f32.mrf.mxu2 }
 0x25a   : > { %v2123_v36 = vadd.f32 %v2122_v58, %v8680_v18  ;;  %v2211_v6 = vpop.f32.mrf.mxu3 }
 0x25b   : > { %v1947_v48 = vpop.f32.mrf.mxu0 }
 0x25c   : > { %v7051_v16 = vadd.f32 %v2211_v6, %v2123_v36  ;;  %v1948_v44 = vadd.f32 %v1947_v48, %v8681_v53  ;;  %v2036_v37 = vpop.f32.mrf.mxu1  ;;  %v8688_v48 = vld [vmem:[#allocation10_spill] sm:$0xff] }
 0x25e   : > { %v7054_v40 = vadd.f32 %v2036_v37, %v1948_v44  ;;  %2262 = vmatmul.bf16.gmra.mxu0 %v8682_v5  ;;  %2440 = vmatmul.bf16.gmra.mxu2 %v8682_v5  ;;  %v8689_v44 = vld [vmem:[#allocation11_spill] sm:$0xff]  ;;  %v2663_v5 = vmax.f32 %v6995_v7, 0.0 }
 0x25f   : > { %2529 = vmatmul.bf16.gmra.mxu3 %v8683_v51 }
 0x260   : > { %2351 = vmatmul.bf16.gmra.mxu1 %v8683_v51 }
 0x261   : > { %v2125_v25 = vpop.f32.mrf.mxu2 }
 0x262   : > { %v2126_v59 = vadd.f32 %v2125_v25, %v8681_v53  ;;  %v2214_v34 = vpop.f32.mrf.mxu3  ;;  %v2680_v53 = vmax.f32 %v7051_v16, 0.0 }
 0x263   : > { %v1949_v10 = vpop.f32.mrf.mxu0 }
 0x264   : > { %v7061_v15 = vadd.f32 %v2214_v34, %v2126_v59  ;;  %v1950_v46 = vadd.f32 %v1949_v10, %v8684_v24  ;;  %v2038_v14 = vpop.f32.mrf.mxu1  ;;  %v2659_v59 = vmax.f32 %v6975_v42, 0.0  ;;  %v8691_v42 = vld [vmem:[#allocation15_spill] sm:$0xff] }
 0x266   : > { %v7064_v62 = vadd.f32 %v2038_v14, %v1950_v46  ;;  %v7103_v10 = vpack.c.bf16 %v2663_v5, %v2659_v59  ;;  %v2664_v46 = vmax.f32 %v7004_v23, 0.0  ;;  %v2671_v23 = vmax.f32 %v7029_v52, 0.0 }
 0x267   : > { %v2683_v52 = vmax.f32 %v7054_v40, 0.0 }
 0x268   : > { %v2687_v5 = vmax.f32 %v7064_v62, 0.0  ;;  %v8694_v62 = vld [vmem:[#allocation16_spill] sm:$0xff] }
 0x269   : > { %v2127_v13 = vpop.f32.mrf.mxu2 }
 0x26a   : > { %v2128_v8 = vadd.f32 %v2127_v13, %v8684_v24  ;;  %v2216_v56 = vpop.f32.mrf.mxu3  ;;  %v2660_v13 = vmax.f32 %v6989_v38, 0.0 }
 0x26b   : > { %v1952_v22 = vpop.f32.mrf.mxu0 }
 0x26c   : > { %v7067_v27 = vadd.f32 %v2216_v56, %v2128_v8  ;;  %v1953_v20 = vadd.f32 %v1952_v22, %v8685_v30  ;;  %v2041_v19 = vpop.f32.mrf.mxu1  ;;  %v7111_v7 = vpack.c.bf16 %v2664_v46, %v2660_v13  ;;  %v2679_v13 = vmax.f32 %v7048_v43, 0.0 }
 0x26e   : > { %v7070_v49 = vadd.f32 %v2041_v19, %v1953_v20  ;;  %2267 = vmatmul.bf16.gmra.mxu0 %v8686_v35  ;;  %2445 = vmatmul.bf16.gmra.mxu2 %v8686_v35  ;;  %v8690_v20 = vld [vmem:[#allocation14_spill] sm:$0xff] }
 0x26f   : > { %2534 = vmatmul.bf16.gmra.mxu3 %v8687_v60 }
 0x270   : > { %2356 = vmatmul.bf16.gmra.mxu1 %v8687_v60  ;;  %v2667_v60 = vmax.f32 %v7011_v33, 0.0  ;;  %v2675_v33 = vmax.f32 %v7038_v41, 0.0 }
 0x271   : > { %v2130_v1 = vpop.f32.mrf.mxu2 }
 0x272   : > { %v2131_v63 = vadd.f32 %v2130_v1, %v8685_v30  ;;  %v2219_v47 = vpop.f32.mrf.mxu3  ;;  %v7138_v43 = vpack.c.bf16 %v2679_v13, %v2675_v33  ;;  %v8695_v30 = vld [vmem:[#allocation17_spill] sm:$0xff]  ;;  %v2676_v13 = vmax.f32 %v7045_v3, 0.0 }
 0x273   : > { %v7077_v57 = vpop.f32.mrf.mxu0 }
 0x274   : > { %v7079_v55 = vadd.f32 %v2219_v47, %v2131_v63  ;;  %v7081_v9 = vpop.f32.mrf.mxu1  ;;  %v7121_v63 = vpack.c.bf16 %v2671_v23, %v2667_v60  ;;  %v2672_v47 = vmax.f32 %v7035_v32, 0.0  ;;  %v8692_v23 = vld [vmem:[#allocation40_spill] sm:$0xff]  ;;  %v7133_v32 = vpack.c.bf16 %v2687_v5, %v2683_v52 }
 0x275   : > { %v2684_v5 = vmax.f32 %v7061_v15, 0.0 }
 0x279   : > { %v7083_v45 = vpop.f32.mrf.mxu2 }
 0x27a   : > { %v7085_v58 = vpop.f32.mrf.mxu3 }
 0x27b   : > { %v7087_v36 = vpop.f32.mrf.mxu0 }
 0x27c   : > { %v7089_v6 = vpop.f32.mrf.mxu1 }
 0x27e   : > { %2272 = vmatmul.bf16.gmra.mxu0 %v8688_v48  ;;  %2450 = vmatmul.bf16.gmra.mxu2 %v8688_v48 }
 0x27f   : > { %2539 = vmatmul.bf16.gmra.mxu3 %v8689_v44 }
 0x280   : > { %2361 = vmatmul.bf16.gmra.mxu1 %v8689_v44  ;;  %v2668_v44 = vmax.f32 %v7025_v17, 0.0  ;;  %v8693_v17 = vld [vmem:[#allocation13_spill] sm:$0xff] }
 0x281   : > { %v7095_v37 = vpop.f32.mrf.mxu2 }
 0x282   : > { %v7098_v51 = vpop.f32.mrf.mxu3 }
 0x283   : > { %v1959_v25 = vpop.f32.mrf.mxu0 }
 0x284   : > { %v7101_v34 = vpop.f32.mrf.mxu1 }
 0x289   : > { %v7106_v14 = vpop.f32.mrf.mxu2 }
 0x28a   : > { %v7109_v8 = vpop.f32.mrf.mxu3 }
 0x28b   : > { %v1962_v56 = vpop.f32.mrf.mxu0 }
 0x28c   : > { %v2051_v22 = vpop.f32.mrf.mxu1 }
 0x28e   : > { %2277 = vmatmul.bf16.gmra.mxu0 %v8690_v20  ;;  %2455 = vmatmul.bf16.gmra.mxu2 %v8690_v20 }
 0x28f   : > { %2544 = vmatmul.bf16.gmra.mxu3 %v8691_v42 }
 0x290   : > { %2366 = vmatmul.bf16.gmra.mxu1 %v8691_v42  ;;  %v7128_v42 = vpack.c.bf16 %v2672_v47, %v2668_v44  ;;  %v2688_v47 = vmax.f32 %v7067_v27, 0.0 }
 0x291   : > { %v2140_v19 = vpop.f32.mrf.mxu2 }
 0x292   : > { %v7118_v35 = vpop.f32.mrf.mxu3  ;;  %v7148_v27 = vpack.c.bf16 %v2688_v47, %v2684_v5  ;;  %v2138_v5 = vadd.f32 %v7106_v14, %v8698_v39 }
 0x293   : > { %v1964_v38 = vpop.f32.mrf.mxu0 }
 0x294   : > { %v2053_v1 = vpop.f32.mrf.mxu1  ;;  %v1965_v41 = vadd.f32 %v1964_v38, %v8695_v30  ;;  %v1960_v38 = vadd.f32 %v1959_v25, %v8698_v39  ;;  %v8700_v25 = vld [vmem:[#allocation12_spill] sm:$0xff] }
 0x296   : > { %v2054_v0 = vadd.f32 %v2053_v1, %v1965_v41  ;;  %v1955_v1 = vadd.f32 %v7077_v57, %v8700_v25 }
 0x298   : > { %v2711_v41 = vmax.f32 %v2054_v0, 0.0  ;;  %v2044_v14 = vadd.f32 %v7081_v9, %v1955_v1 }
 0x299   : > { %v2142_v48 = vpop.f32.mrf.mxu2 }
 0x29a   : > { %v2231_v59 = vpop.f32.mrf.mxu3  ;;  %v2143_v16 = vadd.f32 %v2142_v48, %v8695_v30  ;;  %v2049_v48 = vadd.f32 %v7101_v34, %v1960_v38  ;;  %v2227_v38 = vadd.f32 %v7109_v8, %v2138_v5  ;;  %v2691_v5 = vmax.f32 %v7070_v49, 0.0 }
 0x29b   : > { %v1967_v46 = vpop.f32.mrf.mxu0 }
 0x29c   : > { %v2056_v20 = vpop.f32.mrf.mxu1  ;;  %v1968_v60 = vadd.f32 %v1967_v46, %v8694_v62  ;;  %v8697_v46 = vld [vmem:[#allocation22_spill] sm:$0xff] }
 0x29d   : > { %v1963_v21 = vadd.f32 %v1962_v56, %v8697_v46  ;;  %v2141_v3 = vadd.f32 %v2140_v19, %v8697_v46 }
 0x29e   : > { %2282 = vmatmul.bf16.gmra.mxu0 %v8692_v23  ;;  %2460 = vmatmul.bf16.gmra.mxu2 %v8692_v23  ;;  %v2057_v52 = vadd.f32 %v2056_v20, %v1968_v60  ;;  %v8696_v23 = vld [vmem:[#allocation20_spill] sm:$0xff]  ;;  %v7152_v20 = vpack.c.bf16 %v2680_v53, %v2676_v13 }
 0x29f   : > { %2549 = vmatmul.bf16.gmra.mxu3 %v8693_v17  ;;  %v2052_v56 = vadd.f32 %v2051_v22, %v1963_v21  ;;  %v8701_v22 = vld [vmem:[#allocation36_spill] sm:$0xff]  ;;  %v2230_v57 = vadd.f32 %v7118_v35, %v2141_v3 }
 0x2a0   : > { %2371 = vmatmul.bf16.gmra.mxu1 %v8693_v17  ;;  %v2715_v61 = vmax.f32 %v2057_v52, 0.0 }
 0x2a1   : > { %v2145_v40 = vpop.f32.mrf.mxu2  ;;  %v2708_v3 = vmax.f32 %v2230_v57, 0.0  ;;  %v2692_v57 = vmax.f32 %v7079_v55, 0.0 }
 0x2a2   : > { %v2234_v44 = vpop.f32.mrf.mxu3  ;;  %v2146_v33 = vadd.f32 %v2145_v40, %v8694_v62 }
 0x2a3   : > { %v1969_v24 = vpop.f32.mrf.mxu0 }
 0x2a4   : > { %v1970_v18 = vadd.f32 %v1969_v24, %v8696_v23  ;;  %v2058_v28 = vpop.f32.mrf.mxu1  ;;  %v8699_v24 = vld [vmem:[#allocation18_spill] sm:$0xff]  ;;  %v2235_v40 = vadd.f32 %v2234_v44, %v2146_v33  ;;  %v2707_v44 = vmax.f32 %v2052_v56, 0.0  ;;  %v8702_v33 = vld [vmem:[#allocation21_spill] sm:$0xff] }
 0x2a5   : > { %v1958_v60 = vadd.f32 %v7087_v36, %v8699_v24  ;;  %v2232_v36 = vadd.f32 %v2231_v59, %v2143_v16  ;;  %v2703_v59 = vmax.f32 %v2049_v48, 0.0 }
 0x2a6   : > { %v2059_v17 = vadd.f32 %v2058_v28, %v1970_v18  ;;  %v2716_v34 = vmax.f32 %v2235_v40, 0.0 }
 0x2a8   : > { %v2719_v15 = vmax.f32 %v2059_v17, 0.0  ;;  %v8703_v17 = vld [vmem:[#allocation31_spill] sm:$0xff] }
 0x2a9   : > { %v2147_v11 = vpop.f32.mrf.mxu2 }
 0x2aa   : > { %v2815_v28 = vpack.c.bf16 %v2719_v15, %v2715_v61  ;;  %v2148_v18 = vadd.f32 %v2147_v11, %v8696_v23  ;;  %v2236_v47 = vpop.f32.mrf.mxu3  ;;  %v2047_v61 = vadd.f32 %v7089_v6, %v1958_v60  ;;  %v2136_v11 = vadd.f32 %v7095_v37, %v8699_v24 }
 0x2ab   : > { %v2248_v53 = vpop.f32.mrf.mxu0  ;;  %v2811_v6 = vpack.c.bf16 %v2711_v41, %v2707_v44  ;;  %v2712_v37 = vmax.f32 %v2232_v36, 0.0  ;;  %v2133_v60 = vadd.f32 %v7083_v45, %v8700_v25 }
 0x2ac   : > { %v2237_v21 = vadd.f32 %v2236_v47, %v2148_v18  ;;  %v2249_v52 = vadd.f32 %v2248_v53, %v8701_v22  ;;  %3260 = vmatpush.bf16.msra.mxu1 %v2815_v28  ;;  %v2337_v19 = vpop.f32.mrf.mxu1  ;;  %v2699_v35 = vmax.f32 %v2047_v61, 0.0  ;;  %v2225_v56 = vadd.f32 %v7098_v51, %v2136_v11 }
 0x2ad   : > { %v2695_v28 = vmax.f32 %v2044_v14, 0.0  ;;  %v2704_v47 = vmax.f32 %v2227_v38, 0.0  ;;  %v2812_v53 = vpack.c.bf16 %v2712_v37, %v2708_v3  ;;  %v2222_v45 = vadd.f32 %v7085_v58, %v2133_v60  ;;  %v8705_v14 = vld [vmem:[#allocation4_spill] sm:$0xff] }
 0x2ae   : > { %v2720_v0 = vmax.f32 %v2237_v21, 0.0  ;;  %v7168_v13 = vadd.f32 %v2337_v19, %v2249_v52  ;;  %2287 = vmatmul.bf16.gmra.mxu0 %v8702_v33  ;;  %2465 = vmatmul.bf16.gmra.mxu2 %v8702_v33  ;;  %v2807_v8 = vpack.c.bf16 %v2703_v59, %v2699_v35  ;;  %v2700_v51 = vmax.f32 %v2225_v56, 0.0 }
 0x2af   : > { %2554 = vmatmul.bf16.gmra.mxu3 %v8703_v17  ;;  %v2803_v21 = vpack.c.bf16 %v2695_v28, %v2691_v5  ;;  %v2696_v19 = vmax.f32 %v2222_v45, 0.0  ;;  %v8708_v28 = vld [vmem:[#allocation42_spill] sm:$0xff] }
 0x2b0   : > { %v2816_v16 = vpack.c.bf16 %v2720_v0, %v2716_v34  ;;  %2376 = vmatmul.bf16.gmra.mxu1 %v8703_v17  ;;  %v8704_v34 = vld [vmem:[#allocation25_spill] sm:$0xff] }
 0x2b1   : > { %3261 = vmatpush.bf16.msra.mxu1 %v2811_v6  ;;  %v2426_v15 = vpop.f32.mrf.mxu2  ;;  %v2804_v59 = vpack.c.bf16 %v2696_v19, %v2692_v57 }
 0x2b2   : > { %v2427_v9 = vadd.f32 %v2426_v15, %v8701_v22  ;;  %v2515_v40 = vpop.f32.mrf.mxu3  ;;  %3438 = vmatpush.bf16.msra.mxu3 %v2816_v16  ;;  %v2808_v22 = vpack.c.bf16 %v2704_v47, %v2700_v51  ;;  %v8710_v47 = vld [vmem:[#allocation38_spill] sm:$0xff] }
 0x2b3   : > { %v2250_v18 = vpop.f32.mrf.mxu0 }
 0x2b4   : > { %v7180_v1 = vadd.f32 %v2515_v40, %v2427_v9  ;;  %v2251_v48 = vadd.f32 %v2250_v18, %v6997_v31  ;;  %v2339_v41 = vpop.f32.mrf.mxu1 }
 0x2b5   : > { %3262 = vmatpush.bf16.msra.mxu1 %v2807_v8 }
 0x2b6   : > { %v7185_v36 = vadd.f32 %v2339_v41, %v2251_v48  ;;  %3439 = vmatpush.bf16.msra.mxu3 %v2812_v53 }
 0x2b9   : > { %3263 = vmatpush.bf16.msra.mxu1 %v2803_v21  ;;  %v2428_v52 = vpop.f32.mrf.mxu2 }
 0x2ba   : > { %v2429_v61 = vadd.f32 %v2428_v52, %v6997_v31  ;;  %v2517_v11 = vpop.f32.mrf.mxu3  ;;  %3440 = vmatpush.bf16.msra.mxu3 %v2808_v22  ;;  %v8706_v31 = vld [vmem:[#allocation39_spill] sm:$0xff]  ;;  %v8711_v22 = vld [vmem:[#allocation30_spill] sm:$0xff] }
 0x2bb   : > { %v2253_v44 = vpop.f32.mrf.mxu0 }
 0x2bc   : > { %v7189_v49 = vadd.f32 %v2517_v11, %v2429_v61  ;;  %v2254_v58 = vadd.f32 %v2253_v44, %v8704_v34  ;;  %v8712_v11 = vld [vmem:[#allocation45_spill] sm:$0xff]  ;;  %v8713_v44 = vld [vmem:[#allocation46_spill] sm:$0xff] }
 0x2bd   : > { %3264 = vmatpush.bf16.msra.mxu1 %v7133_v32  ;;  %v2342_v0 = vpop.f32.mrf.mxu1 }
 0x2be   : > { %v7193_v33 = vadd.f32 %v2342_v0, %v2254_v58  ;;  %2292 = vmatmul.bf16.gmra.mxu0 %v8705_v14  ;;  %2470 = vmatmul.bf16.gmra.mxu2 %v8705_v14 }
 0x2bf   : > { %2559 = vmatmul.bf16.gmra.mxu3 %v8706_v31 }
 0x2c0   : > { %3441 = vmatpush.bf16.msra.mxu3 %v2804_v59  ;;  %2381 = vmatmul.bf16.gmra.mxu1 %v8706_v31  ;;  %v8714_v59 = vld [vmem:[#allocation34_spill] sm:$0xff] }
 0x2c1   : > { %3265 = vmatpush.bf16.msra.mxu1 %v7138_v43  ;;  %v2431_v55 = vpop.f32.mrf.mxu2 }
 0x2c2   : > { %v2432_v17 = vadd.f32 %v2431_v55, %v8704_v34  ;;  %v2520_v6 = vpop.f32.mrf.mxu3 }
 0x2c3   : > { %v2255_v32 = vpop.f32.mrf.mxu0 }
 0x2c4   : > { %v7201_v38 = vadd.f32 %v2520_v6, %v2432_v17  ;;  %3442 = vmatpush.bf16.msra.mxu3 %v7148_v27  ;;  %v2256_v37 = vadd.f32 %v2255_v32, %v6654_v50  ;;  %v8707_v27 = vld [vmem:[#allocation43_spill] sm:$0xff] }
 0x2c5   : > { %3266 = vmatpush.bf16.msra.mxu1 %v7121_v63  ;;  %v2344_v16 = vpop.f32.mrf.mxu1 }
 0x2c6   : > { %v7206_v35 = vadd.f32 %v2344_v16, %v2256_v37 }
 0x2c8   : > { %3443 = vmatpush.bf16.msra.mxu3 %v7152_v20  ;;  %v8709_v20 = vld [vmem:[#allocation44_spill] sm:$0xff] }
 0x2c9   : > { %3267 = vmatpush.bf16.msra.mxu1 %v7103_v10  ;;  %v2433_v43 = vpop.f32.mrf.mxu2 }
 0x2ca   : > { %v2434_v15 = vadd.f32 %v2433_v43, %v6654_v50  ;;  %v2522_v60 = vpop.f32.mrf.mxu3 }
 0x2cb   : > { %v2258_v56 = vpop.f32.mrf.mxu0 }
 0x2cc   : > { %v7211_v3 = vadd.f32 %v2522_v60, %v2434_v15  ;;  %3444 = vmatpush.bf16.msra.mxu3 %v7128_v42  ;;  %v2259_v9 = vadd.f32 %v2258_v56, %v8707_v27  ;;  %v8715_v15 = vld [vmem:[#allocation33_spill] sm:$0xff] }
 0x2cd   : > { %v2347_v40 = vpop.f32.mrf.mxu1 }
 0x2ce   : > { %v7215_v63 = vadd.f32 %v2347_v40, %v2259_v9  ;;  %2297 = vmatmul.bf16.gmra.mxu0 %v8708_v28  ;;  %2475 = vmatmul.bf16.gmra.mxu2 %v8708_v28  ;;  %v8716_v9 = vld [vmem:[#allocation47_spill] sm:$0xff]  ;;  %v8717_v40 = vld [vmem:[#allocation48_spill] sm:$0xff] }
 0x2cf   : > { %2564 = vmatmul.bf16.gmra.mxu3 %v8709_v20 }
 0x2d0   : > { %3445 = vmatpush.bf16.msra.mxu3 %v7111_v7  ;;  %2386 = vmatmul.bf16.gmra.mxu1 %v8709_v20 }
 0x2d1   : > { %v2436_v50 = vpop.f32.mrf.mxu2 }
 0x2d2   : > { %v2437_v10 = vadd.f32 %v2436_v50, %v8707_v27  ;;  %v2525_v18 = vpop.f32.mrf.mxu3 }
 0x2d3   : > { %v2260_v42 = vpop.f32.mrf.mxu0 }
 0x2d4   : > { %v7223_v8 = vadd.f32 %v2525_v18, %v2437_v10  ;;  %v2261_v48 = vadd.f32 %v2260_v42, %v8710_v47 }
 0x2d5   : > { %v2349_v41 = vpop.f32.mrf.mxu1 }
 0x2d6   : > { %v7226_v53 = vadd.f32 %v2349_v41, %v2261_v48 }
 0x2d9   : > { %v2438_v5 = vpop.f32.mrf.mxu2 }
 0x2da   : > { %v2439_v45 = vadd.f32 %v2438_v5, %v8710_v47  ;;  %v2527_v51 = vpop.f32.mrf.mxu3 }
 0x2db   : > { %v2263_v21 = vpop.f32.mrf.mxu0 }
 0x2dc   : > { %v7229_v7 = vadd.f32 %v2527_v51, %v2439_v45  ;;  %v2264_v52 = vadd.f32 %v2263_v21, %v8711_v22  ;;  %v8718_v45 = vld [vmem:[#allocation49_spill] sm:$0xff]  ;;  %v8719_v51 = vld [vmem:[#allocation50_spill] sm:$0xff] }
 0x2dd   : > { %v2352_v19 = vpop.f32.mrf.mxu1 }
 0x2de   : > { %v7232_v61 = vadd.f32 %v2352_v19, %v2264_v52  ;;  %2302 = vmatmul.bf16.gmra.mxu0 %v8712_v11  ;;  %2480 = vmatmul.bf16.gmra.mxu2 %v8712_v11  ;;  %v2597_v11 = vmax.f32 %v7168_v13, 0.0  ;;  %v8721_v13 = vld [vmem:[#allocation52_spill] sm:$0xff] }
 0x2df   : > { %2569 = vmatmul.bf16.gmra.mxu3 %v8713_v44 }
 0x2e0   : > { %2391 = vmatmul.bf16.gmra.mxu1 %v8713_v44 }
 0x2e1   : > { %v2441_v57 = vpop.f32.mrf.mxu2 }
 0x2e2   : > { %v2442_v34 = vadd.f32 %v2441_v57, %v8711_v22  ;;  %v2530_v58 = vpop.f32.mrf.mxu3  ;;  %v2601_v22 = vmax.f32 %v7185_v36, 0.0 }
 0x2e3   : > { %v2265_v0 = vpop.f32.mrf.mxu0 }
 0x2e4   : > { %v7239_v14 = vadd.f32 %v2530_v58, %v2442_v34  ;;  %v2266_v31 = vadd.f32 %v2265_v0, %v8714_v59  ;;  %v7281_v57 = vpack.c.bf16 %v2601_v22, %v2597_v11  ;;  %v2602_v34 = vmax.f32 %v7189_v49, 0.0  ;;  %v8722_v11 = vld [vmem:[#allocation53_spill] sm:$0xff] }
 0x2e5   : > { %v2354_v55 = vpop.f32.mrf.mxu1  ;;  %v2598_v0 = vmax.f32 %v7180_v1, 0.0  ;;  %v2609_v49 = vmax.f32 %v7206_v35, 0.0  ;;  %v2621_v35 = vmax.f32 %v7232_v61, 0.0 }
 0x2e6   : > { %v7242_v17 = vadd.f32 %v2354_v55, %v2266_v31 }
 0x2e7   : > { %v7289_v55 = vpack.c.bf16 %v2602_v34, %v2598_v0 }
 0x2e9   : > { %v2443_v6 = vpop.f32.mrf.mxu2 }
 0x2ea   : > { %v2444_v32 = vadd.f32 %v2443_v6, %v8714_v59  ;;  %v2532_v37 = vpop.f32.mrf.mxu3  ;;  %v8720_v6 = vld [vmem:[#allocation51_spill] sm:$0xff] }
 0x2eb   : > { %v2268_v16 = vpop.f32.mrf.mxu0 }
 0x2ec   : > { %v7245_v43 = vadd.f32 %v2532_v37, %v2444_v32  ;;  %v2269_v60 = vadd.f32 %v2268_v16, %v8715_v15  ;;  %v2605_v16 = vmax.f32 %v7193_v33, 0.0  ;;  %v2613_v33 = vmax.f32 %v7215_v63, 0.0 }
 0x2ed   : > { %v2357_v56 = vpop.f32.mrf.mxu1 }
 0x2ee   : > { %v7248_v27 = vadd.f32 %v2357_v56, %v2269_v60  ;;  %2307 = vmatmul.bf16.gmra.mxu0 %v8716_v9  ;;  %2485 = vmatmul.bf16.gmra.mxu2 %v8716_v9  ;;  %v7299_v60 = vpack.c.bf16 %v2609_v49, %v2605_v16  ;;  %v2610_v56 = vmax.f32 %v7211_v3, 0.0  ;;  %v2626_v34 = vmax.f32 %v7245_v43, 0.0 }
 0x2ef   : > { %2574 = vmatmul.bf16.gmra.mxu3 %v8717_v40  ;;  %v2618_v49 = vmax.f32 %v7229_v7, 0.0  ;;  %v2622_v16 = vmax.f32 %v7239_v14, 0.0 }
 0x2f0   : > { %2396 = vmatmul.bf16.gmra.mxu1 %v8717_v40  ;;  %v2606_v40 = vmax.f32 %v7201_v38, 0.0  ;;  %v8723_v38 = vld [vmem:[#allocation54_spill] sm:$0xff] }
 0x2f1   : > { %v2446_v28 = vpop.f32.mrf.mxu2 }
 0x2f2   : > { %v2447_v20 = vadd.f32 %v2446_v28, %v8715_v15  ;;  %v2535_v50 = vpop.f32.mrf.mxu3  ;;  %v2625_v28 = vmax.f32 %v7242_v17, 0.0 }
 0x2f3   : > { %v7255_v10 = vpop.f32.mrf.mxu0 }
 0x2f4   : > { %v7257_v18 = vadd.f32 %v2535_v50, %v2447_v20  ;;  %v7311_v3 = vpack.c.bf16 %v2625_v28, %v2621_v35  ;;  %v2614_v28 = vmax.f32 %v7223_v8, 0.0  ;;  %v5177_v8 = vld [vmem:[%s5421_s24 + $0x4] sm:$0xf] }
 0x2f5   : > { %v7259_v42 = vpop.f32.mrf.mxu1 }
 0x2f9   : > { %v7261_v47 = vpop.f32.mrf.mxu2 }
 0x2fa   : > { %v7263_v48 = vpop.f32.mrf.mxu3 }
 0x2fb   : > { %v7265_v41 = vpop.f32.mrf.mxu0 }
 0x2fc   : > { %v2274_v7 = vadd.f32 %v7265_v41, %v6737_v26 }
 0x2fd   : > { %v7267_v5 = vpop.f32.mrf.mxu1 }
 0x2fe   : > { %2312 = vmatmul.bf16.gmra.mxu0 %v8718_v45  ;;  %2490 = vmatmul.bf16.gmra.mxu2 %v8718_v45  ;;  %v2617_v45 = vmax.f32 %v7226_v53, 0.0 }
 0x2ff   : > { %2579 = vmatmul.bf16.gmra.mxu3 %v8719_v51 }
 0x300   : > { %2401 = vmatmul.bf16.gmra.mxu1 %v8719_v51  ;;  %v7306_v51 = vpack.c.bf16 %v2610_v56, %v2606_v40  ;;  %v7316_v53 = vpack.c.bf16 %v2617_v45, %v2613_v33  ;;  %v5178_v33 = vld [vmem:[%s5421_s24 + $0x4] sm:$0xf0] }
 0x301   : > { %v7273_v21 = vpop.f32.mrf.mxu2 }
 0x302   : > { %v7276_v52 = vpop.f32.mrf.mxu3 }
 0x303   : > { %v2275_v19 = vpop.f32.mrf.mxu0 }
 0x304   : > { %v2276_v43 = vadd.f32 %v2275_v19, %v6652_v4  ;;  %v7336_v19 = vpack.c.bf16 %v2618_v49, %v2614_v28 }
 0x305   : > { %v7279_v44 = vpop.f32.mrf.mxu1 }
 0x309   : > { %v7284_v58 = vpop.f32.mrf.mxu2 }
 0x30a   : > { %v7287_v59 = vpop.f32.mrf.mxu3  ;;  %v2454_v49 = vadd.f32 %v7284_v58, %v6652_v4 }
 0x30b   : > { %v2278_v31 = vpop.f32.mrf.mxu0 }
 0x30d   : > { %v2367_v36 = vpop.f32.mrf.mxu1 }
 0x30e   : > { %2317 = vmatmul.bf16.gmra.mxu0 %v8720_v6  ;;  %2495 = vmatmul.bf16.gmra.mxu2 %v8720_v6  ;;  %v2279_v6 = vadd.f32 %v2278_v31, %v6470_v12  ;;  %v5003_v31 = vld [vmem:[%s5421_s24] sm:$0xf] }
 0x30f   : > { %2584 = vmatmul.bf16.gmra.mxu3 %v8721_v13 }
 0x310   : > { %2406 = vmatmul.bf16.gmra.mxu1 %v8721_v13  ;;  %v2368_v14 = vadd.f32 %v2367_v36, %v2279_v6 }
 0x311   : > { %v2456_v32 = vpop.f32.mrf.mxu2 }
 0x312   : > { %v7296_v37 = vpop.f32.mrf.mxu3 }
 0x313   : > { %v2280_v1 = vpop.f32.mrf.mxu0 }
 0x314   : > { %v2281_v63 = vadd.f32 %v2280_v1, %v6718_v54 }
 0x315   : > { %v2369_v15 = vpop.f32.mrf.mxu1 }
 0x316   : > { %v2370_v45 = vadd.f32 %v2369_v15, %v2281_v63  ;;  %v8724_v15 = vld [vmem:[#allocation28_spill] sm:$0xff] }
 0x318   : > { %v2649_v41 = vmax.f32 %v2370_v45, 0.0 }
 0x319   : > { %v2458_v9 = vpop.f32.mrf.mxu2 }
 0x31a   : > { %v2547_v20 = vpop.f32.mrf.mxu3 }
 0x31b   : > { %v2283_v50 = vpop.f32.mrf.mxu0 }
 0x31c   : > { %v2284_v17 = vadd.f32 %v2283_v50, %v6698_v29 }
 0x31d   : > { %v2372_v22 = vpop.f32.mrf.mxu1 }
 0x31e   : > { %2322 = vmatmul.bf16.gmra.mxu0 %v8722_v11  ;;  %2500 = vmatmul.bf16.gmra.mxu2 %v8722_v11  ;;  %v2373_v56 = vadd.f32 %v2372_v22, %v2284_v17  ;;  %v7329_v11 = vpack.c.bf16 %v2626_v34, %v2622_v16  ;;  %v2459_v22 = vadd.f32 %v2458_v9, %v6718_v54 }
 0x31f   : > { %2589 = vmatmul.bf16.gmra.mxu3 %v8723_v38  ;;  %v2457_v34 = vadd.f32 %v2456_v32, %v6470_v12  ;;  %v7342_v16 = vor.u32 %v5178_v33, %v5003_v31  ;;  %v8727_v32 = vld [vmem:[#allocation57_spill] sm:$0xff] }
 0x320   : > { %2411 = vmatmul.bf16.gmra.mxu1 %v8723_v38  ;;  %v2653_v38 = vmax.f32 %v2373_v56, 0.0  ;;  %v2363_v56 = vadd.f32 %v7267_v5, %v2274_v7  ;;  %v2548_v28 = vadd.f32 %v2547_v20, %v2459_v22 }
 0x321   : > { %v2461_v61 = vpop.f32.mrf.mxu2  ;;  %8725 = vst [vmem:[#allocation41_spill] sm:$0xff] %v7342_v16  ;;  %v2546_v5 = vadd.f32 %v7296_v37, %v2457_v34  ;;  %v2449_v37 = vadd.f32 %v7261_v47, %v8724_v15  ;;  %v8728_v47 = vld [vmem:[#allocation59_spill] sm:$0xff] }
 0x322   : > { %v2550_v0 = vpop.f32.mrf.mxu3  ;;  %v2462_v1 = vadd.f32 %v2461_v61, %v6698_v29  ;;  %v2271_v29 = vadd.f32 %v7255_v10, %v8724_v15  ;;  %v2365_v61 = vadd.f32 %v7279_v44, %v2276_v43  ;;  %v2645_v44 = vmax.f32 %v2368_v14, 0.0 }
 0x323   : > { %v2285_v13 = vpop.f32.mrf.mxu0  ;;  %v2650_v31 = vmax.f32 %v2548_v28, 0.0  ;;  %v2646_v14 = vmax.f32 %v2546_v5, 0.0 }
 0x324   : > { %v2286_v40 = vadd.f32 %v2285_v13, %v6606_v2  ;;  %v5005_v13 = vld [vmem:[%s5421_s24 + $0x8] sm:$0xf0]  ;;  %v2551_v36 = vadd.f32 %v2550_v0, %v2462_v1  ;;  %v2360_v0 = vadd.f32 %v7259_v42, %v2271_v29  ;;  %v2781_v20 = vpack.c.bf16 %v2649_v41, %v2645_v44 }
 0x325   : > { %v2374_v50 = vpop.f32.mrf.mxu1  ;;  %v7348_v10 = vor.u32 %v5177_v8, %v5005_v13  ;;  %v2543_v42 = vadd.f32 %v7287_v59, %v2454_v49 }
 0x326   : > { %v2375_v35 = vadd.f32 %v2374_v50, %v2286_v40  ;;  %v2641_v50 = vmax.f32 %v2365_v61, 0.0  ;;  %v2654_v1 = vmax.f32 %v2551_v36, 0.0  ;;  %v2538_v61 = vadd.f32 %v7263_v48, %v2449_v37  ;;  %v5182_v37 = vld [vmem:[%s5421_s24 + $0x24] sm:$0xf0] }
 0x327   : > { %8726 = vst [vmem:[#allocation26_spill] sm:$0xff] %v7348_v10  ;;  %v2642_v13 = vmax.f32 %v2543_v42, 0.0  ;;  %v2630_v48 = vmax.f32 %v7257_v18, 0.0  ;;  %v8732_v42 = vld [vmem:[#allocation55_spill] sm:$0xff] }
 0x328   : > { %v2657_v17 = vmax.f32 %v2375_v35, 0.0  ;;  %v2637_v35 = vmax.f32 %v2363_v56, 0.0  ;;  %v5013_v56 = vld [vmem:[%s5421_s24 + $0x18] sm:$0xf0]  ;;  %v2634_v49 = vmax.f32 %v2538_v61, 0.0 }
 0x329   : > { %v2463_v63 = vpop.f32.mrf.mxu2 }
 0x32a   : > { %v2785_v6 = vpack.c.bf16 %v2657_v17, %v2653_v38  ;;  %v2464_v54 = vadd.f32 %v2463_v63, %v6606_v2  ;;  %v2552_v9 = vpop.f32.mrf.mxu3  ;;  %v2452_v2 = vadd.f32 %v7273_v21, %v6737_v26  ;;  %v2633_v21 = vmax.f32 %v2360_v0, 0.0 }
 0x32b   : > { %v2288_v40 = vpop.f32.mrf.mxu0  ;;  %v2777_v59 = vpack.c.bf16 %v2641_v50, %v2637_v35  ;;  %v2629_v17 = vmax.f32 %v7248_v27, 0.0  ;;  %v5180_v27 = vld [vmem:[%s5421_s24 + $0x14] sm:$0xf0] }
 0x32c   : > { %v2553_v12 = vadd.f32 %v2552_v9, %v2464_v54  ;;  %v2289_v43 = vadd.f32 %v2288_v40, %v8727_v32  ;;  %3527 = vmatpush.bf16.msrb.mxu0 %v2785_v6  ;;  %v2541_v7 = vadd.f32 %v7276_v52, %v2452_v2  ;;  %v2782_v52 = vpack.c.bf16 %v2650_v31, %v2646_v14  ;;  %v5011_v6 = vld [vmem:[%s5421_s24 + $0x10] sm:$0xf]  ;;  %v5179_v9 = vld [vmem:[%s5421_s24 + $0x14] sm:$0xf]  ;;  %v8731_v2 = vld [vmem:[#allocation58_spill] sm:$0xff] }
 0x32d   : > { %v2377_v45 = vpop.f32.mrf.mxu1  ;;  %v2773_v36 = vpack.c.bf16 %v2633_v21, %v2629_v17 }
 0x32e   : > { %v2658_v4 = vmax.f32 %v2553_v12, 0.0  ;;  %v7355_v58 = vadd.f32 %v2377_v45, %v2289_v43  ;;  %3179 = vmatmul.bf16.vlgmr.msra.gmra.mxu0 %v7342_v16  ;;  %3357 = vmatmul.bf16.vlgmr.msra.gmra.mxu2 %v7342_v16  ;;  %v2638_v63 = vmax.f32 %v2541_v7, 0.0  ;;  %v7378_v12 = vor.u32 %v5180_v27, %v5011_v6  ;;  %v5021_v7 = vld [vmem:[%s5421_s24 + $0x28] sm:$0xf0] }
 0x32f   : > { %3446 = vmatmul.bf16.vlgmr.msra.gmra.mxu3 %v7348_v10  ;;  %v7381_v43 = vor.u32 %v5179_v9, %v5013_v56  ;;  %v2774_v45 = vpack.c.bf16 %v2634_v49, %v2630_v48  ;;  %v8736_v6 = vld [vmem:[#allocation56_spill] sm:$0xff]  ;;  %v5027_v49 = vld [vmem:[%s5421_s24 + $0x30] sm:$0xf] }
 0x330   : > { %v2786_v26 = vpack.c.bf16 %v2658_v4, %v2654_v1  ;;  %3268 = vmatmul.bf16.vlgmr.msra.gmra.mxu1 %v7348_v10  ;;  %3528 = vmatpush.bf16.msrb.mxu0 %v2781_v20  ;;  %v2778_v54 = vpack.c.bf16 %v2642_v13, %v2638_v63  ;;  %8729 = vst [vmem:[#allocation32_spill] sm:$0xff] %v7378_v12 }
 0x331   : > { %v2466_v33 = vpop.f32.mrf.mxu2  ;;  %8730 = vst [vmem:[#allocation37_spill] sm:$0xff] %v7381_v43 }
 0x332   : > { %v2467_v22 = vadd.f32 %v2466_v33, %v8727_v32  ;;  %v2555_v38 = vpop.f32.mrf.mxu3  ;;  %3705 = vmatpush.bf16.msrb.mxu2 %v2786_v26  ;;  %v5181_v33 = vld [vmem:[%s5421_s24 + $0x24] sm:$0xf] }
 0x333   : > { %v2290_v8 = vpop.f32.mrf.mxu0  ;;  %v7414_v17 = vor.u32 %v5181_v33, %v5021_v7 }
 0x334   : > { %v7367_v29 = vadd.f32 %v2555_v38, %v2467_v22  ;;  %v2291_v15 = vadd.f32 %v2290_v8, %v8728_v47  ;;  %3529 = vmatpush.bf16.msrb.mxu0 %v2777_v59  ;;  %v7411_v59 = vpop.permute.xlu0 %2853  ;;  %v8735_v8 = vld [vmem:[#allocation7_spill] sm:$0xff] }
 0x335   : > { %v2379_v34 = vpop.f32.mrf.mxu1  ;;  %8734 = vst [vmem:[#allocation27_spill] sm:$0xff] %v7414_v17 }
 0x336   : > { %v7371_v41 = vadd.f32 %v2379_v34, %v2291_v15  ;;  %3706 = vmatpush.bf16.msrb.mxu2 %v2782_v52  ;;  %v7429_v34 = vpop.permute.xlu1 %2858 }
 0x338   : > { %3530 = vmatpush.bf16.msrb.mxu0 %v2773_v36 }
 0x339   : > { %v2468_v40 = vpop.f32.mrf.mxu2 }
 0x33a   : > { %v2469_v44 = vadd.f32 %v2468_v40, %v8728_v47  ;;  %v2557_v28 = vpop.f32.mrf.mxu3  ;;  %3707 = vmatpush.bf16.msrb.mxu2 %v2778_v54  ;;  %v5184_v40 = vld [vmem:[%s5421_s24 + $0x34] sm:$0xf0] }
 0x33b   : > { %v2293_v32 = vpop.f32.mrf.mxu0 }
 0x33c   : > { %v7383_v0 = vadd.f32 %v2557_v28, %v2469_v44  ;;  %v2294_v50 = vadd.f32 %v2293_v32, %v8731_v2  ;;  %3531 = vmatpush.bf16.msrb.mxu0 %v7311_v3  ;;  %v7434_v54 = vpop.permute.xlu0 %2868  ;;  %v5183_v44 = vld [vmem:[%s5421_s24 + $0x34] sm:$0xf]  ;;  %v5029_v28 = vld [vmem:[%s5421_s24 + $0x38] sm:$0xf0] }
 0x33d   : > { %v2382_v5 = vpop.f32.mrf.mxu1 }
 0x33e   : > { %v7387_v1 = vadd.f32 %v2382_v5, %v2294_v50  ;;  %3184 = vmatmul.bf16.gmra.mxu0 %v7378_v12  ;;  %3362 = vmatmul.bf16.gmra.mxu2 %v7378_v12  ;;  %v7445_v50 = vor.u32 %v5184_v40, %v5027_v49 }
 0x33f   : > { %3708 = vmatpush.bf16.msrb.mxu2 %v2774_v45  ;;  %3451 = vmatmul.bf16.gmra.mxu3 %v7381_v43  ;;  %v7447_v45 = vor.u32 %v5183_v44, %v5029_v28 }
 0x340   : > { %3273 = vmatmul.bf16.gmra.mxu1 %v7381_v43  ;;  %3532 = vmatpush.bf16.msrb.mxu0 %v7316_v53  ;;  %v5019_v53 = vld [vmem:[%s5421_s24 + $0x20] sm:$0xf]  ;;  %8737 = vst [vmem:[#allocation29_spill] sm:$0xff] %v7445_v50  ;;  %v5189_v43 = vld [vmem:[%s5421_s24 + $0x64] sm:$0xf] }
 0x341   : > { %v2471_v18 = vpop.f32.mrf.mxu2  ;;  %v7409_v38 = vor.u32 %v5182_v37, %v5019_v53  ;;  %8738 = vst [vmem:[#allocation19_spill] sm:$0xff] %v7447_v45 }
 0x342   : > { %v2472_v3 = vadd.f32 %v2471_v18, %v8731_v2  ;;  %v2560_v4 = vpop.f32.mrf.mxu3 }
 0x343   : > { %3709 = vmatpush.bf16.msrb.mxu2 %v7329_v11  ;;  %v2295_v20 = vpop.f32.mrf.mxu0  ;;  %8733 = vst [vmem:[#allocation35_spill] sm:$0xff] %v7409_v38 }
 0x344   : > { %v7396_v35 = vadd.f32 %v2560_v4, %v2472_v3  ;;  %v2296_v31 = vadd.f32 %v2295_v20, %v8732_v42  ;;  %3533 = vmatpush.bf16.msrb.mxu0 %v7299_v60  ;;  %v8739_v3 = vld [vmem:[#allocation6_spill] sm:$0xff]  ;;  %v7452_v20 = vpop.permute.xlu1 %2873 }
 0x345   : > { %v2384_v26 = vpop.f32.mrf.mxu1 }
 0x346   : > { %v7400_v21 = vadd.f32 %v2384_v26, %v2296_v31  ;;  %v7458_v26 = vpop.permute.xlu0 %2883 }
 0x347   : > { %3710 = vmatpush.bf16.msrb.mxu2 %v7336_v19 }
 0x348   : > { %3534 = vmatpush.bf16.msrb.mxu0 %v7281_v57  ;;  %v7419_v57 = vpop.permute.xlu2 %2863 }
 0x349   : > { %v2473_v14 = vpop.f32.mrf.mxu2 }
 0x34a   : > { %v2474_v11 = vadd.f32 %v2473_v14, %v8732_v42  ;;  %v2562_v22 = vpop.f32.mrf.mxu3 }
 0x34b   : > { %3711 = vmatpush.bf16.msrb.mxu2 %v7306_v51  ;;  %v2298_v60 = vpop.f32.mrf.mxu0 }
 0x34c   : > { %v7416_v19 = vadd.f32 %v2562_v22, %v2474_v11  ;;  %v2299_v13 = vadd.f32 %v2298_v60, %v8735_v8  ;;  %v8741_v22 = vld [vmem:[#allocation24_spill] sm:$0xff] }
 0x34d   : > { %v2387_v47 = vpop.f32.mrf.mxu1 }
 0x34e   : > { %v7421_v15 = vadd.f32 %v2387_v47, %v2299_v13  ;;  %3189 = vmatmul.bf16.gmra.mxu0 %v7409_v38  ;;  %3367 = vmatmul.bf16.gmra.mxu2 %v7409_v38  ;;  %v7470_v47 = vpop.permute.xlu1 %2888  ;;  %v2666_v38 = vmax.f32 %v7383_v0, 0.0 }
 0x34f   : > { %3712 = vmatpush.bf16.msrb.mxu2 %v7289_v55  ;;  %3456 = vmatmul.bf16.gmra.mxu3 %v7414_v17  ;;  %8742 = vst [vmem:[#allocation23_spill] sm:$0xff] %v7470_v47  ;;  %v5069_v47 = vld [vmem:[%s5421_s24 + $0x88] sm:$0xf0] }
 0x350   : > { %3278 = vmatmul.bf16.gmra.mxu1 %v7414_v17  ;;  %v7438_v56 = vpop.permute.xlu2 %2878  ;;  %v5051_v17 = vld [vmem:[%s5421_s24 + $0x60] sm:$0xf] }
 0x351   : > { %v2476_v51 = vpop.f32.mrf.mxu2 }
 0x352   : > { %v2477_v52 = vadd.f32 %v2476_v51, %v8735_v8  ;;  %v2565_v61 = vpop.f32.mrf.mxu3  ;;  %v5035_v51 = vld [vmem:[%s5421_s24 + $0x40] sm:$0xf] }
 0x353   : > { %v2300_v63 = vpop.f32.mrf.mxu0 }
 0x354   : > { %v7431_v36 = vadd.f32 %v2565_v61, %v2477_v52  ;;  %v2301_v27 = vadd.f32 %v2300_v63, %v8736_v6  ;;  %v5186_v52 = vld [vmem:[%s5421_s24 + $0x44] sm:$0xf0]  ;;  %v5185_v61 = vld [vmem:[%s5421_s24 + $0x44] sm:$0xf]  ;;  %v5037_v63 = vld [vmem:[%s5421_s24 + $0x48] sm:$0xf0] }
 0x355   : > { %v2389_v55 = vpop.f32.mrf.mxu1  ;;  %v7479_v40 = vor.u32 %v5186_v52, %v5035_v51  ;;  %v5043_v52 = vld [vmem:[%s5421_s24 + $0x50] sm:$0xf] }
 0x356   : > { %v7436_v9 = vadd.f32 %v2389_v55, %v2301_v27 }
 0x357   : > { %8744 = vst [vmem:[#allocation10_spill] sm:$0xff] %v7479_v40 }
 0x358   : > { %v7462_v53 = vpop.permute.xlu2 %2893 }
 0x359   : > { %v2478_v48 = vpop.f32.mrf.mxu2  ;;  %8740 = vst [vmem:[#allocation5_spill] sm:$0xff] %v7462_v53 }
 0x35a   : > { %v2479_v32 = vadd.f32 %v2478_v48, %v8736_v6  ;;  %v2567_v2 = vpop.f32.mrf.mxu3  ;;  %v7476_v6 = vpop.permute.xlu0 %2898  ;;  %v7483_v48 = vor.u32 %v5185_v61, %v5037_v63  ;;  %v5188_v61 = vld [vmem:[%s5421_s24 + $0x54] sm:$0xf0]  ;;  %v5187_v63 = vld [vmem:[%s5421_s24 + $0x54] sm:$0xf] }
 0x35b   : > { %v2303_v5 = vpop.f32.mrf.mxu0  ;;  %8743 = vst [vmem:[#allocation9_spill] sm:$0xff] %v7476_v6 }
 0x35c   : > { %v7449_v18 = vadd.f32 %v2567_v2, %v2479_v32  ;;  %v2304_v4 = vadd.f32 %v2303_v5, %v8739_v3  ;;  %8746 = vst [vmem:[#allocation14_spill] sm:$0xff] %v7483_v48  ;;  %v8747_v2 = vld [vmem:[#allocation3_spill] sm:$0xff] }
 0x35d   : > { %v2392_v42 = vpop.f32.mrf.mxu1 }
 0x35e   : > { %v7454_v31 = vadd.f32 %v2392_v42, %v2304_v4  ;;  %3194 = vmatmul.bf16.gmra.mxu0 %v7445_v50  ;;  %3372 = vmatmul.bf16.gmra.mxu2 %v7445_v50  ;;  %v7494_v42 = vpop.permute.xlu1 %2903 }
 0x35f   : > { %3461 = vmatmul.bf16.gmra.mxu3 %v7447_v45  ;;  %8748 = vst [vmem:[#allocation15_spill] sm:$0xff] %v7494_v42 }
 0x360   : > { %3283 = vmatmul.bf16.gmra.mxu1 %v7447_v45  ;;  %v7481_v44 = vpop.permute.xlu2 %2908 }
 0x361   : > { %v2481_v37 = vpop.f32.mrf.mxu2  ;;  %8745 = vst [vmem:[#allocation11_spill] sm:$0xff] %v7481_v44 }
 0x362   : > { %v2482_v33 = vadd.f32 %v2481_v37, %v8739_v3  ;;  %v2570_v7 = vpop.f32.mrf.mxu3 }
 0x363   : > { %v2305_v14 = vpop.f32.mrf.mxu0 }
 0x364   : > { %v7465_v11 = vadd.f32 %v2570_v7, %v2482_v33  ;;  %v2306_v60 = vadd.f32 %v2305_v14, %v8741_v22  ;;  %v7497_v14 = vpop.permute.xlu0 %2913 }
 0x365   : > { %v2394_v8 = vpop.f32.mrf.mxu1  ;;  %8749 = vst [vmem:[#allocation40_spill] sm:$0xff] %v7497_v14 }
 0x366   : > { %v7468_v13 = vadd.f32 %v2394_v8, %v2306_v60 }
 0x368   : > { %v7503_v8 = vpop.permute.xlu2 %2923 }
 0x369   : > { %v2483_v27 = vpop.f32.mrf.mxu2  ;;  %8750 = vst [vmem:[#allocation13_spill] sm:$0xff] %v7503_v8  ;;  %v5191_v8 = vld [vmem:[%s5421_s24 + $0x74] sm:$0xf] }
 0x36a   : > { %v2484_v55 = vadd.f32 %v2483_v27, %v8741_v22  ;;  %v2572_v49 = vpop.f32.mrf.mxu3  ;;  %v5045_v27 = vld [vmem:[%s5421_s24 + $0x58] sm:$0xf0] }
 0x36b   : > { %v2308_v28 = vpop.f32.mrf.mxu0 }
 0x36c   : > { %v7485_v32 = vadd.f32 %v2572_v49, %v2484_v55  ;;  %v2309_v5 = vadd.f32 %v2308_v28, %v8747_v2  ;;  %v7515_v28 = vor.u32 %v5188_v61, %v5043_v52  ;;  %v2665_v61 = vmax.f32 %v7371_v41, 0.0  ;;  %v5053_v41 = vld [vmem:[%s5421_s24 + $0x68] sm:$0xf0] }
 0x36d   : > { %v2397_v3 = vpop.f32.mrf.mxu1 }
 0x36e   : > { %v7488_v4 = vadd.f32 %v2397_v3, %v2309_v5  ;;  %3199 = vmatmul.bf16.gmra.mxu0 %v7479_v40  ;;  %3377 = vmatmul.bf16.gmra.mxu2 %v7479_v40  ;;  %8751 = vst [vmem:[#allocation16_spill] sm:$0xff] %v7515_v28  ;;  %v7521_v3 = vor.u32 %v5187_v63, %v5045_v27 }
 0x36f   : > { %3466 = vmatmul.bf16.gmra.mxu3 %v7483_v48 }
 0x370   : > { %3288 = vmatmul.bf16.gmra.mxu1 %v7483_v48  ;;  %8753 = vst [vmem:[#allocation20_spill] sm:$0xff] %v7521_v3  ;;  %v2661_v48 = vmax.f32 %v7355_v58, 0.0  ;;  %v2662_v58 = vmax.f32 %v7367_v29, 0.0 }
 0x371   : > { %v2486_v37 = vpop.f32.mrf.mxu2 }
 0x372   : > { %v2487_v33 = vadd.f32 %v2486_v37, %v8747_v2  ;;  %v2575_v7 = vpop.f32.mrf.mxu3  ;;  %v7517_v2 = vpop.permute.xlu1 %2918  ;;  %v7545_v45 = vpack.c.bf16 %v2665_v61, %v2661_v48  ;;  %v7563_v61 = vor.u32 %v5189_v43, %v5053_v41 }
 0x373   : > { %v7499_v22 = vpop.f32.mrf.mxu0  ;;  %8752 = vst [vmem:[#allocation17_spill] sm:$0xff] %v7517_v2  ;;  %v7523_v37 = vpop.permute.xlu0 %2928 }
 0x374   : > { %v7501_v60 = vadd.f32 %v2575_v7, %v2487_v33  ;;  %8754 = vst [vmem:[#allocation22_spill] sm:$0xff] %v7523_v37  ;;  %v7529_v7 = vpop.permute.xlu2 %2938  ;;  %v5192_v37 = vld [vmem:[%s5421_s24 + $0x74] sm:$0xf0] }
 0x375   : > { %v7505_v51 = vpop.f32.mrf.mxu1  ;;  %8755 = vst [vmem:[#allocation8_spill] sm:$0xff] %v7529_v7 }
 0x376   : > { %8760 = vst [vmem:[#allocation31_spill] sm:$0xff] %v7563_v61 }
 0x379   : > { %v7511_v55 = vpop.f32.mrf.mxu2 }
 0x37a   : > { %v7513_v49 = vpop.f32.mrf.mxu3  ;;  %v7541_v40 = vpop.permute.xlu1 %2933 }
 0x37b   : > { %v7519_v5 = vpop.f32.mrf.mxu0  ;;  %8756 = vst [vmem:[#allocation18_spill] sm:$0xff] %v7541_v40  ;;  %v7547_v50 = vpop.permute.xlu0 %2943 }
 0x37c   : > { %8757 = vst [vmem:[#allocation12_spill] sm:$0xff] %v7547_v50  ;;  %v7554_v12 = vpop.permute.xlu2 %2953  ;;  %v7565_v50 = vpack.c.bf16 %v2666_v38, %v2662_v58  ;;  %v2673_v38 = vmax.f32 %v7400_v21, 0.0  ;;  %v2669_v58 = vmax.f32 %v7387_v1, 0.0 }
 0x37d   : > { %v7525_v33 = vpop.f32.mrf.mxu1  ;;  %8758 = vst [vmem:[#allocation36_spill] sm:$0xff] %v7554_v12 }
 0x37e   : > { %3204 = vmatmul.bf16.gmra.mxu0 %v7515_v28  ;;  %3382 = vmatmul.bf16.gmra.mxu2 %v7515_v28  ;;  %v7585_v12 = vpack.c.bf16 %v2673_v38, %v2669_v58 }
 0x37f   : > { %3471 = vmatmul.bf16.gmra.mxu3 %v7521_v3 }
 0x380   : > { %3293 = vmatmul.bf16.gmra.mxu1 %v7521_v3  ;;  %v5190_v3 = vld [vmem:[%s5421_s24 + $0x64] sm:$0xf0] }
 0x381   : > { %v7533_v52 = vpop.f32.mrf.mxu2  ;;  %v7561_v16 = vor.u32 %v5190_v3, %v5051_v17 }
 0x382   : > { %v7536_v63 = vpop.f32.mrf.mxu3  ;;  %v7571_v29 = vpop.permute.xlu1 %2948 }
 0x383   : > { %v7538_v27 = vpop.f32.mrf.mxu0  ;;  %8759 = vst [vmem:[#allocation21_spill] sm:$0xff] %v7561_v16  ;;  %v7575_v43 = vpop.permute.xlu0 %2958 }
 0x384   : > { %8761 = vst [vmem:[#allocation25_spill] sm:$0xff] %v7571_v29  ;;  %v7582_v3 = vpop.permute.xlu2 %2968  ;;  %v5059_v29 = vld [vmem:[%s5421_s24 + $0x70] sm:$0xf] }
 0x385   : > { %v7543_v28 = vpop.f32.mrf.mxu1  ;;  %8762 = vst [vmem:[#allocation4_spill] sm:$0xff] %v7575_v43  ;;  %v2674_v43 = vmax.f32 %v7416_v19, 0.0  ;;  %v7594_v44 = vor.u32 %v5192_v37, %v5059_v29  ;;  %v2681_v19 = vmax.f32 %v7436_v9, 0.0  ;;  %v2690_v37 = vmax.f32 %v7485_v32, 0.0 }
 0x386   : > { %8763 = vst [vmem:[#allocation39_spill] sm:$0xff] %v7582_v3  ;;  %v2670_v3 = vmax.f32 %v7396_v35, 0.0  ;;  %v2685_v35 = vmax.f32 %v7454_v31, 0.0  ;;  %v2677_v29 = vmax.f32 %v7421_v15, 0.0 }
 0x387   : > { %8765 = vst [vmem:[#allocation42_spill] sm:$0xff] %v7594_v44 }
 0x388   : > { %v7603_v53 = vpack.c.bf16 %v2674_v43, %v2670_v3 }
 0x389   : > { %v7556_v7 = vpop.f32.mrf.mxu2 }
 0x38a   : > { %v7559_v10 = vpop.f32.mrf.mxu3  ;;  %v7591_v2 = vpop.permute.xlu1 %2963 }
 0x38b   : > { %v2318_v48 = vpop.f32.mrf.mxu0  ;;  %8764 = vst [vmem:[#allocation43_spill] sm:$0xff] %v7591_v2  ;;  %v7596_v42 = vpop.permute.xlu0 %2973  ;;  %v2689_v2 = vmax.f32 %v7468_v13, 0.0 }
 0x38c   : > { %8766 = vst [vmem:[#allocation44_spill] sm:$0xff] %v7596_v42  ;;  %v7601_v38 = vpop.permute.xlu2 %2983  ;;  %v2319_v15 = vadd.f32 %v2318_v48, %v8697_v46 }
 0x38d   : > { %v7567_v40 = vpop.f32.mrf.mxu1  ;;  %8768 = vst [vmem:[#allocation30_spill] sm:$0xff] %v7601_v38  ;;  %v7615_v43 = vpack.c.bf16 %v2689_v2, %v2685_v35  ;;  %v7622_v38 = vpack.c.bf16 %v2681_v19, %v2677_v29  ;;  %v2316_v19 = vadd.f32 %v7538_v27, %v8698_v39 }
 0x38e   : > { %3209 = vmatmul.bf16.gmra.mxu0 %v7561_v16  ;;  %3387 = vmatmul.bf16.gmra.mxu2 %v7561_v16 }
 0x38f   : > { %3476 = vmatmul.bf16.gmra.mxu3 %v7563_v61 }
 0x390   : > { %3298 = vmatmul.bf16.gmra.mxu1 %v7563_v61  ;;  %v5061_v61 = vld [vmem:[%s5421_s24 + $0x78] sm:$0xf0] }
 0x391   : > { %v7577_v0 = vpop.f32.mrf.mxu2  ;;  %v7599_v6 = vor.u32 %v5191_v8, %v5061_v61 }
 0x392   : > { %v7580_v17 = vpop.f32.mrf.mxu3  ;;  %v7617_v3 = vpop.permute.xlu1 %2978 }
 0x393   : > { %v2320_v41 = vpop.f32.mrf.mxu0  ;;  %8767 = vst [vmem:[#allocation38_spill] sm:$0xff] %v7599_v6  ;;  %v7624_v32 = vpop.permute.xlu0 %2988 }
 0x394   : > { %8769 = vst [vmem:[#allocation45_spill] sm:$0xff] %v7617_v3  ;;  %v2321_v9 = vadd.f32 %v2320_v41, %v8695_v30  ;;  %v7630_v3 = vpop.permute.xlu2 %2998 }
 0x395   : > { %v2409_v16 = vpop.f32.mrf.mxu1  ;;  %8770 = vst [vmem:[#allocation46_spill] sm:$0xff] %v7624_v32  ;;  %v5194_v32 = vld [vmem:[%s5421_s24 + $0x84] sm:$0xf0] }
 0x396   : > { %v2410_v29 = vadd.f32 %v2409_v16, %v2321_v9 }
 0x399   : > { %v2498_v14 = vpop.f32.mrf.mxu2 }
 0x39a   : > { %v2587_v21 = vpop.f32.mrf.mxu3  ;;  %v2499_v48 = vadd.f32 %v2498_v14, %v8695_v30 }
 0x39b   : > { %v2323_v1 = vpop.f32.mrf.mxu0 }
 0x39c   : > { %v2324_v8 = vadd.f32 %v2323_v1, %v8694_v62 }
 0x39d   : > { %v2412_v58 = vpop.f32.mrf.mxu1 }
 0x39e   : > { %3214 = vmatmul.bf16.gmra.mxu0 %v7594_v44  ;;  %3392 = vmatmul.bf16.gmra.mxu2 %v7594_v44  ;;  %v2686_v44 = vmax.f32 %v7465_v11, 0.0  ;;  %v2413_v1 = vadd.f32 %v2412_v58, %v2324_v8  ;;  %v2678_v58 = vmax.f32 %v7431_v36, 0.0  ;;  %v2682_v8 = vmax.f32 %v7449_v18, 0.0 }
 0x39f   : > { %3481 = vmatmul.bf16.gmra.mxu3 %v7599_v6  ;;  %v2314_v36 = vadd.f32 %v7519_v5, %v8699_v24  ;;  %v2408_v18 = vadd.f32 %v7567_v40, %v2319_v15  ;;  %v2588_v40 = vadd.f32 %v2587_v21, %v2499_v48 }
 0x3a0   : > { %3303 = vmatmul.bf16.gmra.mxu1 %v7599_v6  ;;  %v7627_v35 = vpack.c.bf16 %v2690_v37, %v2686_v44  ;;  %v2717_v42 = vmax.f32 %v2413_v1, 0.0  ;;  %v5193_v37 = vld [vmem:[%s5421_s24 + $0x84] sm:$0xf]  ;;  %v2405_v1 = vadd.f32 %v7543_v28, %v2316_v19  ;;  %v2492_v28 = vadd.f32 %v7533_v52, %v8699_v24 }
 0x3a1   : > { %v2501_v61 = vpop.f32.mrf.mxu2  ;;  %v2714_v52 = vmax.f32 %v2588_v40, 0.0 }
 0x3a2   : > { %v2590_v13 = vpop.f32.mrf.mxu3  ;;  %v2502_v11 = vadd.f32 %v2501_v61, %v8694_v62  ;;  %v2311_v62 = vadd.f32 %v7499_v22, %v8700_v25  ;;  %v2494_v22 = vadd.f32 %v7556_v7, %v8698_v39 }
 0x3a3   : > { %v2325_v31 = vpop.f32.mrf.mxu0 }
 0x3a4   : > { %v2326_v6 = vadd.f32 %v2325_v31, %v8696_v23  ;;  %v5067_v31 = vld [vmem:[%s5421_s24 + $0x80] sm:$0xf]  ;;  %v2591_v27 = vadd.f32 %v2590_v13, %v2502_v11  ;;  %v2709_v13 = vmax.f32 %v2408_v18, 0.0  ;;  %v7667_v11 = vpop.permute.xlu0 %3003  ;;  %v2583_v24 = vadd.f32 %v7559_v10, %v2494_v22 }
 0x3a5   : > { %v2414_v2 = vpop.f32.mrf.mxu1  ;;  %v7649_v9 = vor.u32 %v5194_v32, %v5067_v31  ;;  %v2489_v31 = vadd.f32 %v7511_v55, %v8700_v25 }
 0x3a6   : > { %v2415_v41 = vadd.f32 %v2414_v2, %v2326_v6  ;;  %v2497_v6 = vadd.f32 %v7577_v0, %v8697_v46  ;;  %v2713_v2 = vmax.f32 %v2410_v29, 0.0  ;;  %v2403_v0 = vadd.f32 %v7525_v33, %v2314_v36  ;;  %v7673_v29 = vpop.permute.xlu2 %4045 }
 0x3a8   : > { %v2721_v44 = vmax.f32 %v2415_v41, 0.0  ;;  %v7654_v41 = vor.u32 %v5193_v37, %v5069_v47  ;;  %v2586_v7 = vadd.f32 %v7580_v17, %v2497_v6  ;;  %v2718_v47 = vmax.f32 %v2591_v27, 0.0 }
 0x3a9   : > { %v2503_v16 = vpop.f32.mrf.mxu2  ;;  %v2813_v33 = vpack.c.bf16 %v2713_v2, %v2709_v13  ;;  %v2701_v48 = vmax.f32 %v2403_v0, 0.0  ;;  %v2706_v27 = vmax.f32 %v2583_v24, 0.0 }
 0x3aa   : > { %v2817_v61 = vpack.c.bf16 %v2721_v44, %v2717_v42  ;;  %v2504_v30 = vadd.f32 %v2503_v16, %v8696_v23  ;;  %v2592_v14 = vpop.f32.mrf.mxu3  ;;  %v7657_v42 = vpack.c.bf16 %v2682_v8, %v2678_v58  ;;  %v7659_v23 = vpop.permute.xlu1 %2993  ;;  %v2400_v58 = vadd.f32 %v7505_v51, %v2311_v62 }
 0x3ab   : > { %v3180_v5 = vpop.f32.mrf.mxu0  ;;  %v2705_v8 = vmax.f32 %v2405_v1, 0.0  ;;  %v2581_v51 = vadd.f32 %v7536_v63, %v2492_v28  ;;  %v2710_v37 = vmax.f32 %v2586_v7, 0.0  ;;  %v2578_v63 = vadd.f32 %v7513_v49, %v2489_v31  ;;  %v5195_v7 = vld [vmem:[%s5421_s24 + $0x94] sm:$0xf] }
 0x3ac   : > { %v2593_v15 = vadd.f32 %v2592_v14, %v2504_v30  ;;  %v3181_v46 = vadd.f32 %v3180_v5, %v7411_v59  ;;  %3616 = vmatpush.bf16.msrb.mxu1 %v2817_v61  ;;  %v2697_v18 = vmax.f32 %v2400_v58, 0.0  ;;  %v2693_v30 = vmax.f32 %v7488_v4, 0.0  ;;  %v7688_v4 = vpop.permute.xlu0 %4050 }
 0x3ad   : > { %v3269_v39 = vpop.f32.mrf.mxu1  ;;  %v2809_v16 = vpack.c.bf16 %v2705_v8, %v2701_v48  ;;  %v2814_v61 = vpack.c.bf16 %v2714_v52, %v2710_v37  ;;  %v2702_v1 = vmax.f32 %v2581_v51, 0.0  ;;  %v2698_v49 = vmax.f32 %v2578_v63, 0.0 }
 0x3ae   : > { %v2722_v32 = vmax.f32 %v2593_v15, 0.0  ;;  %v3270_v21 = vadd.f32 %v3269_v39, %v3181_v46  ;;  %3219 = vmatmul.bf16.gmra.mxu0 %v7649_v9  ;;  %3397 = vmatmul.bf16.gmra.mxu2 %v7649_v9  ;;  %v2805_v40 = vpack.c.bf16 %v2697_v18, %v2693_v30  ;;  %v5075_v15 = vld [vmem:[%s5421_s24 + $0x90] sm:$0xf]  ;;  %v5196_v46 = vld [vmem:[%s5421_s24 + $0x94] sm:$0xf0] }
 0x3af   : > { %3486 = vmatmul.bf16.gmra.mxu3 %v7654_v41  ;;  %v2810_v13 = vpack.c.bf16 %v2706_v27, %v2702_v1  ;;  %v7694_v8 = vor.u32 %v5196_v46, %v5075_v15  ;;  %v5198_v1 = vld [vmem:[%s5421_s24 + $0xa4] sm:$0xf0]  ;;  %v5197_v15 = vld [vmem:[%s5421_s24 + $0xa4] sm:$0xf]  ;;  %v5085_v46 = vld [vmem:[%s5421_s24 + $0xa8] sm:$0xf0] }
 0x3b0   : > { %v2818_v19 = vpack.c.bf16 %v2722_v32, %v2718_v47  ;;  %v3883_v17 = vmax.f32 %v3270_v21, 0.0  ;;  %3308 = vmatmul.bf16.gmra.mxu1 %v7654_v41  ;;  %v5077_v47 = vld [vmem:[%s5421_s24 + $0x98] sm:$0xf0] }
 0x3b1   : > { %3617 = vmatpush.bf16.msrb.mxu1 %v2813_v33  ;;  %v3358_v44 = vpop.f32.mrf.mxu2  ;;  %v2694_v33 = vmax.f32 %v7501_v60, 0.0  ;;  %v7698_v31 = vor.u32 %v5195_v7, %v5077_v47 }
 0x3b2   : > { %v4203_v62 = vmul.f32 %v7673_v29, %v3883_v17  ;;  %v3359_v10 = vadd.f32 %v3358_v44, %v7411_v59  ;;  %3794 = vmatpush.bf16.msrb.mxu3 %v2818_v19  ;;  %v3447_v36 = vpop.f32.mrf.mxu3  ;;  %v7683_v5 = vpop.permute.xlu1 %3008 }
 0x3b3   : > { %v3182_v6 = vpop.f32.mrf.mxu0  ;;  %v2806_v44 = vpack.c.bf16 %v2698_v49, %v2694_v33 }
 0x3b4   : > { %v3183_v25 = vadd.f32 %v3182_v6, %v7429_v34  ;;  %v3448_v55 = vadd.f32 %v3447_v36, %v3359_v10 }
 0x3b5   : > { %3618 = vmatpush.bf16.msrb.mxu1 %v2809_v16  ;;  %v3271_v14 = vpop.f32.mrf.mxu1 }
 0x3b6   : > { %v3884_v22 = vmax.f32 %v3448_v55, 0.0  ;;  %v3272_v2 = vadd.f32 %v3271_v14, %v3183_v25  ;;  %3795 = vmatpush.bf16.msrb.mxu3 %v2814_v61  ;;  %v5083_v14 = vld [vmem:[%s5421_s24 + $0xa0] sm:$0xf] }
 0x3b7   : > { %v7725_v49 = vor.u32 %v5198_v1, %v5083_v14 }
 0x3b8   : > { %v4204_v0 = vmul.f32 %v7673_v29, %v3884_v22  ;;  %v3887_v28 = vmax.f32 %v3272_v2, 0.0 }
 0x3b9   : > { %3619 = vmatpush.bf16.msrb.mxu1 %v2805_v40  ;;  %v3360_v39 = vpop.f32.mrf.mxu2 }
 0x3ba   : > { %v4207_v32 = vmul.f32 %v7688_v4, %v3887_v28  ;;  %v3361_v21 = vadd.f32 %v3360_v39, %v7429_v34  ;;  %3796 = vmatpush.bf16.msrb.mxu3 %v2810_v13  ;;  %v3449_v58 = vpop.f32.mrf.mxu3 }
 0x3bb   : > { %v3185_v24 = vpop.f32.mrf.mxu0 }
 0x3bc   : > { %v4332_v52 = vadd.f32 %v4207_v32, %v4203_v62  ;;  %v3186_v19 = vadd.f32 %v3185_v24, %v7419_v57  ;;  %v3450_v17 = vadd.f32 %v3449_v58, %v3361_v21  ;;  %v7706_v62 = vpop.permute.xlu1 %4055  ;;  %v7729_v32 = vor.u32 %v5197_v15, %v5085_v46 }
 0x3bd   : > { %3620 = vmatpush.bf16.msrb.mxu1 %v7615_v43  ;;  %v3274_v48 = vpop.f32.mrf.mxu1 }
 0x3be   : > { %v3888_v51 = vmax.f32 %v3450_v17, 0.0  ;;  %v3275_v37 = vadd.f32 %v3274_v48, %v3186_v19  ;;  %3224 = vmatmul.bf16.gmra.mxu0 %v7694_v8  ;;  %3402 = vmatmul.bf16.gmra.mxu2 %v7694_v8 }
 0x3bf   : > { %3797 = vmatpush.bf16.msrb.mxu3 %v2806_v44 }
 0x3c0   : > { %v4208_v60 = vmul.f32 %v7688_v4, %v3888_v51  ;;  %v3891_v10 = vmax.f32 %v3275_v37, 0.0  ;;  %3313 = vmatmul.bf16.gmra.mxu1 %v7698_v31  ;;  %3491 = vmatmul.bf16.gmra.mxu3 %v7698_v31 }
 0x3c1   : > { %3621 = vmatpush.bf16.msrb.mxu1 %v7622_v38  ;;  %v3363_v43 = vpop.f32.mrf.mxu2 }
 0x3c2   : > { %v4345_v36 = vadd.f32 %v4208_v60, %v4204_v0  ;;  %v4211_v18 = vmul.f32 %v7706_v62, %v3891_v10  ;;  %v3364_v6 = vadd.f32 %v3363_v43, %v7419_v57  ;;  %v3452_v16 = vpop.f32.mrf.mxu3 }
 0x3c3   : > { %3798 = vmatpush.bf16.msrb.mxu3 %v7627_v35  ;;  %v3187_v27 = vpop.f32.mrf.mxu0  ;;  %v7718_v35 = vpop.permute.xlu2 %4060 }
 0x3c4   : > { %v4333_v25 = vadd.f32 %v4332_v52, %v4211_v18  ;;  %v3188_v55 = vadd.f32 %v3187_v27, %v7434_v54  ;;  %v3453_v61 = vadd.f32 %v3452_v16, %v3364_v6  ;;  %v7741_v51 = vpop.permute.xlu1 %4070  ;;  %v5091_v6 = vld [vmem:[%s5421_s24 + $0xb0] sm:$0xf]  ;;  %v5200_v16 = vld [vmem:[%s5421_s24 + $0xb4] sm:$0xf0] }
 0x3c5   : > { %3622 = vmatpush.bf16.msrb.mxu1 %v7585_v12  ;;  %v3276_v38 = vpop.f32.mrf.mxu1 }
 0x3c6   : > { %v3892_v30 = vmax.f32 %v3453_v61, 0.0  ;;  %v3277_v63 = vadd.f32 %v3276_v38, %v3188_v55  ;;  %v5199_v61 = vld [vmem:[%s5421_s24 + $0xb4] sm:$0xf]  ;;  %v5093_v38 = vld [vmem:[%s5421_s24 + $0xb8] sm:$0xf0] }
 0x3c7   : > { %3799 = vmatpush.bf16.msrb.mxu3 %v7657_v42 }
 0x3c8   : > { %v4212_v22 = vmul.f32 %v7706_v62, %v3892_v30  ;;  %v3895_v2 = vmax.f32 %v3277_v63, 0.0 }
 0x3c9   : > { %3623 = vmatpush.bf16.msrb.mxu1 %v7545_v45  ;;  %v3365_v40 = vpop.f32.mrf.mxu2 }
 0x3ca   : > { %v4346_v0 = vadd.f32 %v4345_v36, %v4212_v22  ;;  %v4215_v12 = vmul.f32 %v7718_v35, %v3895_v2  ;;  %v3366_v28 = vadd.f32 %v3365_v40, %v7434_v54  ;;  %v3454_v13 = vpop.f32.mrf.mxu3  ;;  %v7751_v22 = vor.u32 %v5200_v16, %v5091_v6 }
 0x3cb   : > { %3800 = vmatpush.bf16.msrb.mxu3 %v7603_v53  ;;  %v3190_v42 = vpop.f32.mrf.mxu0  ;;  %v7737_v53 = vpop.permute.xlu0 %4065 }
 0x3cc   : > { %v4334_v39 = vadd.f32 %v4333_v25, %v4215_v12  ;;  %v3191_v7 = vadd.f32 %v3190_v42, %v7452_v20  ;;  %v3455_v47 = vadd.f32 %v3454_v13, %v3366_v28  ;;  %v7756_v28 = vpop.permute.xlu1 %4085 }
 0x3cd   : > { %v3279_v45 = vpop.f32.mrf.mxu1  ;;  %8771 = vst [vmem:[#allocation34_spill] sm:$0xff] %v7756_v28 }
 0x3ce   : > { %v3896_v21 = vmax.f32 %v3455_v47, 0.0  ;;  %v3280_v58 = vadd.f32 %v3279_v45, %v3191_v7  ;;  %3229 = vmatmul.bf16.gmra.mxu0 %v7725_v49  ;;  %3407 = vmatmul.bf16.gmra.mxu2 %v7725_v49  ;;  %v7763_v47 = vpop.permute.xlu2 %4075 }
 0x3cf   : > { %3801 = vmatpush.bf16.msrb.mxu3 %v7565_v50 }
 0x3d0   : > { %v4216_v33 = vmul.f32 %v7718_v35, %v3896_v21  ;;  %v3899_v24 = vmax.f32 %v3280_v58, 0.0  ;;  %3318 = vmatmul.bf16.gmra.mxu1 %v7729_v32  ;;  %3496 = vmatmul.bf16.gmra.mxu3 %v7729_v32 }
 0x3d1   : > { %v3368_v52 = vpop.f32.mrf.mxu2 }
 0x3d2   : > { %v4347_v19 = vadd.f32 %v4346_v0, %v4216_v33  ;;  %v4219_v17 = vmul.f32 %v7737_v53, %v3899_v24  ;;  %v3369_v48 = vadd.f32 %v3368_v52, %v7452_v20  ;;  %v3457_v50 = vpop.f32.mrf.mxu3  ;;  %v7754_v0 = vor.u32 %v5199_v61, %v5093_v38  ;;  %v5099_v38 = vld [vmem:[%s5421_s24 + $0xc0] sm:$0xf] }
 0x3d3   : > { %v3192_v44 = vpop.f32.mrf.mxu0 }
 0x3d4   : > { %v4335_v37 = vadd.f32 %v4334_v39, %v4219_v17  ;;  %v3193_v60 = vadd.f32 %v3192_v44, %v7438_v56  ;;  %v3458_v10 = vadd.f32 %v3457_v50, %v3369_v48  ;;  %v8772_v17 = vld [vmem:[#allocation23_spill] sm:$0xff] }
 0x3d5   : > { %v3281_v43 = vpop.f32.mrf.mxu1 }
 0x3d6   : > { %v3900_v36 = vmax.f32 %v3458_v10, 0.0  ;;  %v3282_v18 = vadd.f32 %v3281_v43, %v3193_v60  ;;  %v7768_v10 = vpop.permute.xlu1 %4100 }
 0x3d7   : > { %8773 = vst [vmem:[#allocation33_spill] sm:$0xff] %v7768_v10 }
 0x3d8   : > { %v4220_v27 = vmul.f32 %v7737_v53, %v3900_v36  ;;  %v3903_v25 = vmax.f32 %v3282_v18, 0.0  ;;  %v7771_v18 = vpop.permute.xlu0 %4080 }
 0x3d9   : > { %v3370_v55 = vpop.f32.mrf.mxu2 }
 0x3da   : > { %v4348_v30 = vadd.f32 %v4347_v19, %v4220_v27  ;;  %v4223_v63 = vmul.f32 %v7741_v51, %v3903_v25  ;;  %v3371_v14 = vadd.f32 %v3370_v55, %v7438_v56  ;;  %v3459_v1 = vpop.f32.mrf.mxu3 }
 0x3db   : > { %v3195_v2 = vpop.f32.mrf.mxu0 }
 0x3dc   : > { %v4336_v40 = vadd.f32 %v4335_v37, %v4223_v63  ;;  %v3196_v15 = vadd.f32 %v3195_v2, %v7458_v26  ;;  %v3460_v46 = vadd.f32 %v3459_v1, %v3371_v14  ;;  %v5201_v63 = vld [vmem:[%s5421_s24 + $0xc4] sm:$0xf]  ;;  %v8774_v1 = vld [vmem:[#allocation5_spill] sm:$0xff] }
 0x3dd   : > { %v3284_v12 = vpop.f32.mrf.mxu1 }
 0x3de   : > { %v3904_v13 = vmax.f32 %v3460_v46, 0.0  ;;  %v3285_v42 = vadd.f32 %v3284_v12, %v3196_v15  ;;  %3234 = vmatmul.bf16.gmra.mxu0 %v7751_v22  ;;  %3412 = vmatmul.bf16.gmra.mxu2 %v7751_v22  ;;  %v5101_v46 = vld [vmem:[%s5421_s24 + $0xc8] sm:$0xf0] }
 0x3e0   : > { %v4224_v39 = vmul.f32 %v7741_v51, %v3904_v13  ;;  %v3907_v7 = vmax.f32 %v3285_v42, 0.0  ;;  %3323 = vmatmul.bf16.gmra.mxu1 %v7754_v0  ;;  %3501 = vmatmul.bf16.gmra.mxu3 %v7754_v0  ;;  %v7784_v13 = vor.u32 %v5201_v63, %v5101_v46 }
 0x3e1   : > { %v3373_v45 = vpop.f32.mrf.mxu2 }
 0x3e2   : > { %v4349_v21 = vadd.f32 %v4348_v30, %v4224_v39  ;;  %v4227_v58 = vmul.f32 %v7763_v47, %v3907_v7  ;;  %v3374_v33 = vadd.f32 %v3373_v45, %v7458_v26  ;;  %v3462_v24 = vpop.f32.mrf.mxu3  ;;  %v5202_v30 = vld [vmem:[%s5421_s24 + $0xc4] sm:$0xf0] }
 0x3e3   : > { %v3197_v52 = vpop.f32.mrf.mxu0  ;;  %v7781_v15 = vor.u32 %v5202_v30, %v5099_v38 }
 0x3e4   : > { %v4337_v19 = vadd.f32 %v4336_v40, %v4227_v58  ;;  %v3198_v48 = vadd.f32 %v3197_v52, %v8772_v17  ;;  %v3463_v50 = vadd.f32 %v3462_v24, %v3374_v33 }
 0x3e5   : > { %v3286_v44 = vpop.f32.mrf.mxu1 }
 0x3e6   : > { %v3908_v37 = vmax.f32 %v3463_v50, 0.0  ;;  %v3287_v60 = vadd.f32 %v3286_v44, %v3198_v48 }
 0x3e8   : > { %v4228_v43 = vmul.f32 %v7763_v47, %v3908_v37  ;;  %v3911_v36 = vmax.f32 %v3287_v60, 0.0 }
 0x3e9   : > { %v3375_v6 = vpop.f32.mrf.mxu2 }
 0x3ea   : > { %v4350_v16 = vadd.f32 %v4349_v21, %v4228_v43  ;;  %v4231_v27 = vmul.f32 %v7771_v18, %v3911_v36  ;;  %v3376_v25 = vadd.f32 %v3375_v6, %v8772_v17  ;;  %v3464_v55 = vpop.f32.mrf.mxu3  ;;  %v7791_v21 = vpop.permute.xlu1 %4115  ;;  %v5107_v43 = vld [vmem:[%s5421_s24 + $0xd0] sm:$0xf]  ;;  %v5204_v36 = vld [vmem:[%s5421_s24 + $0xd4] sm:$0xf0] }
 0x3eb   : > { %v3200_v61 = vpop.f32.mrf.mxu0  ;;  %8775 = vst [vmem:[#allocation47_spill] sm:$0xff] %v7791_v21 }
 0x3ec   : > { %v7778_v14 = vadd.f32 %v4337_v19, %v4231_v27  ;;  %v3201_v2 = vadd.f32 %v3200_v61, %v8774_v1  ;;  %v3465_v40 = vadd.f32 %v3464_v55, %v3376_v25  ;;  %v8776_v19 = vld [vmem:[#allocation9_spill] sm:$0xff]  ;;  %v7799_v27 = vpop.permute.xlu2 %4090  ;;  %v5109_v61 = vld [vmem:[%s5421_s24 + $0xd8] sm:$0xf0] }
 0x3ed   : > { %v3289_v12 = vpop.f32.mrf.mxu1  ;;  %8777 = vst [vmem:[#allocation48_spill] sm:$0xff] %v7799_v27  ;;  %v5203_v55 = vld [vmem:[%s5421_s24 + $0xd4] sm:$0xf] }
 0x3ee   : > { %v3912_v42 = vmax.f32 %v3465_v40, 0.0  ;;  %v3290_v39 = vadd.f32 %v3289_v12, %v3201_v2  ;;  %3239 = vmatmul.bf16.gmra.mxu0 %v7781_v15  ;;  %3417 = vmatmul.bf16.gmra.mxu2 %v7781_v15  ;;  %v7806_v2 = vor.u32 %v5204_v36, %v5107_v43 }
 0x3f0   : > { %v4232_v7 = vmul.f32 %v7771_v18, %v3912_v42  ;;  %3328 = vmatmul.bf16.gmra.mxu1 %v7784_v13  ;;  %3506 = vmatmul.bf16.gmra.mxu3 %v7784_v13  ;;  %v3915_v37 = vmax.f32 %v3290_v39, 0.0  ;;  %8778 = vst [vmem:[#allocation49_spill] sm:$0xff] %v7806_v2  ;;  %v8780_v42 = vld [vmem:[#allocation15_spill] sm:$0xff] }
 0x3f1   : > { %v3378_v45 = vpop.f32.mrf.mxu2 }
 0x3f2   : > { %v7793_v58 = vadd.f32 %v4350_v16, %v4232_v7  ;;  %v3379_v33 = vadd.f32 %v3378_v45, %v8774_v1  ;;  %v3467_v24 = vpop.f32.mrf.mxu3  ;;  %v4235_v16 = vmul.f32 %v7756_v28, %v3915_v37  ;;  %v7808_v46 = vpop.permute.xlu1 %4130  ;;  %v7811_v7 = vor.u32 %v5203_v55, %v5109_v61 }
 0x3f3   : > { %v3202_v52 = vpop.f32.mrf.mxu0  ;;  %8779 = vst [vmem:[#allocation50_spill] sm:$0xff] %v7808_v46  ;;  %v7817_v37 = vpop.permute.xlu0 %4095 }
 0x3f4   : > { %v3203_v48 = vadd.f32 %v3202_v52, %v8776_v19  ;;  %v3468_v50 = vadd.f32 %v3467_v24, %v3379_v33  ;;  %8781 = vst [vmem:[#allocation51_spill] sm:$0xff] %v7811_v7 }
 0x3f5   : > { %v3291_v44 = vpop.f32.mrf.mxu1  ;;  %8782 = vst [vmem:[#allocation52_spill] sm:$0xff] %v7817_v37 }
 0x3f6   : > { %v3292_v60 = vadd.f32 %v3291_v44, %v3203_v48  ;;  %v3916_v45 = vmax.f32 %v3468_v50, 0.0 }
 0x3f8   : > { %v3919_v6 = vmax.f32 %v3292_v60, 0.0  ;;  %v4236_v60 = vmul.f32 %v7756_v28, %v3916_v45 }
 0x3f9   : > { %v3380_v25 = vpop.f32.mrf.mxu2 }
 0x3fa   : > { %v4239_v38 = vmul.f32 %v7799_v27, %v3919_v6  ;;  %v3381_v30 = vadd.f32 %v3380_v25, %v8776_v19  ;;  %v3469_v63 = vpop.f32.mrf.mxu3 }
 0x3fb   : > { %v3205_v40 = vpop.f32.mrf.mxu0 }
 0x3fc   : > { %v4406_v12 = vadd.f32 %v4239_v38, %v4235_v16  ;;  %v3206_v39 = vadd.f32 %v3205_v40, %v8780_v42  ;;  %v3470_v33 = vadd.f32 %v3469_v63, %v3381_v30  ;;  %v8783_v38 = vld [vmem:[#allocation11_spill] sm:$0xff] }
 0x3fd   : > { %v3294_v24 = vpop.f32.mrf.mxu1 }
 0x3fe   : > { %v3295_v52 = vadd.f32 %v3294_v24, %v3206_v39  ;;  %3244 = vmatmul.bf16.gmra.mxu0 %v7806_v2  ;;  %3422 = vmatmul.bf16.gmra.mxu2 %v7806_v2  ;;  %v3920_v48 = vmax.f32 %v3470_v33, 0.0  ;;  %v7824_v39 = vpop.permute.xlu1 %4165  ;;  %v5115_v24 = vld [vmem:[%s5421_s24 + $0xe0] sm:$0xf]  ;;  %v5117_v2 = vld [vmem:[%s5421_s24 + $0xe8] sm:$0xf0] }
 0x3ff   : > { %8784 = vst [vmem:[#allocation53_spill] sm:$0xff] %v7824_v39 }
 0x400   : > { %v3923_v44 = vmax.f32 %v3295_v52, 0.0  ;;  %3333 = vmatmul.bf16.gmra.mxu1 %v7811_v7  ;;  %3511 = vmatmul.bf16.gmra.mxu3 %v7811_v7  ;;  %v4240_v50 = vmul.f32 %v7799_v27, %v3920_v48  ;;  %v5206_v52 = vld [vmem:[%s5421_s24 + $0xe4] sm:$0xf0]  ;;  %v5205_v7 = vld [vmem:[%s5421_s24 + $0xe4] sm:$0xf] }
 0x401   : > { %v3383_v43 = vpop.f32.mrf.mxu2 }
 0x402   : > { %v4243_v36 = vmul.f32 %v7817_v37, %v3923_v44  ;;  %v3384_v6 = vadd.f32 %v3383_v43, %v8780_v42  ;;  %v3472_v25 = vpop.f32.mrf.mxu3  ;;  %v4419_v55 = vadd.f32 %v4240_v50, %v4236_v60 }
 0x403   : > { %v3207_v61 = vpop.f32.mrf.mxu0 }
 0x404   : > { %v4407_v16 = vadd.f32 %v4406_v12, %v4243_v36  ;;  %v3208_v30 = vadd.f32 %v3207_v61, %v8783_v38  ;;  %v3473_v63 = vadd.f32 %v3472_v25, %v3384_v6  ;;  %v7833_v36 = vor.u32 %v5206_v52, %v5115_v24  ;;  %v8786_v61 = vld [vmem:[#allocation40_spill] sm:$0xff] }
 0x405   : > { %v3296_v40 = vpop.f32.mrf.mxu1 }
 0x406   : > { %v3924_v45 = vmax.f32 %v3473_v63, 0.0  ;;  %v3297_v33 = vadd.f32 %v3296_v40, %v3208_v30  ;;  %8785 = vst [vmem:[#allocation54_spill] sm:$0xff] %v7833_v36  ;;  %v7836_v40 = vor.u32 %v5205_v7, %v5117_v2  ;;  %v7845_v2 = vpop.permute.xlu2 %4105 }
 0x407   : > { %8789 = vst [vmem:[#allocation59_spill] sm:$0xff] %v7845_v2 }
 0x408   : > { %v4244_v48 = vmul.f32 %v7817_v37, %v3924_v45  ;;  %v3927_v44 = vmax.f32 %v3297_v33, 0.0  ;;  %8787 = vst [vmem:[#allocation28_spill] sm:$0xff] %v7836_v40 }
 0x409   : > { %v3385_v43 = vpop.f32.mrf.mxu2 }
 0x40a   : > { %v4420_v42 = vadd.f32 %v4419_v55, %v4244_v48  ;;  %v4247_v60 = vmul.f32 %v7768_v10, %v3927_v44  ;;  %v3386_v12 = vadd.f32 %v3385_v43, %v8783_v38  ;;  %v3474_v50 = vpop.f32.mrf.mxu3  ;;  %v7840_v55 = vpop.permute.xlu1 %4145 }
 0x40b   : > { %v3210_v6 = vpop.f32.mrf.mxu0  ;;  %8788 = vst [vmem:[#allocation57_spill] sm:$0xff] %v7840_v55 }
 0x40c   : > { %v4408_v25 = vadd.f32 %v4407_v16, %v4247_v60  ;;  %v3211_v30 = vadd.f32 %v3210_v6, %v8786_v61  ;;  %v3475_v63 = vadd.f32 %v3474_v50, %v3386_v12 }
 0x40d   : > { %v3299_v45 = vpop.f32.mrf.mxu1 }
 0x40e   : > { %v3928_v33 = vmax.f32 %v3475_v63, 0.0  ;;  %v3300_v37 = vadd.f32 %v3299_v45, %v3211_v30  ;;  %3249 = vmatmul.bf16.gmra.mxu0 %v7833_v36  ;;  %3427 = vmatmul.bf16.gmra.mxu2 %v7833_v36 }
 0x410   : > { %v4248_v48 = vmul.f32 %v7768_v10, %v3928_v33  ;;  %v3931_v24 = vmax.f32 %v3300_v37, 0.0  ;;  %3338 = vmatmul.bf16.gmra.mxu1 %v7836_v40  ;;  %3516 = vmatmul.bf16.gmra.mxu3 %v7836_v40  ;;  %v8790_v37 = vld [vmem:[#allocation17_spill] sm:$0xff]  ;;  %v5208_v40 = vld [vmem:[%s5421_s24 + $0xf4] sm:$0xf0] }
 0x411   : > { %v3388_v7 = vpop.f32.mrf.mxu2  ;;  %v5123_v33 = vld [vmem:[%s5421_s24 + $0xf0] sm:$0xf]  ;;  %v5207_v10 = vld [vmem:[%s5421_s24 + $0xf4] sm:$0xf] }
 0x412   : > { %v4421_v16 = vadd.f32 %v4420_v42, %v4248_v48  ;;  %v4251_v52 = vmul.f32 %v7845_v2, %v3931_v24  ;;  %v3389_v44 = vadd.f32 %v3388_v7, %v8786_v61  ;;  %v3477_v43 = vpop.f32.mrf.mxu3  ;;  %v7853_v48 = vpop.permute.xlu0 %4110  ;;  %v5125_v7 = vld [vmem:[%s5421_s24 + $0xf8] sm:$0xf0] }
 0x413   : > { %v3212_v60 = vpop.f32.mrf.mxu0  ;;  %8791 = vst [vmem:[#allocation58_spill] sm:$0xff] %v7853_v48  ;;  %v7857_v61 = vpop.permute.xlu1 %4185 }
 0x414   : > { %v4409_v12 = vadd.f32 %v4408_v25, %v4251_v52  ;;  %v3213_v50 = vadd.f32 %v3212_v60, %v8790_v37  ;;  %v3478_v6 = vadd.f32 %v3477_v43, %v3389_v44  ;;  %v7861_v43 = vor.u32 %v5208_v40, %v5123_v33 }
 0x415   : > { %v3301_v30 = vpop.f32.mrf.mxu1  ;;  %v4339_v60 = vrot.slane %v7778_v14, 4 }
 0x416   : > { %v3932_v63 = vmax.f32 %v3478_v6, 0.0  ;;  %v3302_v45 = vadd.f32 %v3301_v30, %v3213_v50  ;;  %8792 = vst [vmem:[#allocation55_spill] sm:$0xff] %v7861_v43  ;;  %v8793_v30 = vld [vmem:[#allocation13_spill] sm:$0xff] }
 0x418   : > { %v4252_v36 = vmul.f32 %v7845_v2, %v3932_v63  ;;  %v3935_v42 = vmax.f32 %v3302_v45, 0.0  ;;  %v7865_v2 = vor.u32 %v5207_v10, %v5125_v7 }
 0x419   : > { %v3390_v24 = vpop.f32.mrf.mxu2 }
 0x41a   : > { %v4422_v38 = vadd.f32 %v4421_v16, %v4252_v36  ;;  %v4255_v25 = vmul.f32 %v7853_v48, %v3935_v42  ;;  %v3391_v52 = vadd.f32 %v3390_v24, %v8790_v37  ;;  %v3479_v44 = vpop.f32.mrf.mxu3  ;;  %8794 = vst [vmem:[#allocation7_spill] sm:$0xff] %v7865_v2  ;;  %v4340_v36 = vadd.f32 %v4339_v60, %v7778_v14  ;;  %v7896_v37 = vpop.permute.xlu0 %4125 }
 0x41b   : > { %v3215_v50 = vpop.f32.mrf.mxu0  ;;  %8802 = vst [vmem:[#allocation24_spill] sm:$0xff] %v7896_v37 }
 0x41c   : > { %v4410_v6 = vadd.f32 %v4409_v12, %v4255_v25  ;;  %v3216_v63 = vadd.f32 %v3215_v50, %v8793_v30  ;;  %v3480_v45 = vadd.f32 %v3479_v44, %v3391_v52  ;;  %v4352_v12 = vrot.slane %v7793_v58, 4  ;;  %v7876_v52 = vpop.permute.xlu1 %4160 }
 0x41d   : > { %v3304_v27 = vpop.f32.mrf.mxu1  ;;  %v4341_v7 = vrot.slane %v4340_v36, 2  ;;  %8795 = vst [vmem:[#allocation56_spill] sm:$0xff] %v7876_v52 }
 0x41e   : > { %v3936_v28 = vmax.f32 %v3480_v45, 0.0  ;;  %v3305_v19 = vadd.f32 %v3304_v27, %v3216_v63  ;;  %3254 = vmatmul.bf16.gmra.mxu0 %v7861_v43  ;;  %3432 = vmatmul.bf16.gmra.mxu2 %v7861_v43  ;;  %v4353_v60 = vadd.f32 %v4352_v12, %v7793_v58  ;;  %v8798_v12 = vld [vmem:[#allocation18_spill] sm:$0xff] }
 0x420   : > { %v4256_v40 = vmul.f32 %v7853_v48, %v3936_v28  ;;  %v3939_v16 = vmax.f32 %v3305_v19, 0.0  ;;  %3343 = vmatmul.bf16.gmra.mxu1 %v7865_v2  ;;  %3521 = vmatmul.bf16.gmra.mxu3 %v7865_v2  ;;  %v8796_v28 = vld [vmem:[#allocation22_spill] sm:$0xff]  ;;  %v4342_v2 = vadd.f32 %v4341_v7, %v4340_v36 }
 0x421   : > { %v3393_v10 = vpop.f32.mrf.mxu2 }
 0x422   : > { %v4423_v33 = vadd.f32 %v4422_v38, %v4256_v40  ;;  %v4259_v42 = vmul.f32 %v7791_v21, %v3939_v16  ;;  %v3394_v27 = vadd.f32 %v3393_v10, %v8793_v30  ;;  %v3482_v24 = vpop.f32.mrf.mxu3  ;;  %v7881_v16 = vpop.permute.xlu2 %4120  ;;  %v4354_v10 = vrot.slane %v4353_v60, 2 }
 0x423   : > { %v3217_v25 = vpop.f32.mrf.mxu0  ;;  %8797 = vst [vmem:[#allocation6_spill] sm:$0xff] %v7881_v16 }
 0x424   : > { %v4411_v14 = vadd.f32 %v4410_v6, %v4259_v42  ;;  %v3218_v19 = vadd.f32 %v3217_v25, %v8796_v28  ;;  %v3483_v44 = vadd.f32 %v3482_v24, %v3394_v27  ;;  %v4343_v27 = vrot.slane %v4342_v2, 1 }
 0x425   : > { %v3306_v50 = vpop.f32.mrf.mxu1  ;;  %v4355_v36 = vadd.f32 %v4354_v10, %v4353_v60 }
 0x426   : > { %v3940_v63 = vmax.f32 %v3483_v44, 0.0  ;;  %v3307_v45 = vadd.f32 %v3306_v50, %v3218_v19  ;;  %v4387_v44 = vpop.permute.xlu1 %4386 }
 0x428   : > { %v4260_v38 = vmul.f32 %v7791_v21, %v3940_v63  ;;  %v3943_v40 = vmax.f32 %v3307_v45, 0.0  ;;  %v8799_v21 = vld [vmem:[#allocation41_spill] sm:$0xff] }
 0x429   : > { %v3395_v43 = vpop.f32.mrf.mxu2 }
 0x42a   : > { %v4424_v30 = vadd.f32 %v4423_v33, %v4260_v38  ;;  %v4263_v48 = vmul.f32 %v7881_v16, %v3943_v40  ;;  %v3396_v6 = vadd.f32 %v3395_v43, %v8796_v28  ;;  %v3484_v42 = vpop.f32.mrf.mxu3  ;;  %v4344_v33 = vadd.f32 %v4343_v27, %v4342_v2  ;;  %v8800_v40 = vld [vmem:[#allocation26_spill] sm:$0xff] }
 0x42b   : > { %v3220_v24 = vpop.f32.mrf.mxu0 }
 0x42c   : > { %v4412_v58 = vadd.f32 %v4411_v14, %v4263_v48  ;;  %v3221_v25 = vadd.f32 %v3220_v24, %v8798_v12  ;;  %v3485_v19 = vadd.f32 %v3484_v42, %v3396_v6  ;;  %v7891_v48 = vperm.slane %v4387_v44, 0 }
 0x42d   : > { %v3309_v7 = vpop.f32.mrf.mxu1  ;;  %v4356_v14 = vrot.slane %v4355_v36, 1 }
 0x42e   : > { %v4413_v50 = vrot.slane %v4412_v58, 4  ;;  %v3944_v63 = vmax.f32 %v3485_v19, 0.0  ;;  %v3310_v45 = vadd.f32 %v3309_v7, %v3221_v25  ;;  %3535 = vmatmul.bf16.vlgmr.msrb.gmra.mxu0 %v8799_v21  ;;  %3713 = vmatmul.bf16.vlgmr.msrb.gmra.mxu2 %v8799_v21  ;;  %v4390_v25 = vadd.f32 %v7891_v48, %v4344_v33 }
 0x430   : > { %v4414_v38 = vadd.f32 %v4413_v50, %v4412_v58  ;;  %v4264_v43 = vmul.f32 %v7881_v16, %v3944_v63  ;;  %3624 = vmatmul.bf16.vlgmr.msrb.gmra.mxu1 %v8800_v40  ;;  %3802 = vmatmul.bf16.vlgmr.msrb.gmra.mxu3 %v8800_v40  ;;  %v8801_v58 = vld [vmem:[#allocation8_spill] sm:$0xff]  ;;  %v4357_v50 = vadd.f32 %v4356_v14, %v4355_v36  ;;  %v3947_v63 = vmax.f32 %v3310_v45, 0.0 }
 0x431   : > { %v3398_v60 = vpop.f32.mrf.mxu2  ;;  %5248 = vtanh.f32 %v4390_v25 }
 0x432   : > { %v4415_v10 = vrot.slane %v4414_v38, 2  ;;  %v4425_v6 = vadd.f32 %v4424_v30, %v4264_v43  ;;  %v3399_v42 = vadd.f32 %v3398_v60, %v8798_v12  ;;  %v3487_v24 = vpop.f32.mrf.mxu3  ;;  %v4391_v33 = vadd.f32 %v7891_v48, %v4357_v50  ;;  %v8819_v12 = vld [vmem:[#allocation44_spill] sm:$0xff] }
 0x433   : > { %v3222_v21 = vpop.f32.mrf.mxu0 }
 0x434   : > { %v4416_v2 = vadd.f32 %v4415_v10, %v4414_v38  ;;  %v4426_v27 = vrot.slane %v4425_v6, 4  ;;  %v3223_v19 = vadd.f32 %v3222_v21, %v8801_v58  ;;  %v3488_v7 = vadd.f32 %v3487_v24, %v3399_v42 }
 0x435   : > { %v3311_v40 = vpop.f32.mrf.mxu1  ;;  %v4267_v38 = vmul.f32 %v7896_v37, %v3947_v63 }
 0x436   : > { %v4417_v44 = vrot.slane %v4416_v2, 1  ;;  %v4427_v16 = vadd.f32 %v4426_v27, %v4425_v6  ;;  %v3312_v28 = vadd.f32 %v3311_v40, %v3223_v19 }
 0x437   : > { %v5249_v40 = vpop.eup %5248 }
 0x438   : > { %v4418_v30 = vadd.f32 %v4417_v44, %v4416_v2  ;;  %v4428_v43 = vrot.slane %v4427_v16, 2  ;;  %v3951_v60 = vmax.f32 %v3312_v28, 0.0  ;;  %v8803_v2 = vld [vmem:[#allocation12_spill] sm:$0xff]  ;;  %v3948_v28 = vmax.f32 %v3488_v7, 0.0 }
 0x439   : > { %v3400_v10 = vpop.f32.mrf.mxu2  ;;  %v4398_v7 = vmul.f32 127.0, %v5249_v40 }
 0x43a   : > { %v4458_v21 = vadd.f32 %v4418_v30, %v7891_v48  ;;  %v4429_v42 = vadd.f32 %v4428_v43, %v4427_v16  ;;  %v4271_v36 = vmul.f32 %v7808_v46, %v3951_v60  ;;  %v3401_v45 = vadd.f32 %v3400_v10, %v8801_v58  ;;  %v3489_v14 = vpop.f32.mrf.mxu3  ;;  %v8804_v30 = vld [vmem:[#allocation32_spill] sm:$0xff]  ;;  %v8805_v10 = vld [vmem:[#allocation37_spill] sm:$0xff] }
 0x43b   : > { %v3225_v6 = vpop.f32.mrf.mxu0 }
 0x43c   : > { %5250 = vtanh.f32 %v4458_v21  ;;  %v4430_v24 = vrot.slane %v4429_v42, 1  ;;  %v4478_v25 = vadd.f32 %v4271_v36, %v4267_v38  ;;  %v3226_v27 = vadd.f32 %v3225_v6, %v8803_v2  ;;  %v7909_v38 = vpop.permute.xlu2 %4135 }
 0x43d   : > { %v3490_v19 = vadd.f32 %v3489_v14, %v3401_v45  ;;  %v3314_v50 = vpop.f32.mrf.mxu1  ;;  %5252 = vtanh.f32 %v4391_v33  ;;  %8806 = vst [vmem:[#allocation3_spill] sm:$0xff] %v7909_v38  ;;  %v4268_v21 = vmul.f32 %v7896_v37, %v3948_v28  ;;  %v4402_v28 = vfloor.f32 %v4398_v7 }
 0x43e   : > { %v4431_v63 = vadd.f32 %v4430_v24, %v4429_v42  ;;  %v3315_v44 = vadd.f32 %v3314_v50, %v3226_v27  ;;  %3540 = vmatmul.bf16.gmra.mxu0 %v8804_v30  ;;  %3718 = vmatmul.bf16.gmra.mxu2 %v8804_v30 }
 0x43f   : > { %v3952_v16 = vmax.f32 %v3490_v19, 0.0 }
 0x440   : > { %v4459_v43 = vadd.f32 %v4431_v63, %v7891_v48  ;;  %v3955_v60 = vmax.f32 %v3315_v44, 0.0  ;;  %3629 = vmatmul.bf16.gmra.mxu1 %v8805_v10  ;;  %3807 = vmatmul.bf16.gmra.mxu3 %v8805_v10  ;;  %v8807_v44 = vld [vmem:[#allocation25_spill] sm:$0xff]  ;;  %v7916_v10 = vpop.permute.xlu0 %4140 }
 0x441   : > { %v4272_v33 = vmul.f32 %v7808_v46, %v3952_v16  ;;  %v3403_v42 = vpop.f32.mrf.mxu2  ;;  %8808 = vst [vmem:[#allocation23_spill] sm:$0xff] %v7916_v10 }
 0x442   : > { %v5251_v36 = vpop.eup %5250  ;;  %5254 = vtanh.f32 %v4459_v43  ;;  %v4275_v45 = vmul.f32 %v7909_v38, %v3955_v60  ;;  %v3404_v14 = vadd.f32 %v3403_v42, %v8803_v2 }
 0x443   : > { %v4466_v6 = vmul.f32 127.0, %v5251_v36  ;;  %v4491_v24 = vadd.f32 %v4272_v33, %v4268_v21  ;;  %v3227_v27 = vpop.f32.mrf.mxu0  ;;  %v3492_v19 = vpop.f32.mrf.mxu3 }
 0x444   : > { %v5253_v50 = vpop.eup %5252  ;;  %v4479_v63 = vadd.f32 %v4478_v25, %v4275_v45  ;;  %v3228_v30 = vadd.f32 %v3227_v27, %v8807_v44  ;;  %v3493_v40 = vadd.f32 %v3492_v19, %v3404_v14 }
 0x445   : > { %v4470_v16 = vfloor.f32 %v4466_v6  ;;  %v3316_v46 = vpop.f32.mrf.mxu1  ;;  %v4399_v58 = vmul.f32 127.0, %v5253_v50 }
 0x446   : > { %v3956_v37 = vmax.f32 %v3493_v40, 0.0  ;;  %v3317_v43 = vadd.f32 %v3316_v46, %v3228_v30  ;;  %v8809_v46 = vld [vmem:[#allocation36_spill] sm:$0xff] }
 0x447   : > { %v7918_v60 = vadd.f32 %v4470_v16, %v4402_v28  ;;  %v4403_v27 = vfloor.f32 %v4399_v58  ;;  %v7924_v28 = vpop.permute.xlu2 %4170 }
 0x448   : > { %v5255_v42 = vpop.eup %5254  ;;  %v4276_v21 = vmul.f32 %v7909_v38, %v3956_v37  ;;  %v3959_v33 = vmax.f32 %v3317_v43, 0.0  ;;  %v8815_v38 = vld [vmem:[#allocation29_spill] sm:$0xff] }
 0x449   : > { %v4467_v36 = vmul.f32 127.0, %v5255_v42  ;;  %v3405_v2 = vpop.f32.mrf.mxu2 }
 0x44a   : > { %v4492_v25 = vadd.f32 %v4491_v24, %v4276_v21  ;;  %v4279_v45 = vmul.f32 %v7916_v10, %v3959_v33  ;;  %v3406_v14 = vadd.f32 %v3405_v2, %v8807_v44  ;;  %v8810_v24 = vld [vmem:[#allocation35_spill] sm:$0xff]  ;;  %v7930_v2 = vpop.permute.xlu0 %4175 }
 0x44b   : > { %v4471_v7 = vfloor.f32 %v4467_v36  ;;  %v3230_v6 = vpop.f32.mrf.mxu0  ;;  %v3494_v19 = vpop.f32.mrf.mxu3 }
 0x44c   : > { %v4480_v40 = vadd.f32 %v4479_v63, %v4279_v45  ;;  %v3231_v50 = vadd.f32 %v3230_v6, %v8809_v46  ;;  %v3495_v30 = vadd.f32 %v3494_v19, %v3406_v14  ;;  %v8811_v63 = vld [vmem:[#allocation27_spill] sm:$0xff]  ;;  %v8812_v19 = vld [vmem:[#allocation4_spill] sm:$0xff] }
 0x44d   : > { %v7926_v16 = vadd.f32 %v4471_v7, %v4403_v27  ;;  %v3319_v37 = vpop.f32.mrf.mxu1 }
 0x44e   : > { %v3960_v43 = vmax.f32 %v3495_v30, 0.0  ;;  %v3320_v42 = vadd.f32 %v3319_v37, %v3231_v50  ;;  %3545 = vmatmul.bf16.gmra.mxu0 %v8810_v24  ;;  %3723 = vmatmul.bf16.gmra.mxu2 %v8810_v24 }
 0x450   : > { %v4280_v58 = vmul.f32 %v7916_v10, %v3960_v43  ;;  %v3963_v21 = vmax.f32 %v3320_v42, 0.0  ;;  %3634 = vmatmul.bf16.gmra.mxu1 %v8811_v63  ;;  %3812 = vmatmul.bf16.gmra.mxu3 %v8811_v63  ;;  %v7938_v42 = vpop.permute.xlu2 %4180 }
 0x451   : > { %v3408_v33 = vpop.f32.mrf.mxu2 }
 0x452   : > { %v4493_v36 = vadd.f32 %v4492_v25, %v4280_v58  ;;  %v4283_v45 = vmul.f32 %v7840_v55, %v3963_v21  ;;  %v3409_v14 = vadd.f32 %v3408_v33, %v8809_v46  ;;  %v7941_v44 = vpop.permute.xlu0 %4150 }
 0x453   : > { %v3232_v27 = vpop.f32.mrf.mxu0  ;;  %v3497_v7 = vpop.f32.mrf.mxu3  ;;  %8813 = vst [vmem:[#allocation5_spill] sm:$0xff] %v7941_v44 }
 0x454   : > { %v4481_v6 = vadd.f32 %v4480_v40, %v4283_v45  ;;  %v3233_v50 = vadd.f32 %v3232_v27, %v8812_v19  ;;  %v3498_v30 = vadd.f32 %v3497_v7, %v3409_v14  ;;  %v8814_v14 = vld [vmem:[#allocation43_spill] sm:$0xff] }
 0x455   : > { %v3321_v37 = vpop.f32.mrf.mxu1 }
 0x456   : > { %v3964_v24 = vmax.f32 %v3498_v30, 0.0  ;;  %v3322_v43 = vadd.f32 %v3321_v37, %v3233_v50 }
 0x458   : > { %v4284_v10 = vmul.f32 %v7840_v55, %v3964_v24  ;;  %v3967_v63 = vmax.f32 %v3322_v43, 0.0  ;;  %v7951_v43 = vpop.permute.xlu2 %4155 }
 0x459   : > { %v3410_v25 = vpop.f32.mrf.mxu2  ;;  %8817 = vst [vmem:[#allocation41_spill] sm:$0xff] %v7951_v43 }
 0x45a   : > { %v4494_v58 = vadd.f32 %v4493_v36, %v4284_v10  ;;  %v4287_v21 = vmul.f32 %v7941_v44, %v3967_v63  ;;  %v3411_v33 = vadd.f32 %v3410_v25, %v8812_v19  ;;  %v8816_v36 = vld [vmem:[#allocation19_spill] sm:$0xff] }
 0x45b   : > { %v3235_v40 = vpop.f32.mrf.mxu0  ;;  %v3499_v45 = vpop.f32.mrf.mxu3 }
 0x45c   : > { %v4482_v27 = vadd.f32 %v4481_v6, %v4287_v21  ;;  %v3236_v7 = vadd.f32 %v3235_v40, %v8814_v14  ;;  %v3500_v30 = vadd.f32 %v3499_v45, %v3411_v33 }
 0x45d   : > { %v3324_v50 = vpop.f32.mrf.mxu1 }
 0x45e   : > { %v3968_v37 = vmax.f32 %v3500_v30, 0.0  ;;  %v3325_v46 = vadd.f32 %v3324_v50, %v3236_v7  ;;  %3550 = vmatmul.bf16.gmra.mxu0 %v8815_v38  ;;  %3728 = vmatmul.bf16.gmra.mxu2 %v8815_v38  ;;  %v8818_v7 = vld [vmem:[#allocation39_spill] sm:$0xff] }
 0x460   : > { %v4288_v24 = vmul.f32 %v7941_v44, %v3968_v37  ;;  %v3971_v10 = vmax.f32 %v3325_v46, 0.0  ;;  %3639 = vmatmul.bf16.gmra.mxu1 %v8816_v36  ;;  %3817 = vmatmul.bf16.gmra.mxu3 %v8816_v36 }
 0x461   : > { %v3413_v6 = vpop.f32.mrf.mxu2 }
 0x462   : > { %v4495_v63 = vadd.f32 %v4494_v58, %v4288_v24  ;;  %v4291_v25 = vmul.f32 %v7951_v43, %v3971_v10  ;;  %v3414_v21 = vadd.f32 %v3413_v6, %v8814_v14 }
 0x463   : > { %v3237_v33 = vpop.f32.mrf.mxu0  ;;  %v3502_v40 = vpop.f32.mrf.mxu3 }
 0x464   : > { %v4483_v45 = vadd.f32 %v4482_v27, %v4291_v25  ;;  %v3238_v38 = vadd.f32 %v3237_v33, %v8818_v7  ;;  %v3503_v30 = vadd.f32 %v3502_v40, %v3414_v21 }
 0x465   : > { %v3326_v50 = vpop.f32.mrf.mxu1 }
 0x466   : > { %v3972_v46 = vmax.f32 %v3503_v30, 0.0  ;;  %v3327_v37 = vadd.f32 %v3326_v50, %v3238_v38  ;;  %v8820_v38 = vld [vmem:[#allocation10_spill] sm:$0xff] }
 0x468   : > { %v4292_v44 = vmul.f32 %v7951_v43, %v3972_v46  ;;  %v3975_v36 = vmax.f32 %v3327_v37, 0.0 }
 0x469   : > { %v3415_v19 = vpop.f32.mrf.mxu2 }
 0x46a   : > { %v4496_v55 = vadd.f32 %v4495_v63, %v4292_v44  ;;  %v4295_v58 = vmul.f32 %v7876_v52, %v3975_v36  ;;  %v3416_v24 = vadd.f32 %v3415_v19, %v8818_v7  ;;  %v8821_v63 = vld [vmem:[#allocation14_spill] sm:$0xff] }
 0x46b   : > { %v3240_v10 = vpop.f32.mrf.mxu0  ;;  %v3504_v6 = vpop.f32.mrf.mxu3 }
 0x46c   : > { %v4484_v14 = vadd.f32 %v4483_v45, %v4295_v58  ;;  %v3241_v27 = vadd.f32 %v3240_v10, %v8819_v12  ;;  %v3505_v25 = vadd.f32 %v3504_v6, %v3416_v24  ;;  %v8822_v6 = vld [vmem:[#allocation45_spill] sm:$0xff] }
 0x46d   : > { %v3329_v33 = vpop.f32.mrf.mxu1 }
 0x46e   : > { %v4485_v21 = vrot.slane %v4484_v14, 4  ;;  %v3976_v40 = vmax.f32 %v3505_v25, 0.0  ;;  %v3330_v30 = vadd.f32 %v3329_v33, %v3241_v27  ;;  %3555 = vmatmul.bf16.gmra.mxu0 %v8820_v38  ;;  %3733 = vmatmul.bf16.gmra.mxu2 %v8820_v38 }
 0x470   : > { %v4486_v50 = vadd.f32 %v4485_v21, %v4484_v14  ;;  %v4296_v44 = vmul.f32 %v7876_v52, %v3976_v40  ;;  %3644 = vmatmul.bf16.gmra.mxu1 %v8821_v63  ;;  %3822 = vmatmul.bf16.gmra.mxu3 %v8821_v63  ;;  %v3979_v33 = vmax.f32 %v3330_v30, 0.0 }
 0x471   : > { %v3418_v19 = vpop.f32.mrf.mxu2 }
 0x472   : > { %v4487_v45 = vrot.slane %v4486_v50, 2  ;;  %v4497_v46 = vadd.f32 %v4496_v55, %v4296_v44  ;;  %v3419_v37 = vadd.f32 %v3418_v19, %v8819_v12  ;;  %v4299_v43 = vmul.f32 %v7824_v39, %v3979_v33 }
 0x473   : > { %v3242_v36 = vpop.f32.mrf.mxu0  ;;  %v3507_v58 = vpop.f32.mrf.mxu3 }
 0x474   : > { %v4488_v24 = vadd.f32 %v4487_v45, %v4486_v50  ;;  %v4498_v10 = vrot.slane %v4497_v46, 4  ;;  %v3243_v27 = vadd.f32 %v3242_v36, %v8822_v6  ;;  %v3508_v25 = vadd.f32 %v3507_v58, %v3419_v37 }
 0x475   : > { %v3331_v14 = vpop.f32.mrf.mxu1 }
 0x476   : > { %v4489_v21 = vrot.slane %v4488_v24, 1  ;;  %v4499_v40 = vadd.f32 %v4498_v10, %v4497_v46  ;;  %v3332_v38 = vadd.f32 %v3331_v14, %v3243_v27  ;;  %v8823_v46 = vld [vmem:[#allocation30_spill] sm:$0xff] }
 0x478   : > { %v4490_v52 = vadd.f32 %v4489_v21, %v4488_v24  ;;  %v4500_v7 = vrot.slane %v4499_v40, 2  ;;  %v3983_v63 = vmax.f32 %v3332_v38, 0.0  ;;  %v3980_v24 = vmax.f32 %v3508_v25, 0.0  ;;  %v8824_v38 = vld [vmem:[#allocation16_spill] sm:$0xff] }
 0x479   : > { %v3420_v55 = vpop.f32.mrf.mxu2 }
 0x47a   : > { %v4530_v44 = vadd.f32 %v4490_v52, %v7891_v48  ;;  %v4501_v19 = vadd.f32 %v4500_v7, %v4499_v40  ;;  %v4303_v50 = vmul.f32 %v7924_v28, %v3983_v63  ;;  %v3421_v45 = vadd.f32 %v3420_v55, %v8822_v6  ;;  %v8825_v63 = vld [vmem:[#allocation20_spill] sm:$0xff] }
 0x47b   : > { %v3245_v36 = vpop.f32.mrf.mxu0  ;;  %v3509_v37 = vpop.f32.mrf.mxu3 }
 0x47c   : > { %5256 = vtanh.f32 %v4530_v44  ;;  %v4502_v30 = vrot.slane %v4501_v19, 1  ;;  %v4550_v58 = vadd.f32 %v4303_v50, %v4299_v43  ;;  %v3246_v10 = vadd.f32 %v3245_v36, %v8823_v46 }
 0x47d   : > { %v3510_v27 = vadd.f32 %v3509_v37, %v3421_v45  ;;  %v3334_v14 = vpop.f32.mrf.mxu1  ;;  %v4300_v43 = vmul.f32 %v7824_v39, %v3980_v24 }
 0x47e   : > { %v4503_v21 = vadd.f32 %v4502_v30, %v4501_v19  ;;  %v3335_v33 = vadd.f32 %v3334_v14, %v3246_v10  ;;  %3560 = vmatmul.bf16.gmra.mxu0 %v8824_v38  ;;  %3738 = vmatmul.bf16.gmra.mxu2 %v8824_v38 }
 0x47f   : > { %v3984_v52 = vmax.f32 %v3510_v27, 0.0  ;;  %v8826_v27 = vld [vmem:[#allocation46_spill] sm:$0xff] }
 0x480   : > { %v4531_v7 = vadd.f32 %v4503_v21, %v7891_v48  ;;  %v3987_v40 = vmax.f32 %v3335_v33, 0.0  ;;  %3649 = vmatmul.bf16.gmra.mxu1 %v8825_v63  ;;  %3827 = vmatmul.bf16.gmra.mxu3 %v8825_v63 }
 0x481   : > { %v4304_v25 = vmul.f32 %v7924_v28, %v3984_v52  ;;  %v3423_v55 = vpop.f32.mrf.mxu2 }
 0x482   : > { %v5257_v44 = vpop.eup %5256  ;;  %5258 = vtanh.f32 %v4531_v7  ;;  %v4307_v19 = vmul.f32 %v7930_v2, %v3987_v40  ;;  %v3424_v50 = vadd.f32 %v3423_v55, %v8823_v46 }
 0x483   : > { %v4538_v45 = vmul.f32 127.0, %v5257_v44  ;;  %v4563_v36 = vadd.f32 %v4304_v25, %v4300_v43  ;;  %v3247_v37 = vpop.f32.mrf.mxu0  ;;  %v3512_v30 = vpop.f32.mrf.mxu3 }
 0x484   : > { %v4551_v10 = vadd.f32 %v4550_v58, %v4307_v19  ;;  %v3248_v14 = vadd.f32 %v3247_v37, %v8826_v27  ;;  %v3513_v21 = vadd.f32 %v3512_v30, %v3424_v50 }
 0x485   : > { %v4542_v33 = vfloor.f32 %v4538_v45  ;;  %v3336_v38 = vpop.f32.mrf.mxu1 }
 0x486   : > { %v3988_v24 = vmax.f32 %v3513_v21, 0.0  ;;  %v3337_v63 = vadd.f32 %v3336_v38, %v3248_v14 }
 0x487   : > { %v7983_v52 = vadd.f32 %v4542_v33, %v7918_v60 }
 0x488   : > { %v5259_v7 = vpop.eup %5258  ;;  %v4308_v40 = vmul.f32 %v7930_v2, %v3988_v24  ;;  %v3991_v39 = vmax.f32 %v3337_v63, 0.0  ;;  %v8827_v24 = vld [vmem:[#allocation21_spill] sm:$0xff]  ;;  %v8828_v63 = vld [vmem:[#allocation31_spill] sm:$0xff] }
 0x489   : > { %v4539_v55 = vmul.f32 127.0, %v5259_v7  ;;  %v3425_v44 = vpop.f32.mrf.mxu2 }
 0x48a   : > { %v4564_v43 = vadd.f32 %v4563_v36, %v4308_v40  ;;  %v4311_v25 = vmul.f32 %v7938_v42, %v3991_v39  ;;  %v3426_v58 = vadd.f32 %v3425_v44, %v8826_v27 }
 0x48b   : > { %v4543_v19 = vfloor.f32 %v4539_v55  ;;  %v3250_v50 = vpop.f32.mrf.mxu0  ;;  %v3514_v45 = vpop.f32.mrf.mxu3 }
 0x48c   : > { %v4552_v37 = vadd.f32 %v4551_v10, %v4311_v25  ;;  %v3251_v30 = vadd.f32 %v3250_v50, %v7659_v23  ;;  %v3515_v14 = vadd.f32 %v3514_v45, %v3426_v58 }
 0x48d   : > { %v7990_v60 = vadd.f32 %v4543_v19, %v7926_v16  ;;  %v3339_v21 = vpop.f32.mrf.mxu1 }
 0x48e   : > { %v3992_v33 = vmax.f32 %v3515_v14, 0.0  ;;  %v3340_v38 = vadd.f32 %v3339_v21, %v3251_v30  ;;  %3565 = vmatmul.bf16.gmra.mxu0 %v8827_v24  ;;  %3743 = vmatmul.bf16.gmra.mxu2 %v8827_v24 }
 0x490   : > { %v4312_v39 = vmul.f32 %v7938_v42, %v3992_v33  ;;  %v3995_v36 = vmax.f32 %v3340_v38, 0.0  ;;  %3654 = vmatmul.bf16.gmra.mxu1 %v8828_v63  ;;  %3832 = vmatmul.bf16.gmra.mxu3 %v8828_v63  ;;  %v8001_v33 = vpop.permute.xlu0 %4190 }
 0x491   : > { %v3428_v10 = vpop.f32.mrf.mxu2  ;;  %8829 = vst [vmem:[#allocation26_spill] sm:$0xff] %v8001_v33 }
 0x492   : > { %v4565_v7 = vadd.f32 %v4564_v43, %v4312_v39  ;;  %v4315_v40 = vmul.f32 %v7857_v61, %v3995_v36  ;;  %v3429_v16 = vadd.f32 %v3428_v10, %v7659_v23 }
 0x493   : > { %v3252_v55 = vpop.f32.mrf.mxu0  ;;  %v3517_v44 = vpop.f32.mrf.mxu3 }
 0x494   : > { %v4553_v25 = vadd.f32 %v4552_v37, %v4315_v40  ;;  %v3253_v58 = vadd.f32 %v3252_v55, %v7630_v3  ;;  %v3518_v19 = vadd.f32 %v3517_v44, %v3429_v16 }
 0x495   : > { %v3341_v50 = vpop.f32.mrf.mxu1 }
 0x496   : > { %v3996_v45 = vmax.f32 %v3518_v19, 0.0  ;;  %v3342_v30 = vadd.f32 %v3341_v50, %v3253_v58  ;;  %v8830_v58 = vld [vmem:[#allocation42_spill] sm:$0xff] }
 0x497   : > { %v8831_v50 = vld [vmem:[#allocation38_spill] sm:$0xff] }
 0x498   : > { %v4316_v14 = vmul.f32 %v7857_v61, %v3996_v45  ;;  %v3999_v21 = vmax.f32 %v3342_v30, 0.0  ;;  %v8011_v45 = vpop.permute.xlu2 %4195 }
 0x499   : > { %v3430_v38 = vpop.f32.mrf.mxu2 }
 0x49a   : > { %v4566_v43 = vadd.f32 %v4565_v7, %v4316_v14  ;;  %v4319_v24 = vmul.f32 %v8001_v33, %v3999_v21  ;;  %v3431_v39 = vadd.f32 %v3430_v38, %v7630_v3 }
 0x49b   : > { %v3255_v36 = vpop.f32.mrf.mxu0  ;;  %v3519_v63 = vpop.f32.mrf.mxu3 }
 0x49c   : > { %v4554_v37 = vadd.f32 %v4553_v25, %v4319_v24  ;;  %v3256_v10 = vadd.f32 %v3255_v36, %v7667_v11  ;;  %v3520_v40 = vadd.f32 %v3519_v63, %v3431_v39 }
 0x49d   : > { %v3344_v16 = vpop.f32.mrf.mxu1 }
 0x49e   : > { %v4000_v55 = vmax.f32 %v3520_v40, 0.0  ;;  %v3345_v44 = vadd.f32 %v3344_v16, %v3256_v10  ;;  %3570 = vmatmul.bf16.gmra.mxu0 %v8830_v58  ;;  %3748 = vmatmul.bf16.gmra.mxu2 %v8830_v58  ;;  %v8017_v58 = vpop.permute.xlu0 %4200 }
 0x4a0   : > { %v4320_v19 = vmul.f32 %v8001_v33, %v4000_v55  ;;  %v4003_v7 = vmax.f32 %v3345_v44, 0.0  ;;  %3659 = vmatmul.bf16.gmra.mxu1 %v8831_v50  ;;  %3837 = vmatmul.bf16.gmra.mxu3 %v8831_v50 }
 0x4a1   : > { %v3433_v25 = vpop.f32.mrf.mxu2 }
 0x4a2   : > { %v4567_v30 = vadd.f32 %v4566_v43, %v4320_v19  ;;  %v4323_v14 = vmul.f32 %v8011_v45, %v4003_v7  ;;  %v3434_v21 = vadd.f32 %v3433_v25, %v7667_v11 }
 0x4a3   : > { %v3257_v38 = vpop.f32.mrf.mxu0  ;;  %v3522_v24 = vpop.f32.mrf.mxu3 }
 0x4a4   : > { %v4555_v39 = vadd.f32 %v4554_v37, %v4323_v14  ;;  %v3258_v36 = vadd.f32 %v3257_v38, %v7683_v5  ;;  %v3523_v63 = vadd.f32 %v3522_v24, %v3434_v21 }
 0x4a5   : > { %v3346_v10 = vpop.f32.mrf.mxu1 }
 0x4a6   : > { %v4004_v40 = vmax.f32 %v3523_v63, 0.0  ;;  %v3347_v16 = vadd.f32 %v3346_v10, %v3258_v36 }
 0x4a8   : > { %v4324_v55 = vmul.f32 %v8011_v45, %v4004_v40  ;;  %v4007_v44 = vmax.f32 %v3347_v16, 0.0 }
 0x4a9   : > { %v3435_v50 = vpop.f32.mrf.mxu2 }
 0x4aa   : > { %v4568_v43 = vadd.f32 %v4567_v30, %v4324_v55  ;;  %v4327_v19 = vmul.f32 %v8017_v58, %v4007_v44  ;;  %v3436_v7 = vadd.f32 %v3435_v50, %v7683_v5 }
 0x4ab   : > { %v3524_v25 = vpop.f32.mrf.mxu3  ;;  %v3536_v14 = vpop.f32.mrf.mxu0 }
 0x4ac   : > { %v4556_v33 = vadd.f32 %v4555_v39, %v4327_v19  ;;  %v3525_v37 = vadd.f32 %v3524_v25, %v3436_v7  ;;  %v3537_v36 = vadd.f32 %v3536_v14, %v7411_v59 }
 0x4ad   : > { %v3625_v38 = vpop.f32.mrf.mxu1 }
 0x4ae   : > { %v4557_v21 = vrot.slane %v4556_v33, 4  ;;  %v4008_v24 = vmax.f32 %v3525_v37, 0.0  ;;  %3575 = vmatmul.bf16.gmra.mxu0 %v7649_v9  ;;  %3753 = vmatmul.bf16.gmra.mxu2 %v7649_v9  ;;  %v3626_v10 = vadd.f32 %v3625_v38, %v3537_v36 }
 0x4b0   : > { %v4558_v63 = vadd.f32 %v4557_v21, %v4556_v33  ;;  %v4328_v30 = vmul.f32 %v8017_v58, %v4008_v24  ;;  %3664 = vmatmul.bf16.gmra.mxu1 %v7654_v41  ;;  %3842 = vmatmul.bf16.gmra.mxu3 %v7654_v41  ;;  %v3885_v55 = vmax.f32 %v3626_v10, 0.0 }
 0x4b1   : > { %v3714_v39 = vpop.f32.mrf.mxu2 }
 0x4b2   : > { %v4559_v40 = vrot.slane %v4558_v63, 2  ;;  %v4569_v16 = vadd.f32 %v4568_v43, %v4328_v30  ;;  %v3715_v44 = vadd.f32 %v3714_v39, %v7411_v59  ;;  %v4205_v25 = vmul.f32 %v7673_v29, %v3885_v55 }
 0x4b3   : > { %v3803_v50 = vpop.f32.mrf.mxu3  ;;  %v3538_v33 = vpop.f32.mrf.mxu0 }
 0x4b4   : > { %v4560_v19 = vadd.f32 %v4559_v40, %v4558_v63  ;;  %v4570_v7 = vrot.slane %v4569_v16, 4  ;;  %v3804_v9 = vadd.f32 %v3803_v50, %v3715_v44  ;;  %v3539_v21 = vadd.f32 %v3538_v33, %v7429_v34 }
 0x4b5   : > { %v3627_v37 = vpop.f32.mrf.mxu1 }
 0x4b6   : > { %v4561_v14 = vrot.slane %v4560_v19, 1  ;;  %v4571_v38 = vadd.f32 %v4570_v7, %v4569_v16  ;;  %v3886_v24 = vmax.f32 %v3804_v9, 0.0  ;;  %v3628_v30 = vadd.f32 %v3627_v37, %v3539_v21 }
 0x4b8   : > { %v4562_v41 = vadd.f32 %v4561_v14, %v4560_v19  ;;  %v4572_v36 = vrot.slane %v4571_v38, 2  ;;  %v4206_v43 = vmul.f32 %v7673_v29, %v3886_v24  ;;  %v3889_v39 = vmax.f32 %v3628_v30, 0.0 }
 0x4b9   : > { %v3716_v10 = vpop.f32.mrf.mxu2 }
 0x4ba   : > { %v4602_v59 = vadd.f32 %v4562_v41, %v7891_v48  ;;  %v4573_v63 = vadd.f32 %v4572_v36, %v4571_v38  ;;  %v3717_v40 = vadd.f32 %v3716_v10, %v7429_v34  ;;  %v4209_v16 = vmul.f32 %v7688_v4, %v3889_v39 }
 0x4bb   : > { %v3805_v55 = vpop.f32.mrf.mxu3  ;;  %v3541_v7 = vpop.f32.mrf.mxu0 }
 0x4bc   : > { %5260 = vtanh.f32 %v4602_v59  ;;  %v4574_v44 = vrot.slane %v4573_v63, 1  ;;  %v3806_v50 = vadd.f32 %v3805_v55, %v3717_v40  ;;  %v4358_v33 = vadd.f32 %v4209_v16, %v4205_v25 }
 0x4bd   : > { %v3630_v9 = vpop.f32.mrf.mxu1  ;;  %v3542_v29 = vadd.f32 %v3541_v7, %v7419_v57 }
 0x4be   : > { %v4575_v19 = vadd.f32 %v4574_v44, %v4573_v63  ;;  %v3890_v37 = vmax.f32 %v3806_v50, 0.0  ;;  %3580 = vmatmul.bf16.gmra.mxu0 %v7694_v8  ;;  %3758 = vmatmul.bf16.gmra.mxu2 %v7694_v8 }
 0x4bf   : > { %v3631_v38 = vadd.f32 %v3630_v9, %v3542_v29 }
 0x4c0   : > { %v4603_v14 = vadd.f32 %v4575_v19, %v7891_v48  ;;  %v4210_v34 = vmul.f32 %v7688_v4, %v3890_v37  ;;  %3669 = vmatmul.bf16.gmra.mxu1 %v7698_v31  ;;  %3847 = vmatmul.bf16.gmra.mxu3 %v7698_v31 }
 0x4c1   : > { %v3719_v21 = vpop.f32.mrf.mxu2  ;;  %v3893_v41 = vmax.f32 %v3631_v38, 0.0 }
 0x4c2   : > { %v5261_v24 = vpop.eup %5260  ;;  %5262 = vtanh.f32 %v4603_v14  ;;  %v4371_v25 = vadd.f32 %v4210_v34, %v4206_v43  ;;  %v3720_v36 = vadd.f32 %v3719_v21, %v7419_v57 }
 0x4c3   : > { %v4610_v30 = vmul.f32 127.0, %v5261_v24  ;;  %v3808_v10 = vpop.f32.mrf.mxu3  ;;  %v4213_v8 = vmul.f32 %v7706_v62, %v3893_v41  ;;  %v3543_v39 = vpop.f32.mrf.mxu0 }
 0x4c4   : > { %v3809_v59 = vadd.f32 %v3808_v10, %v3720_v36  ;;  %v3544_v55 = vadd.f32 %v3543_v39, %v7434_v54 }
 0x4c5   : > { %v4614_v63 = vfloor.f32 %v4610_v30  ;;  %v3632_v4 = vpop.f32.mrf.mxu1  ;;  %v4359_v40 = vadd.f32 %v4358_v33, %v4213_v8 }
 0x4c6   : > { %v3894_v44 = vmax.f32 %v3809_v59, 0.0  ;;  %v3633_v50 = vadd.f32 %v3632_v4, %v3544_v55 }
 0x4c7   : > { %v8045_v31 = vadd.f32 %v4614_v63, %v7983_v52 }
 0x4c8   : > { %v5263_v16 = vpop.eup %5262  ;;  %v4214_v43 = vmul.f32 %v7706_v62, %v3894_v44  ;;  %v3897_v19 = vmax.f32 %v3633_v50, 0.0 }
 0x4c9   : > { %v4611_v57 = vmul.f32 127.0, %v5263_v16  ;;  %v3721_v7 = vpop.f32.mrf.mxu2 }
 0x4ca   : > { %v4372_v9 = vadd.f32 %v4371_v25, %v4214_v43  ;;  %v3722_v29 = vadd.f32 %v3721_v7, %v7434_v54  ;;  %v4217_v33 = vmul.f32 %v7718_v35, %v3897_v19 }
 0x4cb   : > { %v4615_v37 = vfloor.f32 %v4611_v57  ;;  %v3810_v14 = vpop.f32.mrf.mxu3  ;;  %v3546_v52 = vpop.f32.mrf.mxu0 }
 0x4cc   : > { %v3811_v34 = vadd.f32 %v3810_v14, %v3722_v29  ;;  %v4360_v24 = vadd.f32 %v4359_v40, %v4217_v33  ;;  %v3547_v62 = vadd.f32 %v3546_v52, %v7452_v20 }
 0x4cd   : > { %v8051_v38 = vadd.f32 %v4615_v37, %v7990_v60  ;;  %v3635_v21 = vpop.f32.mrf.mxu1 }
 0x4ce   : > { %v3898_v41 = vmax.f32 %v3811_v34, 0.0  ;;  %3585 = vmatmul.bf16.gmra.mxu0 %v7725_v49  ;;  %3763 = vmatmul.bf16.gmra.mxu2 %v7725_v49  ;;  %v3636_v25 = vadd.f32 %v3635_v21, %v3547_v62 }
 0x4d0   : > { %v4218_v54 = vmul.f32 %v7718_v35, %v3898_v41  ;;  %3674 = vmatmul.bf16.gmra.mxu1 %v7729_v32  ;;  %3852 = vmatmul.bf16.gmra.mxu3 %v7729_v32  ;;  %v3901_v30 = vmax.f32 %v3636_v25, 0.0 }
 0x4d1   : > { %v3724_v36 = vpop.f32.mrf.mxu2 }
 0x4d2   : > { %v4373_v60 = vadd.f32 %v4372_v9, %v4218_v54  ;;  %v3725_v10 = vadd.f32 %v3724_v36, %v7452_v20  ;;  %v4221_v59 = vmul.f32 %v7737_v53, %v3901_v30 }
 0x4d3   : > { %v3813_v8 = vpop.f32.mrf.mxu3  ;;  %v3548_v39 = vpop.f32.mrf.mxu0 }
 0x4d4   : > { %v3814_v63 = vadd.f32 %v3813_v8, %v3725_v10  ;;  %v4361_v40 = vadd.f32 %v4360_v24, %v4221_v59  ;;  %v3549_v49 = vadd.f32 %v3548_v39, %v7438_v56 }
 0x4d5   : > { %v3637_v4 = vpop.f32.mrf.mxu1 }
 0x4d6   : > { %v3902_v35 = vmax.f32 %v3814_v63, 0.0  ;;  %v3638_v44 = vadd.f32 %v3637_v4, %v3549_v49 }
 0x4d8   : > { %v4222_v55 = vmul.f32 %v7737_v53, %v3902_v35  ;;  %v3905_v43 = vmax.f32 %v3638_v44, 0.0 }
 0x4d9   : > { %v3726_v16 = vpop.f32.mrf.mxu2 }
 0x4da   : > { %v4374_v32 = vadd.f32 %v4373_v60, %v4222_v55  ;;  %v3727_v50 = vadd.f32 %v3726_v16, %v7438_v56  ;;  %v4225_v20 = vmul.f32 %v7741_v51, %v3905_v43 }
 0x4db   : > { %v3815_v57 = vpop.f32.mrf.mxu3  ;;  %v3551_v9 = vpop.f32.mrf.mxu0 }
 0x4dc   : > { %v3816_v7 = vadd.f32 %v3815_v57, %v3727_v50  ;;  %v4362_v29 = vadd.f32 %v4361_v40, %v4225_v20  ;;  %v3552_v37 = vadd.f32 %v3551_v9, %v7458_v26 }
 0x4dd   : > { %v3640_v19 = vpop.f32.mrf.mxu1 }
 0x4de   : > { %v3906_v14 = vmax.f32 %v3816_v7, 0.0  ;;  %3590 = vmatmul.bf16.gmra.mxu0 %v7751_v22  ;;  %3768 = vmatmul.bf16.gmra.mxu2 %v7751_v22  ;;  %v3641_v33 = vadd.f32 %v3640_v19, %v3552_v37  ;;  %v8832_v7 = vld [vmem:[#allocation9_spill] sm:$0xff] }
 0x4e0   : > { %v4226_v53 = vmul.f32 %v7741_v51, %v3906_v14  ;;  %3679 = vmatmul.bf16.gmra.mxu1 %v7754_v0  ;;  %3857 = vmatmul.bf16.gmra.mxu3 %v7754_v0  ;;  %v3909_v52 = vmax.f32 %v3641_v33, 0.0  ;;  %v8834_v33 = vld [vmem:[#allocation48_spill] sm:$0xff] }
 0x4e1   : > { %v3729_v56 = vpop.f32.mrf.mxu2 }
 0x4e2   : > { %v4375_v34 = vadd.f32 %v4374_v32, %v4226_v53  ;;  %v3730_v21 = vadd.f32 %v3729_v56, %v7458_v26  ;;  %v4229_v62 = vmul.f32 %v7763_v47, %v3909_v52  ;;  %v8833_v53 = vld [vmem:[#allocation34_spill] sm:$0xff] }
 0x4e3   : > { %v3818_v24 = vpop.f32.mrf.mxu3  ;;  %v3553_v54 = vpop.f32.mrf.mxu0 }
 0x4e4   : > { %v3819_v41 = vadd.f32 %v3818_v24, %v3730_v21  ;;  %v4363_v36 = vadd.f32 %v4362_v29, %v4229_v62  ;;  %v3554_v22 = vadd.f32 %v3553_v54, %v8772_v17  ;;  %v8835_v62 = vld [vmem:[#allocation15_spill] sm:$0xff]  ;;  %v8836_v54 = vld [vmem:[#allocation49_spill] sm:$0xff] }
 0x4e5   : > { %v3642_v25 = vpop.f32.mrf.mxu1 }
 0x4e6   : > { %v3910_v51 = vmax.f32 %v3819_v41, 0.0  ;;  %v3643_v30 = vadd.f32 %v3642_v25, %v3554_v22  ;;  %v8837_v22 = vld [vmem:[#allocation51_spill] sm:$0xff] }
 0x4e8   : > { %v4230_v60 = vmul.f32 %v7763_v47, %v3910_v51  ;;  %v3913_v8 = vmax.f32 %v3643_v30, 0.0 }
 0x4e9   : > { %v3731_v10 = vpop.f32.mrf.mxu2 }
 0x4ea   : > { %v4376_v0 = vadd.f32 %v4375_v34, %v4230_v60  ;;  %v3732_v59 = vadd.f32 %v3731_v10, %v8772_v17  ;;  %v4233_v26 = vmul.f32 %v7771_v18, %v3913_v8 }
 0x4eb   : > { %v3820_v63 = vpop.f32.mrf.mxu3  ;;  %v3556_v4 = vpop.f32.mrf.mxu0 }
 0x4ec   : > { %v3821_v39 = vadd.f32 %v3820_v63, %v3732_v59  ;;  %v8077_v49 = vadd.f32 %v4363_v36, %v4233_v26  ;;  %v3557_v35 = vadd.f32 %v3556_v4, %v8774_v1  ;;  %v8838_v63 = vld [vmem:[#allocation52_spill] sm:$0xff] }
 0x4ed   : > { %v3645_v40 = vpop.f32.mrf.mxu1 }
 0x4ee   : > { %v3914_v55 = vmax.f32 %v3821_v39, 0.0  ;;  %3595 = vmatmul.bf16.gmra.mxu0 %v7781_v15  ;;  %3773 = vmatmul.bf16.gmra.mxu2 %v7781_v15  ;;  %v3646_v44 = vadd.f32 %v3645_v40, %v3557_v35 }
 0x4f0   : > { %v4234_v47 = vmul.f32 %v7771_v18, %v3914_v55  ;;  %3684 = vmatmul.bf16.gmra.mxu1 %v7784_v13  ;;  %3862 = vmatmul.bf16.gmra.mxu3 %v7784_v13  ;;  %v3917_v19 = vmax.f32 %v3646_v44, 0.0  ;;  %v8839_v55 = vld [vmem:[#allocation11_spill] sm:$0xff] }
 0x4f1   : > { %v3734_v17 = vpop.f32.mrf.mxu2 }
 0x4f2   : > { %v8085_v16 = vadd.f32 %v4376_v0, %v4234_v47  ;;  %v3735_v32 = vadd.f32 %v3734_v17, %v8774_v1  ;;  %v4237_v13 = vmul.f32 %v8833_v53, %v3917_v19 }
 0x4f3   : > { %v3823_v43 = vpop.f32.mrf.mxu3  ;;  %v3558_v57 = vpop.f32.mrf.mxu0 }
 0x4f4   : > { %v3824_v50 = vadd.f32 %v3823_v43, %v3735_v32  ;;  %v3559_v9 = vadd.f32 %v3558_v57, %v8832_v7 }
 0x4f5   : > { %v3647_v20 = vpop.f32.mrf.mxu1 }
 0x4f6   : > { %v3648_v15 = vadd.f32 %v3647_v20, %v3559_v9  ;;  %v3918_v52 = vmax.f32 %v3824_v50, 0.0  ;;  %v8840_v9 = vld [vmem:[#allocation33_spill] sm:$0xff] }
 0x4f8   : > { %v3921_v18 = vmax.f32 %v3648_v15, 0.0  ;;  %v4238_v51 = vmul.f32 %v8833_v53, %v3918_v52  ;;  %v8843_v52 = vld [vmem:[#allocation28_spill] sm:$0xff] }
 0x4f9   : > { %v3736_v29 = vpop.f32.mrf.mxu2 }
 0x4fa   : > { %v3737_v37 = vadd.f32 %v3736_v29, %v8832_v7  ;;  %v4241_v56 = vmul.f32 %v8834_v33, %v3921_v18 }
 0x4fb   : > { %v3825_v14 = vpop.f32.mrf.mxu3  ;;  %v3561_v1 = vpop.f32.mrf.mxu0 }
 0x4fc   : > { %v3826_v34 = vadd.f32 %v3825_v14, %v3737_v37  ;;  %v4432_v24 = vadd.f32 %v4241_v56, %v4237_v13  ;;  %v3562_v41 = vadd.f32 %v3561_v1, %v8835_v62  ;;  %v8841_v14 = vld [vmem:[#allocation40_spill] sm:$0xff] }
 0x4fd   : > { %v3650_v21 = vpop.f32.mrf.mxu1 }
 0x4fe   : > { %3600 = vmatmul.bf16.gmra.mxu0 %v8836_v54  ;;  %3778 = vmatmul.bf16.gmra.mxu2 %v8836_v54  ;;  %v3922_v25 = vmax.f32 %v3826_v34, 0.0  ;;  %v3651_v36 = vadd.f32 %v3650_v21, %v3562_v41  ;;  %v8844_v54 = vld [vmem:[#allocation59_spill] sm:$0xff] }
 0x500   : > { %3689 = vmatmul.bf16.gmra.mxu1 %v8837_v22  ;;  %3867 = vmatmul.bf16.gmra.mxu3 %v8837_v22  ;;  %v4242_v60 = vmul.f32 %v8834_v33, %v3922_v25  ;;  %v3925_v10 = vmax.f32 %v3651_v36, 0.0  ;;  %v8842_v33 = vld [vmem:[#allocation54_spill] sm:$0xff] }
 0x501   : > { %v3739_v30 = vpop.f32.mrf.mxu2 }
 0x502   : > { %v3740_v0 = vadd.f32 %v3739_v30, %v8835_v62  ;;  %v4445_v8 = vadd.f32 %v4242_v60, %v4238_v51  ;;  %v4245_v26 = vmul.f32 %v8838_v63, %v3925_v10  ;;  %v8845_v30 = vld [vmem:[#allocation17_spill] sm:$0xff] }
 0x503   : > { %v3828_v59 = vpop.f32.mrf.mxu3  ;;  %v3563_v4 = vpop.f32.mrf.mxu0 }
 0x504   : > { %v3829_v39 = vadd.f32 %v3828_v59, %v3740_v0  ;;  %v4433_v35 = vadd.f32 %v4432_v24, %v4245_v26  ;;  %v3564_v47 = vadd.f32 %v3563_v4, %v8839_v55 }
 0x505   : > { %v3652_v40 = vpop.f32.mrf.mxu1 }
 0x506   : > { %v3926_v44 = vmax.f32 %v3829_v39, 0.0  ;;  %v3653_v32 = vadd.f32 %v3652_v40, %v3564_v47 }
 0x508   : > { %v4246_v17 = vmul.f32 %v8838_v63, %v3926_v44  ;;  %v3929_v57 = vmax.f32 %v3653_v32, 0.0  ;;  %v4365_v44 = vrot.slane %v8077_v49, 4 }
 0x509   : > { %v3741_v43 = vpop.f32.mrf.mxu2 }
 0x50a   : > { %v4446_v50 = vadd.f32 %v4445_v8, %v4246_v17  ;;  %v3742_v20 = vadd.f32 %v3741_v43, %v8839_v55  ;;  %v4249_v19 = vmul.f32 %v8840_v9, %v3929_v57 }
 0x50b   : > { %v3830_v7 = vpop.f32.mrf.mxu3  ;;  %v3566_v29 = vpop.f32.mrf.mxu0 }
 0x50c   : > { %v3831_v15 = vadd.f32 %v3830_v7, %v3742_v20  ;;  %v4434_v37 = vadd.f32 %v4433_v35, %v4249_v19  ;;  %v3567_v53 = vadd.f32 %v3566_v29, %v8841_v14  ;;  %v8846_v35 = vld [vmem:[#allocation58_spill] sm:$0xff]  ;;  %v8848_v7 = vld [vmem:[#allocation55_spill] sm:$0xff]  ;;  %v4366_v29 = vadd.f32 %v4365_v44, %v8077_v49 }
 0x50d   : > { %v3655_v18 = vpop.f32.mrf.mxu1 }
 0x50e   : > { %v3930_v13 = vmax.f32 %v3831_v15, 0.0  ;;  %3605 = vmatmul.bf16.gmra.mxu0 %v8842_v33  ;;  %3783 = vmatmul.bf16.gmra.mxu2 %v8842_v33  ;;  %v3656_v34 = vadd.f32 %v3655_v18, %v3567_v53  ;;  %v8849_v15 = vld [vmem:[#allocation7_spill] sm:$0xff]  ;;  %v4378_v18 = vrot.slane %v8085_v16, 4 }
 0x510   : > { %v4250_v56 = vmul.f32 %v8840_v9, %v3930_v13  ;;  %3694 = vmatmul.bf16.gmra.mxu1 %v8843_v52  ;;  %3872 = vmatmul.bf16.gmra.mxu3 %v8843_v52  ;;  %v3933_v24 = vmax.f32 %v3656_v34, 0.0 }
 0x511   : > { %v3744_v1 = vpop.f32.mrf.mxu2 }
 0x512   : > { %v4447_v21 = vadd.f32 %v4446_v50, %v4250_v56  ;;  %v3745_v62 = vadd.f32 %v3744_v1, %v8841_v14  ;;  %v4253_v25 = vmul.f32 %v8844_v54, %v3933_v24  ;;  %v8847_v50 = vld [vmem:[#allocation13_spill] sm:$0xff]  ;;  %v8850_v56 = vld [vmem:[#allocation47_spill] sm:$0xff]  ;;  %v4367_v1 = vrot.slane %v4366_v29, 2 }
 0x513   : > { %v3833_v41 = vpop.f32.mrf.mxu3  ;;  %v3568_v22 = vpop.f32.mrf.mxu0 }
 0x514   : > { %v3834_v36 = vadd.f32 %v3833_v41, %v3745_v62  ;;  %v4435_v60 = vadd.f32 %v4434_v37, %v4253_v25  ;;  %v3569_v10 = vadd.f32 %v3568_v22, %v8845_v30 }
 0x515   : > { %v3657_v51 = vpop.f32.mrf.mxu1 }
 0x516   : > { %v3934_v0 = vmax.f32 %v3834_v36, 0.0  ;;  %v3658_v59 = vadd.f32 %v3657_v51, %v3569_v10  ;;  %v4368_v51 = vadd.f32 %v4367_v1, %v4366_v29  ;;  %v8854_v1 = vld [vmem:[#allocation8_spill] sm:$0xff] }
 0x518   : > { %v4254_v8 = vmul.f32 %v8844_v54, %v3934_v0  ;;  %v3937_v39 = vmax.f32 %v3658_v59, 0.0  ;;  %v8851_v54 = vld [vmem:[#allocation22_spill] sm:$0xff] }
 0x519   : > { %v3746_v63 = vpop.f32.mrf.mxu2 }
 0x51a   : > { %v4448_v26 = vadd.f32 %v4447_v21, %v4254_v8  ;;  %v3747_v4 = vadd.f32 %v3746_v63, %v8845_v30  ;;  %v4257_v55 = vmul.f32 %v8846_v35, %v3937_v39  ;;  %v4379_v21 = vadd.f32 %v4378_v18, %v8085_v16  ;;  %v8852_v63 = vld [vmem:[#allocation6_spill] sm:$0xff] }
 0x51b   : > { %v3835_v40 = vpop.f32.mrf.mxu3  ;;  %v3571_v17 = vpop.f32.mrf.mxu0  ;;  %v4369_v39 = vrot.slane %v4368_v51, 1 }
 0x51c   : > { %v3836_v47 = vadd.f32 %v3835_v40, %v3747_v4  ;;  %v4436_v43 = vadd.f32 %v4435_v60, %v4257_v55  ;;  %v3572_v57 = vadd.f32 %v3571_v17, %v8847_v50  ;;  %v4380_v60 = vrot.slane %v4379_v21, 2 }
 0x51d   : > { %v3660_v32 = vpop.f32.mrf.mxu1 }
 0x51e   : > { %v3938_v20 = vmax.f32 %v3836_v47, 0.0  ;;  %3610 = vmatmul.bf16.gmra.mxu0 %v8848_v7  ;;  %3788 = vmatmul.bf16.gmra.mxu2 %v8848_v7  ;;  %v3661_v19 = vadd.f32 %v3660_v32, %v3572_v57  ;;  %v4381_v4 = vadd.f32 %v4380_v60, %v4379_v21  ;;  %v8853_v47 = vld [vmem:[#allocation18_spill] sm:$0xff]  ;;  %v4370_v57 = vadd.f32 %v4369_v39, %v4368_v51 }
 0x520   : > { %v4258_v9 = vmul.f32 %v8846_v35, %v3938_v20  ;;  %3699 = vmatmul.bf16.gmra.mxu1 %v8849_v15  ;;  %3877 = vmatmul.bf16.gmra.mxu3 %v8849_v15  ;;  %v3941_v53 = vmax.f32 %v3661_v19, 0.0  ;;  %v4382_v20 = vrot.slane %v4381_v4, 1 }
 0x521   : > { %v3749_v37 = vpop.f32.mrf.mxu2 }
 0x522   : > { %v4449_v14 = vadd.f32 %v4448_v26, %v4258_v9  ;;  %v3750_v13 = vadd.f32 %v3749_v37, %v8847_v50  ;;  %v4261_v34 = vmul.f32 %v8850_v56, %v3941_v53  ;;  %v4392_v53 = vadd.f32 %v7891_v48, %v4370_v57 }
 0x523   : > { %v3838_v33 = vpop.f32.mrf.mxu3  ;;  %v3573_v24 = vpop.f32.mrf.mxu0 }
 0x524   : > { %v3839_v52 = vadd.f32 %v3838_v33, %v3750_v13  ;;  %v4437_v41 = vadd.f32 %v4436_v43, %v4261_v34  ;;  %v3574_v25 = vadd.f32 %v3573_v24, %v8851_v54  ;;  %v4383_v13 = vadd.f32 %v4382_v20, %v4381_v4 }
 0x525   : > { %v3662_v62 = vpop.f32.mrf.mxu1  ;;  %5264 = vtanh.f32 %v4392_v53  ;;  %v8858_v53 = vld [vmem:[#allocation3_spill] sm:$0xff] }
 0x526   : > { %v3942_v49 = vmax.f32 %v3839_v52, 0.0  ;;  %v3663_v22 = vadd.f32 %v3662_v62, %v3574_v25  ;;  %v4393_v25 = vadd.f32 %v7891_v48, %v4383_v13 }
 0x528   : > { %v4262_v36 = vmul.f32 %v8850_v56, %v3942_v49  ;;  %v3945_v0 = vmax.f32 %v3663_v22, 0.0  ;;  %5266 = vtanh.f32 %v4393_v25 }
 0x529   : > { %v3751_v30 = vpop.f32.mrf.mxu2 }
 0x52a   : > { %v4450_v10 = vadd.f32 %v4449_v14, %v4262_v36  ;;  %v3752_v8 = vadd.f32 %v3751_v30, %v8851_v54  ;;  %v4265_v26 = vmul.f32 %v8852_v63, %v3945_v0  ;;  %v8855_v30 = vld [vmem:[#allocation24_spill] sm:$0xff] }
 0x52b   : > { %v3840_v59 = vpop.f32.mrf.mxu3  ;;  %v3576_v40 = vpop.f32.mrf.mxu0 }
 0x52c   : > { %v3841_v16 = vadd.f32 %v3840_v59, %v3752_v8  ;;  %v4438_v55 = vadd.f32 %v4437_v41, %v4265_v26  ;;  %v3577_v44 = vadd.f32 %v3576_v40, %v8853_v47 }
 0x52d   : > { %v3665_v35 = vpop.f32.mrf.mxu1 }
 0x52e   : > { %v3946_v17 = vmax.f32 %v3841_v16, 0.0  ;;  %v4439_v32 = vrot.slane %v4438_v55, 4  ;;  %v3666_v50 = vadd.f32 %v3665_v35, %v3577_v44 }
 0x530   : > { %v4266_v43 = vmul.f32 %v8852_v63, %v3946_v17  ;;  %v4440_v9 = vadd.f32 %v4439_v32, %v4438_v55  ;;  %v3949_v24 = vmax.f32 %v3666_v50, 0.0  ;;  %v8856_v63 = vld [vmem:[#allocation50_spill] sm:$0xff]  ;;  %v5265_v17 = vpop.eup %5264 }
 0x531   : > { %v3754_v7 = vpop.f32.mrf.mxu2 }
 0x532   : > { %v4451_v19 = vadd.f32 %v4450_v10, %v4266_v43  ;;  %v3755_v15 = vadd.f32 %v3754_v7, %v8853_v47  ;;  %v4441_v18 = vrot.slane %v4440_v9, 2  ;;  %v4269_v10 = vmul.f32 %v8855_v30, %v3949_v24  ;;  %v8857_v47 = vld [vmem:[#allocation12_spill] sm:$0xff] }
 0x533   : > { %v3843_v29 = vpop.f32.mrf.mxu3  ;;  %v3578_v33 = vpop.f32.mrf.mxu0 }
 0x534   : > { %v4452_v37 = vrot.slane %v4451_v19, 4  ;;  %v3844_v14 = vadd.f32 %v3843_v29, %v3755_v15  ;;  %v4442_v34 = vadd.f32 %v4441_v18, %v4440_v9  ;;  %v3579_v21 = vadd.f32 %v3578_v33, %v8854_v1  ;;  %v5267_v15 = vpop.eup %5266 }
 0x535   : > { %v3667_v56 = vpop.f32.mrf.mxu1  ;;  %v4400_v29 = vmul.f32 127.0, %v5265_v17 }
 0x536   : > { %v4453_v52 = vadd.f32 %v4452_v37, %v4451_v19  ;;  %v4443_v62 = vrot.slane %v4442_v34, 1  ;;  %v3668_v54 = vadd.f32 %v3667_v56, %v3579_v21  ;;  %v3950_v39 = vmax.f32 %v3844_v14, 0.0  ;;  %v8859_v21 = vld [vmem:[#allocation25_spill] sm:$0xff] }
 0x538   : > { %v4454_v41 = vrot.slane %v4453_v52, 2  ;;  %v4444_v36 = vadd.f32 %v4443_v62, %v4442_v34  ;;  %v3953_v51 = vmax.f32 %v3668_v54, 0.0  ;;  %v4270_v57 = vmul.f32 %v8855_v30, %v3950_v39 }
 0x539   : > { %v3756_v49 = vpop.f32.mrf.mxu2  ;;  %v4401_v54 = vmul.f32 127.0, %v5267_v15  ;;  %v8862_v15 = vld [vmem:[#allocation57_spill] sm:$0xff] }
 0x53a   : > { %v4455_v22 = vadd.f32 %v4454_v41, %v4453_v52  ;;  %v3757_v60 = vadd.f32 %v3756_v49, %v8854_v1  ;;  %v4460_v8 = vadd.f32 %v4444_v36, %v7891_v48  ;;  %v4273_v26 = vmul.f32 %v8856_v63, %v3953_v51 }
 0x53b   : > { %v3845_v0 = vpop.f32.mrf.mxu3  ;;  %v3581_v4 = vpop.f32.mrf.mxu0  ;;  %v4404_v41 = vfloor.f32 %v4400_v29 }
 0x53c   : > { %v4456_v59 = vrot.slane %v4455_v22, 1  ;;  %v3846_v16 = vadd.f32 %v3845_v0, %v3757_v60  ;;  %5268 = vtanh.f32 %v4460_v8  ;;  %v4504_v55 = vadd.f32 %v4273_v26, %v4269_v10 }
 0x53d   : > { %v3670_v40 = vpop.f32.mrf.mxu1  ;;  %v3582_v44 = vadd.f32 %v3581_v4, %v8857_v47 }
 0x53e   : > { %v4457_v35 = vadd.f32 %v4456_v59, %v4455_v22  ;;  %v3954_v32 = vmax.f32 %v3846_v16, 0.0  ;;  %v4405_v59 = vfloor.f32 %v4401_v54  ;;  %v8860_v16 = vld [vmem:[#allocation23_spill] sm:$0xff]  ;;  %v8864_v54 = vld [vmem:[#allocation5_spill] sm:$0xff] }
 0x53f   : > { %v3671_v50 = vadd.f32 %v3670_v40, %v3582_v44  ;;  %v8861_v44 = vld [vmem:[#allocation36_spill] sm:$0xff] }
 0x540   : > { %v4461_v43 = vadd.f32 %v4457_v35, %v7891_v48  ;;  %v4274_v20 = vmul.f32 %v8856_v63, %v3954_v32 }
 0x541   : > { %v3759_v7 = vpop.f32.mrf.mxu2  ;;  %v3957_v9 = vmax.f32 %v3671_v50, 0.0 }
 0x542   : > { %5270 = vtanh.f32 %v4461_v43  ;;  %v3760_v19 = vadd.f32 %v3759_v7, %v8857_v47  ;;  %v4517_v18 = vadd.f32 %v4274_v20, %v4270_v57  ;;  %v5269_v14 = vpop.eup %5268 }
 0x543   : > { %v3848_v37 = vpop.f32.mrf.mxu3  ;;  %v4277_v13 = vmul.f32 %v8858_v53, %v3957_v9  ;;  %v4468_v56 = vmul.f32 127.0, %v5269_v14  ;;  %v3583_v34 = vpop.f32.mrf.mxu0 }
 0x544   : > { %v3849_v33 = vadd.f32 %v3848_v37, %v3760_v19  ;;  %v3584_v24 = vadd.f32 %v3583_v34, %v8859_v21 }
 0x545   : > { %v3672_v52 = vpop.f32.mrf.mxu1  ;;  %v4505_v1 = vadd.f32 %v4504_v55, %v4277_v13  ;;  %v4472_v25 = vfloor.f32 %v4468_v56  ;;  %v8863_v13 = vld [vmem:[#allocation4_spill] sm:$0xff] }
 0x546   : > { %v3958_v62 = vmax.f32 %v3849_v33, 0.0  ;;  %v3673_v22 = vadd.f32 %v3672_v52, %v3584_v24 }
 0x547   : > { %v8151_v51 = vadd.f32 %v4472_v25, %v4404_v41 }
 0x548   : > { %v5271_v49 = vpop.eup %5270  ;;  %v4278_v36 = vmul.f32 %v8858_v53, %v3958_v62  ;;  %v3961_v0 = vmax.f32 %v3673_v22, 0.0 }
 0x549   : > { %v4469_v60 = vmul.f32 127.0, %v5271_v49  ;;  %v3761_v30 = vpop.f32.mrf.mxu2 }
 0x54a   : > { %v4518_v10 = vadd.f32 %v4517_v18, %v4278_v36  ;;  %v3762_v8 = vadd.f32 %v3761_v30, %v8859_v21  ;;  %v4281_v39 = vmul.f32 %v8860_v16, %v3961_v0  ;;  %v8865_v30 = vld [vmem:[#allocation43_spill] sm:$0xff] }
 0x54b   : > { %v4473_v63 = vfloor.f32 %v4469_v60  ;;  %v3850_v26 = vpop.f32.mrf.mxu3  ;;  %v3586_v35 = vpop.f32.mrf.mxu0 }
 0x54c   : > { %v3851_v4 = vadd.f32 %v3850_v26, %v3762_v8  ;;  %v4506_v47 = vadd.f32 %v4505_v1, %v4281_v39  ;;  %v3587_v17 = vadd.f32 %v3586_v35, %v8861_v44  ;;  %v8866_v35 = vld [vmem:[#allocation41_spill] sm:$0xff] }
 0x54d   : > { %v8155_v40 = vadd.f32 %v4473_v63, %v4405_v59  ;;  %v3675_v55 = vpop.f32.mrf.mxu1 }
 0x54e   : > { %v3962_v32 = vmax.f32 %v3851_v4, 0.0  ;;  %v3676_v50 = vadd.f32 %v3675_v55, %v3587_v17 }
 0x550   : > { %v4282_v43 = vmul.f32 %v8860_v16, %v3962_v32  ;;  %v3965_v7 = vmax.f32 %v3676_v50, 0.0 }
 0x551   : > { %v3764_v57 = vpop.f32.mrf.mxu2 }
 0x552   : > { %v4519_v20 = vadd.f32 %v4518_v10, %v4282_v43  ;;  %v3765_v9 = vadd.f32 %v3764_v57, %v8861_v44  ;;  %v4285_v29 = vmul.f32 %v8862_v15, %v3965_v7  ;;  %v8867_v43 = vld [vmem:[#allocation39_spill] sm:$0xff] }
 0x553   : > { %v3853_v19 = vpop.f32.mrf.mxu3  ;;  %v3588_v37 = vpop.f32.mrf.mxu0 }
 0x554   : > { %v3854_v18 = vadd.f32 %v3853_v19, %v3765_v9  ;;  %v4507_v53 = vadd.f32 %v4506_v47, %v4285_v29  ;;  %v3589_v33 = vadd.f32 %v3588_v37, %v8863_v13  ;;  %v8868_v37 = vld [vmem:[#allocation56_spill] sm:$0xff] }
 0x555   : > { %v3677_v14 = vpop.f32.mrf.mxu1 }
 0x556   : > { %v3966_v56 = vmax.f32 %v3854_v18, 0.0  ;;  %v3678_v52 = vadd.f32 %v3677_v14, %v3589_v33 }
 0x558   : > { %v4286_v34 = vmul.f32 %v8862_v15, %v3966_v56  ;;  %v3969_v24 = vmax.f32 %v3678_v52, 0.0 }
 0x559   : > { %v3766_v1 = vpop.f32.mrf.mxu2 }
 0x55a   : > { %v4520_v21 = vadd.f32 %v4519_v20, %v4286_v34  ;;  %v3767_v62 = vadd.f32 %v3766_v1, %v8863_v13  ;;  %v4289_v25 = vmul.f32 %v8864_v54, %v3969_v24 }
 0x55b   : > { %v3855_v41 = vpop.f32.mrf.mxu3  ;;  %v3591_v36 = vpop.f32.mrf.mxu0 }
 0x55c   : > { %v3856_v49 = vadd.f32 %v3855_v41, %v3767_v62  ;;  %v4508_v60 = vadd.f32 %v4507_v53, %v4289_v25  ;;  %v3592_v10 = vadd.f32 %v3591_v36, %v8865_v30 }
 0x55d   : > { %v3680_v22 = vpop.f32.mrf.mxu1 }
 0x55e   : > { %v3970_v0 = vmax.f32 %v3856_v49, 0.0  ;;  %v3681_v59 = vadd.f32 %v3680_v22, %v3592_v10 }
 0x560   : > { %v4290_v8 = vmul.f32 %v8864_v54, %v3970_v0  ;;  %v3973_v16 = vmax.f32 %v3681_v59, 0.0 }
 0x561   : > { %v3769_v63 = vpop.f32.mrf.mxu2 }
 0x562   : > { %v4521_v26 = vadd.f32 %v4520_v21, %v4290_v8  ;;  %v3770_v39 = vadd.f32 %v3769_v63, %v8865_v30  ;;  %v4293_v55 = vmul.f32 %v8866_v35, %v3973_v16 }
 0x563   : > { %v3858_v4 = vpop.f32.mrf.mxu3  ;;  %v3593_v44 = vpop.f32.mrf.mxu0 }
 0x564   : > { %v3859_v47 = vadd.f32 %v3858_v4, %v3770_v39  ;;  %v4509_v32 = vadd.f32 %v4508_v60, %v4293_v55  ;;  %v3594_v50 = vadd.f32 %v3593_v44, %v8867_v43 }
 0x565   : > { %v3682_v17 = vpop.f32.mrf.mxu1 }
 0x566   : > { %v3974_v57 = vmax.f32 %v3859_v47, 0.0  ;;  %v3683_v7 = vadd.f32 %v3682_v17, %v3594_v50 }
 0x568   : > { %v4294_v20 = vmul.f32 %v8866_v35, %v3974_v57  ;;  %v3977_v15 = vmax.f32 %v3683_v7, 0.0 }
 0x569   : > { %v3771_v9 = vpop.f32.mrf.mxu2 }
 0x56a   : > { %v4522_v19 = vadd.f32 %v4521_v26, %v4294_v20  ;;  %v3772_v29 = vadd.f32 %v3771_v9, %v8867_v43  ;;  %v4297_v14 = vmul.f32 %v8868_v37, %v3977_v15 }
 0x56b   : > { %v3860_v18 = vpop.f32.mrf.mxu3  ;;  %v3596_v13 = vpop.f32.mrf.mxu0 }
 0x56c   : > { %v3861_v53 = vadd.f32 %v3860_v18, %v3772_v29  ;;  %v4510_v56 = vadd.f32 %v4509_v32, %v4297_v14 }
 0x56d   : > { %v3685_v33 = vpop.f32.mrf.mxu1 }
 0x56e   : > { %v3978_v34 = vmax.f32 %v3861_v53, 0.0  ;;  %v4511_v52 = vrot.slane %v4510_v56, 4 }
 0x570   : > { %v4298_v1 = vmul.f32 %v8868_v37, %v3978_v34  ;;  %v4512_v24 = vadd.f32 %v4511_v52, %v4510_v56  ;;  %v3597_v34 = vadd.f32 %v3596_v13, %v8819_v12 }
 0x571   : > { %v3774_v21 = vpop.f32.mrf.mxu2 }
 0x572   : > { %v4523_v62 = vadd.f32 %v4522_v19, %v4298_v1  ;;  %v4513_v54 = vrot.slane %v4512_v24, 2 }
 0x573   : > { %v3863_v41 = vpop.f32.mrf.mxu3  ;;  %v3598_v49 = vpop.f32.mrf.mxu0 }
 0x574   : > { %v4524_v25 = vrot.slane %v4523_v62, 4  ;;  %v4514_v22 = vadd.f32 %v4513_v54, %v4512_v24  ;;  %v3599_v53 = vadd.f32 %v3598_v49, %v8822_v6 }
 0x575   : > { %v3687_v36 = vpop.f32.mrf.mxu1 }
 0x576   : > { %v4525_v60 = vadd.f32 %v4524_v25, %v4523_v62  ;;  %v4515_v30 = vrot.slane %v4514_v22, 1  ;;  %v3688_v24 = vadd.f32 %v3687_v36, %v3599_v53 }
 0x578   : > { %v4526_v10 = vrot.slane %v4525_v60, 2  ;;  %v4516_v8 = vadd.f32 %v4515_v30, %v4514_v22  ;;  %v3686_v22 = vadd.f32 %v3685_v33, %v3597_v34 }
 0x579   : > { %v3776_v0 = vpop.f32.mrf.mxu2 }
 0x57a   : > { %v4527_v59 = vadd.f32 %v4526_v10, %v4525_v60  ;;  %v4532_v26 = vadd.f32 %v4516_v8, %v7891_v48  ;;  %v3985_v10 = vmax.f32 %v3688_v24, 0.0 }
 0x57b   : > { %v3865_v63 = vpop.f32.mrf.mxu3  ;;  %v3601_v39 = vpop.f32.mrf.mxu0 }
 0x57c   : > { %v4528_v16 = vrot.slane %v4527_v59, 1  ;;  %5272 = vtanh.f32 %v4532_v26  ;;  %v3602_v1 = vadd.f32 %v3601_v39, %v8823_v46 }
 0x57d   : > { %v3690_v4 = vpop.f32.mrf.mxu1 }
 0x57e   : > { %v4529_v35 = vadd.f32 %v4528_v16, %v4527_v59  ;;  %v3691_v30 = vadd.f32 %v3690_v4, %v3602_v1 }
 0x580   : > { %v4533_v55 = vadd.f32 %v4529_v35, %v7891_v48 }
 0x581   : > { %v3779_v47 = vpop.f32.mrf.mxu2 }
 0x582   : > { %5274 = vtanh.f32 %v4533_v55  ;;  %v5273_v17 = vpop.eup %5272  ;;  %v3780_v60 = vadd.f32 %v3779_v47, %v8823_v46  ;;  %v4305_v46 = vmul.f32 %v7924_v28, %v3985_v10 }
 0x583   : > { %v3868_v44 = vpop.f32.mrf.mxu3  ;;  %v4540_v32 = vmul.f32 127.0, %v5273_v17  ;;  %v3603_v43 = vpop.f32.mrf.mxu0 }
 0x584   : > { %v3604_v25 = vadd.f32 %v3603_v43, %v8826_v27  ;;  %v3869_v16 = vadd.f32 %v3868_v44, %v3780_v60  ;;  %v8869_v43 = vld [vmem:[#allocation53_spill] sm:$0xff] }
 0x585   : > { %v3692_v50 = vpop.f32.mrf.mxu1  ;;  %v4544_v57 = vfloor.f32 %v4540_v32 }
 0x586   : > { %v3693_v36 = vadd.f32 %v3692_v50, %v3604_v25  ;;  %v3990_v50 = vmax.f32 %v3869_v16, 0.0 }
 0x587   : > { %v8177_v7 = vadd.f32 %v4544_v57, %v8151_v51  ;;  %v3777_v51 = vadd.f32 %v3776_v0, %v8822_v6  ;;  %v3981_v0 = vmax.f32 %v3686_v22, 0.0 }
 0x588   : > { %v5275_v20 = vpop.eup %5274  ;;  %v3993_v47 = vmax.f32 %v3693_v36, 0.0  ;;  %v4310_v1 = vmul.f32 %v7930_v2, %v3990_v50 }
 0x589   : > { %v4541_v9 = vmul.f32 127.0, %v5275_v20  ;;  %v3781_v19 = vpop.f32.mrf.mxu2  ;;  %v3866_v13 = vadd.f32 %v3865_v63, %v3777_v51 }
 0x58a   : > { %v3782_v8 = vadd.f32 %v3781_v19, %v8826_v27 }
 0x58b   : > { %v4545_v15 = vfloor.f32 %v4541_v9  ;;  %v3870_v29 = vpop.f32.mrf.mxu3  ;;  %v3606_v37 = vpop.f32.mrf.mxu0  ;;  %v3986_v4 = vmax.f32 %v3866_v13, 0.0 }
 0x58c   : > { %v3607_v49 = vadd.f32 %v3606_v37, %v7659_v23  ;;  %v3871_v35 = vadd.f32 %v3870_v29, %v3782_v8 }
 0x58d   : > { %v8180_v18 = vadd.f32 %v4545_v15, %v8155_v40  ;;  %v3695_v14 = vpop.f32.mrf.mxu1  ;;  %v3775_v40 = vadd.f32 %v3774_v21, %v8819_v12  ;;  %v3989_v12 = vmax.f32 %v3691_v30, 0.0  ;;  %v4306_v15 = vmul.f32 %v7924_v28, %v3986_v4  ;;  %v8870_v30 = vld [vmem:[#allocation26_spill] sm:$0xff] }
 0x58e   : > { %v3696_v21 = vadd.f32 %v3695_v14, %v3607_v49  ;;  %v3994_v29 = vmax.f32 %v3871_v35, 0.0  ;;  %v4313_v14 = vmul.f32 %v7938_v42, %v3993_v47 }
 0x58f   : > { %v3864_v26 = vadd.f32 %v3863_v41, %v3775_v40  ;;  %v4301_v41 = vmul.f32 %v8869_v43, %v3981_v0  ;;  %v4309_v57 = vmul.f32 %v7930_v2, %v3989_v12 }
 0x590   : > { %v3997_v20 = vmax.f32 %v3696_v21, 0.0  ;;  %v4314_v22 = vmul.f32 %v7938_v42, %v3994_v29 }
 0x591   : > { %v3784_v56 = vpop.f32.mrf.mxu2  ;;  %v3982_v44 = vmax.f32 %v3864_v26, 0.0  ;;  %v4576_v19 = vadd.f32 %v4305_v46, %v4301_v41 }
 0x592   : > { %v3785_v33 = vadd.f32 %v3784_v56, %v7659_v23 }
 0x593   : > { %v3873_v52 = vpop.f32.mrf.mxu3  ;;  %v3608_v62 = vpop.f32.mrf.mxu0  ;;  %v4302_v34 = vmul.f32 %v8869_v43, %v3982_v44  ;;  %v4577_v51 = vadd.f32 %v4576_v19, %v4309_v57 }
 0x594   : > { %v3609_v6 = vadd.f32 %v3608_v62, %v7630_v3  ;;  %v3874_v23 = vadd.f32 %v3873_v52, %v3785_v33  ;;  %v4317_v62 = vmul.f32 %v7857_v61, %v3997_v20 }
 0x595   : > { %v3697_v54 = vpop.f32.mrf.mxu1  ;;  %v4589_v28 = vadd.f32 %v4306_v15, %v4302_v34  ;;  %v4578_v60 = vadd.f32 %v4577_v51, %v4313_v14 }
 0x596   : > { %v3698_v27 = vadd.f32 %v3697_v54, %v3609_v6  ;;  %v3998_v52 = vmax.f32 %v3874_v23, 0.0 }
 0x597   : > { %v4590_v13 = vadd.f32 %v4589_v28, %v4310_v1 }
 0x598   : > { %v4001_v53 = vmax.f32 %v3698_v27, 0.0  ;;  %v4318_v2 = vmul.f32 %v7857_v61, %v3998_v52 }
 0x599   : > { %v3786_v59 = vpop.f32.mrf.mxu2  ;;  %v4591_v26 = vadd.f32 %v4590_v13, %v4314_v22 }
 0x59a   : > { %v3787_v17 = vadd.f32 %v3786_v59, %v7630_v3  ;;  %v4321_v49 = vmul.f32 %v8870_v30, %v4001_v53  ;;  %v4579_v59 = vadd.f32 %v4578_v60, %v4317_v62 }
 0x59b   : > { %v3875_v39 = vpop.f32.mrf.mxu3  ;;  %v3611_v55 = vpop.f32.mrf.mxu0  ;;  %v4592_v21 = vadd.f32 %v4591_v26, %v4318_v2 }
 0x59c   : > { %v3612_v32 = vadd.f32 %v3611_v55, %v7667_v11  ;;  %v3876_v3 = vadd.f32 %v3875_v39, %v3787_v17  ;;  %v4580_v33 = vadd.f32 %v4579_v59, %v4321_v49 }
 0x59d   : > { %v3700_v63 = vpop.f32.mrf.mxu1 }
 0x59e   : > { %v3701_v9 = vadd.f32 %v3700_v63, %v3612_v32  ;;  %v4002_v10 = vmax.f32 %v3876_v3, 0.0 }
 0x5a0   : > { %v4005_v54 = vmax.f32 %v3701_v9, 0.0  ;;  %v4322_v42 = vmul.f32 %v8870_v30, %v4002_v10 }
 0x5a1   : > { %v3789_v37 = vpop.f32.mrf.mxu2 }
 0x5a2   : > { %v3790_v56 = vadd.f32 %v3789_v37, %v7667_v11  ;;  %v4325_v36 = vmul.f32 %v8011_v45, %v4005_v54  ;;  %v4593_v63 = vadd.f32 %v4592_v21, %v4322_v42 }
 0x5a3   : > { %v3878_v24 = vpop.f32.mrf.mxu3  ;;  %v3613_v40 = vpop.f32.mrf.mxu0 }
 0x5a4   : > { %v3879_v25 = vadd.f32 %v3878_v24, %v3790_v56  ;;  %v3614_v11 = vadd.f32 %v3613_v40, %v7683_v5  ;;  %v4581_v4 = vadd.f32 %v4580_v33, %v4325_v36 }
 0x5a5   : > { %v3702_v8 = vpop.f32.mrf.mxu1 }
 0x5a6   : > { %v4006_v6 = vmax.f32 %v3879_v25, 0.0  ;;  %v3703_v0 = vadd.f32 %v3702_v8, %v3614_v11 }
 0x5a8   : > { %v4009_v39 = vmax.f32 %v3703_v0, 0.0  ;;  %v4326_v35 = vmul.f32 %v8011_v45, %v4006_v6 }
 0x5a9   : > { %v3791_v16 = vpop.f32.mrf.mxu2 }
 0x5aa   : > { %v3792_v12 = vadd.f32 %v3791_v16, %v7683_v5  ;;  %v4329_v61 = vmul.f32 %v8017_v58, %v4009_v39  ;;  %v4594_v17 = vadd.f32 %v4593_v63, %v4326_v35 }
 0x5ab   : > { %v3880_v46 = vpop.f32.mrf.mxu3 }
 0x5ac   : > { %v3881_v55 = vadd.f32 %v3880_v46, %v3792_v12  ;;  %v4582_v47 = vadd.f32 %v4581_v4, %v4329_v61 }
 0x5ae   : > { %v4010_v27 = vmax.f32 %v3881_v55, 0.0  ;;  %v4583_v32 = vrot.slane %v4582_v47, 4 }
 0x5b0   : > { %v4330_v43 = vmul.f32 %v8017_v58, %v4010_v27  ;;  %v4584_v41 = vadd.f32 %v4583_v32, %v4582_v47 }
 0x5b2   : > { %v4595_v44 = vadd.f32 %v4594_v17, %v4330_v43  ;;  %v4585_v50 = vrot.slane %v4584_v41, 2 }
 0x5b4   : > { %v4596_v23 = vrot.slane %v4595_v44, 4  ;;  %v4586_v5 = vadd.f32 %v4585_v50, %v4584_v41 }
 0x5b6   : > { %v4597_v57 = vadd.f32 %v4596_v23, %v4595_v44  ;;  %v4587_v20 = vrot.slane %v4586_v5, 1 }
 0x5b8   : > { %v4598_v9 = vrot.slane %v4597_v57, 2  ;;  %v4588_v19 = vadd.f32 %v4587_v20, %v4586_v5 }
 0x5ba   : > { %v4599_v45 = vadd.f32 %v4598_v9, %v4597_v57  ;;  %v4604_v15 = vadd.f32 %v4588_v19, %v7891_v48 }
 0x5bc   : > { %v4600_v29 = vrot.slane %v4599_v45, 1  ;;  %5276 = vtanh.f32 %v4604_v15 }
 0x5be   : > { %v4601_v37 = vadd.f32 %v4600_v29, %v4599_v45 }
 0x5c0   : > { %v4605_v14 = vadd.f32 %v4601_v37, %v7891_v48 }
 0x5c2   : > { %5278 = vtanh.f32 %v4605_v14  ;;  %v5277_v53 = vpop.eup %5276 }
 0x5c3   : > { %v4612_v58 = vmul.f32 127.0, %v5277_v53 }
 0x5c5   : > { %v4616_v3 = vfloor.f32 %v4612_v58 }
 0x5c7   : > { %v4620_v34 = vadd.f32 %v4616_v3, %v8177_v7 }
 0x5c8   : > { %v5279_v56 = vpop.eup %5278 }
 0x5c9   : > { %v4613_v1 = vmul.f32 127.0, %v5279_v56  ;;  %4625 = sbr.rel (%p5129_p6) target bundleno = 1494 (0x5d6), region = 64 }
 0x5cb   : > { %v4617_v52 = vfloor.f32 %v4613_v1 }
 0x5cd   : > { %v4621_v24 = vadd.f32 %v4617_v52, %v8180_v18 }
 0x5ce   : > { %v4631_v51 = vrot.slane %v8051_v38, 7  ;;  %v4632_v62 = vrot.slane %v4620_v34, 6  ;;  %vm4634_vm1 = vcmask 1040384   ;;  %v4626_v48 = vld [vmem:[%s8254_s9] sm:$0xf]  ;;  %vm4636_vm2 = vcmask 1042434  }
 0x5cf   : > { %v4633_v54 = vrot.slane %v4621_v24, 5  ;;  %vm4638_vm3 = vcmask 1041408   ;;  %v4642_v25 = vlaneseq }
 0x5d0   : > { %v4635_v7 = vsel %vm4634_vm1, %v8045_v31, %v4631_v51 }
 0x5d1   : > { %v4637_v28 = vsel %vm4636_vm2, %v4632_v62, %v4633_v54  ;;  %vm4644_vm4 = vcmp.lt.s32.totalorder %v4642_v25, 512 }
 0x5d2   : > { %v4639_v22 = vsel %vm4638_vm3, %v4635_v7, %v4637_v28 }
 0x5d3   : > { %v4641_v18 = vadd.f32 %v4639_v22, %v4626_v48 }
 0x5d5   : > { %4646 = vst.msk [vmem:[%s8254_s9] sm:$0xf] %vm4644_vm4, %v4641_v18 }
 0x5d6 PF: > { %p5130_p7 = scmp.lt.s32.totalorder %s5298_s13, 3 }
 0x5d8   : > { %4650 = sbr.rel (%p5130_p7) target bundleno = 1508 (0x5e4), region = 68 }
 0x5dd   : > { %v4656_v40 = vrot.slane %v8051_v38, 7  ;;  %v4657_v60 = vrot.slane %v4620_v34, 6  ;;  %v4658_v30 = vrot.slane %v4621_v24, 5  ;;  %vm4659_vm5 = vcmask 1040384   ;;  %v4651_v49 = vld [vmem:[%s8255_s10] sm:$0xf] }
 0x5de   : > { %vm4661_vm6 = vcmask 1042434   ;;  %vm4663_vm7 = vcmask 1041408   ;;  %v4667_v10 = vlaneseq }
 0x5df   : > { %v4660_v11 = vsel %vm4659_vm5, %v8045_v31, %v4656_v40  ;;  %v4662_v13 = vsel %vm4661_vm6, %v4657_v60, %v4658_v30 }
 0x5e0   : > { %v4664_v2 = vsel %vm4663_vm7, %v4660_v11, %v4662_v13  ;;  %vm4669_vm8 = vcmp.lt.s32.totalorder %v4667_v10, 512 }
 0x5e1   : > { %v4666_v8 = vadd.f32 %v4664_v2, %v4651_v49 }
 0x5e3   : > { %4671 = vst.msk [vmem:[%s8255_s10] sm:$0xf] %vm4669_vm8, %v4666_v8 }
 0x5e4 PF: > { %s21_s15 = sadd.s32 1, %s5306_s15   ;;  %s8871_s24 = sld [smem:[#allocation2_spill]] }
 0x5e5   : > { %p18_p8 = scmp.ge.s32.totalorder %s21_s15, 7   ;;  %s8872_s13 = smov %s5302_s14 }
 0x5e7   :  { %20 = sbr.rel (!%p18_p8) target bundleno = 4 (0x4), region = 134 }
 0x5ea   : > { %s8873_s14 = smov %s8871_s24 }

</bundles_post_ra>
